<compile_context>
chip_gen: v5e
topology: v5e:2x2
jax: 0.10.0
libtpu: 0.0.40
codegen_flags: <defaults>
</compile_context>

<pallas_src>
import jax
import jax.numpy as jnp
from jax import lax
from jax.experimental import pallas as pl
from jax.experimental.pallas import tpu as pltpu

H1 = 64
H2 = 32
OUT = 1
LANE = 128          # vreg lane width; one lane-major output row = 128 batch rows
SUB = 128           # rows per in-kernel compute sub-tile
TILE_UNIT = 1024    # multi-block batch tiles are multiples of this (keeps the
                    # output block's sublane count a multiple of 8)
DEFAULT_BLOCK_B = 4096
MIN_PALLAS_ROWS = 256   # below this, plain fused XLA dots beat the kernel launch


def _round_up(n, m):
    return ((n + m - 1) // m) * m


def _mlp_kernel(x_ref, w1_ref, b1_ref, w2_ref, b2_ref, w3_ref, b3_ref, eye_ref,
                o_ref):
    """One batch tile: x (TB, D) f32 -> lane-major logits (TB//128, 128) f32."""
    n_sub = x_ref.shape[0] // SUB   # static

    # Weights / biases are tiny and VMEM-resident; read them once per block.
    w1 = w1_ref[...]                # (D, 64)
    b1 = b1_ref[...]                # (1, 64)
    w2 = w2_ref[...]                # (64, 32)
    b2 = b2_ref[...]                # (1, 32)
    w3 = w3_ref[...]                # (1, 32)  final-layer weights as a row
    b3 = b3_ref[...]                # (1, 1)

    def body(j, carry):
        off = pl.multiple_of(j * SUB, SUB)
        xs = x_ref[pl.ds(off, SUB), :]                                # (SUB, D)

        # Layer 1 + ReLU (MXU matmul, f32 accumulation; bias/ReLU on the VPU).
        h1 = jnp.dot(xs, w1, preferred_element_type=jnp.float32) + b1
        h1 = jnp.maximum(h1, 0.0)                                     # (SUB, 64)

        # Layer 2 + ReLU.
        h2 = jnp.dot(h1, w2, preferred_element_type=jnp.float32) + b2
        h2 = jnp.maximum(h2, 0.0)                                     # (SUB, 32)

        # Output layer (K=32, N=1) on the VPU/XLU: per-row dot with the weight
        # row, then bias.  Produces the logit column.
        ycol = jnp.sum(h2 * w3, axis=1, keepdims=True) + b3           # (SUB, 1)

        # Sublane -> lane transpose of the logit column via the (idle) MXU:
        # ycol^T @ I == (1, SUB).  dW-style dimension numbers (contract 0/0).
        yrow = lax.dot_general(ycol, eye_ref[...],
                               (((0,), (0,)), ((), ())),
                               preferred_element_type=jnp.float32)    # (1, 128)

        # Lane-dense, unmasked store of one full output row.
        o_ref[pl.ds(j, 1), :] = yrow.astype(o_ref.dtype)
        return carry

    lax.fori_loop(0, n_sub, body, 0, unroll=True)


def pfas_risk_mlp(x, params, *, block_b=DEFAULT_BLOCK_B,
                  min_pallas_rows=MIN_PALLAS_ROWS):
    """Fused MLP forward. x: (B, input_size) f32 -> (B, 1) f32."""
    w1, b1, w2, b2, w3, b3 = params
    B, D = x.shape

    # Small-batch fallback: launch + padding overhead beats any kernel gain.
    if B < min_pallas_rows:
        return reference_mlp(x, params)

    w3_row = jnp.reshape(w3, (1, H2))            # (32,1) -> (1,32) row vector
    eye = jnp.eye(LANE, dtype=jnp.float32)       # for the column->row transpose

    # Batch tiling: lane-major output needs 128-row groups.  Multi-block tiles
    # are multiples of 1024 (output-block sublanes stay a multiple of 8), and
    # we keep the grid length >= 2 whenever possible so ("parallel",) can
    # shard the batch across both TensorCores on v7x.
    rb = _round_up(B, LANE)
    if rb < 2 * TILE_UNIT:
        tb = rb                                   # single block (full-dim spec)
    else:
        tb = max(TILE_UNIT, (min(block_b, rb // 2) // TILE_UNIT) * TILE_UNIT)
    bp = _round_up(B, tb)
    xp = x if bp == B else jnp.pad(x, ((0, bp - B), (0, 0)))

    grid = (bp // tb,)
    n_rows = bp // LANE
    blk_rows = tb // LANE

    flops = 2 * bp * (D * H1 + H1 * H2 + H2 + LANE)
    bytes_accessed = (bp * D * 4 + bp * 4
                      + 4 * (w1.size + b1.size + w2.size + b2.size
                             + w3.size + b3.size + eye.size))

    out_lanes = pl.pallas_call(
        _mlp_kernel,
        out_shape=jax.ShapeDtypeStruct((n_rows, LANE), jnp.float32),
        grid=grid,
        in_specs=[
            pl.BlockSpec((tb, D), lambda i: (i, 0)),        # x: streamed per tile
            pl.BlockSpec((D, H1), lambda i: (0, 0)),        # weights: VMEM-resident
            pl.BlockSpec((1, H1), lambda i: (0, 0)),
            pl.BlockSpec((H1, H2), lambda i: (0, 0)),
            pl.BlockSpec((1, H2), lambda i: (0, 0)),
            pl.BlockSpec((1, H2), lambda i: (0, 0)),        # w3 as a (1,32) row
            pl.BlockSpec((1, 1), lambda i: (0, 0)),         # b3
            pl.BlockSpec((LANE, LANE), lambda i: (0, 0)),   # identity for transpose
        ],
        out_specs=pl.BlockSpec((blk_rows, LANE), lambda i: (i, 0)),
        compiler_params=pltpu.CompilerParams(
            dimension_semantics=("parallel",)),
        cost_estimate=pl.CostEstimate(
            flops=flops, transcendentals=0, bytes_accessed=bytes_accessed),
    )(xp, w1, b1, w2, b2, w3_row, b3, eye)

    # Row-major (n_rows, 128) flattens exactly to logits for rows 0..bp-1.
    return out_lanes.reshape(bp)[:B].reshape(B, OUT)


def init_params(key, input_size):
    """Deterministic init mimicking nn.Linear's U(-1/sqrt(fan_in), 1/sqrt(fan_in))."""
    def linear_init(k, fan_in, fan_out):
        kw, kb = jax.random.split(k)
        bound = 1.0 / jnp.sqrt(fan_in)
        # Stored as (in, out) so the kernel computes x @ W directly.
        w = jax.random.uniform(kw, (fan_in, fan_out), jnp.float32, -bound, bound)
        b = jax.random.uniform(kb, (1, fan_out), jnp.float32, -bound, bound)
        return w, b

    k1, k2, k3 = jax.random.split(key, 3)
    w1, b1 = linear_init(k1, input_size, H1)
    w2, b2 = linear_init(k2, H1, H2)
    w3, b3 = linear_init(k3, H2, OUT)
    return (w1, b1, w2, b2, w3, b3)


def reference_mlp(x, params):
    """Plain-JAX f32 reference of the PyTorch forward pass."""
    w1, b1, w2, b2, w3, b3 = params
    h1 = jnp.maximum(x @ w1 + b1, 0.0)
    h2 = jnp.maximum(h1 @ w2 + b2, 0.0)
    return h2 @ w3 + b3


if __name__ == "__main__":
    key = jax.random.PRNGKey(0)
    kx, kp = jax.random.split(key)

    input_size = 16   # number of PFAS / environmental features
    batch = 2000      # exercises the multi-step grid, batch padding and sub-tiling
    x = jax.random.normal(kx, (batch, input_size), dtype=jnp.float32)
    params = init_params(kp, input_size)

    out = jax.block_until_ready(pfas_risk_mlp(x, params))
    ref = reference_mlp(x, params)
    assert out.shape == (batch, OUT), out.shape
    # Everything is f32 now; the tolerance only covers possible default-precision
    # (multi-pass bf16) differences between the Mosaic and XLA matmul paths.
    assert jnp.allclose(out, ref, atol=2e-2, rtol=2e-2), \
        float(jnp.max(jnp.abs(out - ref)))

    # Small-batch fallback path (plain XLA dots).
    xs = x[:8]
    outs = jax.block_until_ready(pfas_risk_mlp(xs, params))
    assert outs.shape == (8, OUT)
    assert jnp.allclose(outs, reference_mlp(xs, params), atol=1e-5, rtol=1e-5)

    print("KERNEL_OK")
</pallas_src>

<mosaic_0001>
module attributes {stable_mosaic.version = 11 : i64} {
  func.func @_mlp_kernel(%arg0: i32, %arg1: memref<1024x16xf32, #tpu.memory_space<vmem>>, %arg2: memref<16x64xf32, #tpu.memory_space<vmem>>, %arg3: memref<1x64xf32, #tpu.memory_space<vmem>>, %arg4: memref<64x32xf32, #tpu.memory_space<vmem>>, %arg5: memref<1x32xf32, #tpu.memory_space<vmem>>, %arg6: memref<1x32xf32, #tpu.memory_space<vmem>>, %arg7: memref<1x1xf32, #tpu.memory_space<vmem>>, %arg8: memref<128x128xf32, #tpu.memory_space<vmem>>, %arg9: memref<8x128xf32, #tpu.memory_space<vmem>>) attributes {dimension_semantics = [#tpu.dimension_semantics<parallel>], iteration_bounds = array<i64: 2>, scalar_prefetch = 0 : i64, scratch_operands = 0 : i64, tpu.core_type = #tpu.core_type<tc>, window_params = [{transform_indices = @transform_0, window_bounds = array<i64: 1024, 16>}, {pipeline_mode = #tpu.pipeline_mode<synchronous>, transform_indices = @transform_1, window_bounds = array<i64: 16, 64>}, {pipeline_mode = #tpu.pipeline_mode<synchronous>, transform_indices = @transform_2, window_bounds = array<i64: 1, 64>}, {pipeline_mode = #tpu.pipeline_mode<synchronous>, transform_indices = @transform_3, window_bounds = array<i64: 64, 32>}, {pipeline_mode = #tpu.pipeline_mode<synchronous>, transform_indices = @transform_4, window_bounds = array<i64: 1, 32>}, {pipeline_mode = #tpu.pipeline_mode<synchronous>, transform_indices = @transform_5, window_bounds = array<i64: 1, 32>}, {pipeline_mode = #tpu.pipeline_mode<synchronous>, transform_indices = @transform_6, window_bounds = array<i64: 1, 1>}, {pipeline_mode = #tpu.pipeline_mode<synchronous>, transform_indices = @transform_7, window_bounds = array<i64: 128, 128>}, {transform_indices = @transform_8, window_bounds = array<i64: 8, 128>}]} {
    %c0 = arith.constant 0 : index
    %c0_0 = arith.constant 0 : index
    %0 = vector.load %arg2[%c0, %c0_0] : memref<16x64xf32, #tpu.memory_space<vmem>>, vector<16x64xf32>
    %c0_1 = arith.constant 0 : index
    %c0_2 = arith.constant 0 : index
    %1 = vector.load %arg3[%c0_1, %c0_2] : memref<1x64xf32, #tpu.memory_space<vmem>>, vector<1x64xf32>
    %c0_3 = arith.constant 0 : index
    %c0_4 = arith.constant 0 : index
    %2 = vector.load %arg4[%c0_3, %c0_4] : memref<64x32xf32, #tpu.memory_space<vmem>>, vector<64x32xf32>
    %c0_5 = arith.constant 0 : index
    %c0_6 = arith.constant 0 : index
    %3 = vector.load %arg5[%c0_5, %c0_6] : memref<1x32xf32, #tpu.memory_space<vmem>>, vector<1x32xf32>
    %c0_7 = arith.constant 0 : index
    %c0_8 = arith.constant 0 : index
    %4 = vector.load %arg6[%c0_7, %c0_8] : memref<1x32xf32, #tpu.memory_space<vmem>>, vector<1x32xf32>
    %c0_9 = arith.constant 0 : index
    %c0_10 = arith.constant 0 : index
    %5 = vector.load %arg7[%c0_9, %c0_10] : memref<1x1xf32, #tpu.memory_space<vmem>>, vector<1x1xf32>
    %c0_i32 = arith.constant 0 : i32
    %c128_i32 = arith.constant 128 : i32
    %6 = arith.muli %c0_i32, %c128_i32 : i32
    %7 = tpu.assume_multiple %6, 128 : i32
    %8 = arith.index_cast %7 : i32 to index
    %c0_11 = arith.constant 0 : index
    %9 = vector.load %arg1[%8, %c0_11] : memref<1024x16xf32, #tpu.memory_space<vmem>>, vector<128x16xf32>
    %cst = arith.constant dense<0.000000e+00> : vector<128x64xf32>
    %10 = tpu.matmul %9, %0, %cst {dimension_numbers = #tpu.dot_dimension_numbers<[1], [0], [0], [1], [0, 0, 1, 1], [], []>} : vector<128x16xf32>, vector<16x64xf32>, vector<128x64xf32> -> vector<128x64xf32>
    %11 = vector.broadcast %1 : vector<1x64xf32> to vector<128x64xf32>
    %12 = arith.addf %10, %11 : vector<128x64xf32>
    %cst_12 = arith.constant 0.000000e+00 : f32
    %13 = vector.broadcast %cst_12 : f32 to vector<128x64xf32>
    %14 = arith.maximumf %12, %13 : vector<128x64xf32>
    %cst_13 = arith.constant dense<0.000000e+00> : vector<128x32xf32>
    %15 = tpu.matmul %14, %2, %cst_13 {dimension_numbers = #tpu.dot_dimension_numbers<[1], [0], [0], [1], [0, 0, 1, 1], [], []>} : vector<128x64xf32>, vector<64x32xf32>, vector<128x32xf32> -> vector<128x32xf32>
    %16 = vector.broadcast %3 : vector<1x32xf32> to vector<128x32xf32>
    %17 = arith.addf %15, %16 : vector<128x32xf32>
    %cst_14 = arith.constant 0.000000e+00 : f32
    %18 = vector.broadcast %cst_14 : f32 to vector<128x32xf32>
    %19 = arith.maximumf %17, %18 : vector<128x32xf32>
    %20 = vector.broadcast %4 : vector<1x32xf32> to vector<128x32xf32>
    %21 = arith.mulf %19, %20 : vector<128x32xf32>
    %cst_15 = arith.constant dense<0.000000e+00> : vector<128xf32>
    %22 = vector.multi_reduction <add>, %21, %cst_15 [1] : vector<128x32xf32> to vector<128xf32>
    %23 = vector.shape_cast %22 : vector<128xf32> to vector<128x1xf32>
    %24 = vector.broadcast %5 : vector<1x1xf32> to vector<128x1xf32>
    %25 = arith.addf %23, %24 : vector<128x1xf32>
    %c0_16 = arith.constant 0 : index
    %c0_17 = arith.constant 0 : index
    %26 = vector.load %arg8[%c0_16, %c0_17] : memref<128x128xf32, #tpu.memory_space<vmem>>, vector<128x128xf32>
    %cst_18 = arith.constant dense<0.000000e+00> : vector<1x128xf32>
    %27 = tpu.matmul %25, %26, %cst_18 {dimension_numbers = #tpu.dot_dimension_numbers<[0], [0], [1], [1], [0, 1, 1, 1], [], []>} : vector<128x1xf32>, vector<128x128xf32>, vector<1x128xf32> -> vector<1x128xf32>
    %28 = arith.index_cast %c0_i32 : i32 to index
    %c0_19 = arith.constant 0 : index
    %29 = vector.load %arg9[%28, %c0_19] : memref<8x128xf32, #tpu.memory_space<vmem>>, vector<1x128xf32>
    tpu.vector_store %arg9[%28, %c0_19], %27 {strides = array<i32>} : memref<8x128xf32, #tpu.memory_space<vmem>>, vector<1x128xf32>,
    %c1_i32 = arith.constant 1 : i32
    %c128_i32_20 = arith.constant 128 : i32
    %30 = arith.muli %c1_i32, %c128_i32_20 : i32
    %31 = tpu.assume_multiple %30, 128 : i32
    %32 = arith.index_cast %31 : i32 to index
    %c0_21 = arith.constant 0 : index
    %33 = vector.load %arg1[%32, %c0_21] : memref<1024x16xf32, #tpu.memory_space<vmem>>, vector<128x16xf32>
    %cst_22 = arith.constant dense<0.000000e+00> : vector<128x64xf32>
    %34 = tpu.matmul %33, %0, %cst_22 {dimension_numbers = #tpu.dot_dimension_numbers<[1], [0], [0], [1], [0, 0, 1, 1], [], []>} : vector<128x16xf32>, vector<16x64xf32>, vector<128x64xf32> -> vector<128x64xf32>
    %35 = vector.broadcast %1 : vector<1x64xf32> to vector<128x64xf32>
    %36 = arith.addf %34, %35 : vector<128x64xf32>
    %cst_23 = arith.constant 0.000000e+00 : f32
    %37 = vector.broadcast %cst_23 : f32 to vector<128x64xf32>
    %38 = arith.maximumf %36, %37 : vector<128x64xf32>
    %cst_24 = arith.constant dense<0.000000e+00> : vector<128x32xf32>
    %39 = tpu.matmul %38, %2, %cst_24 {dimension_numbers = #tpu.dot_dimension_numbers<[1], [0], [0], [1], [0, 0, 1, 1], [], []>} : vector<128x64xf32>, vector<64x32xf32>, vector<128x32xf32> -> vector<128x32xf32>
    %40 = vector.broadcast %3 : vector<1x32xf32> to vector<128x32xf32>
    %41 = arith.addf %39, %40 : vector<128x32xf32>
    %cst_25 = arith.constant 0.000000e+00 : f32
    %42 = vector.broadcast %cst_25 : f32 to vector<128x32xf32>
    %43 = arith.maximumf %41, %42 : vector<128x32xf32>
    %44 = vector.broadcast %4 : vector<1x32xf32> to vector<128x32xf32>
    %45 = arith.mulf %43, %44 : vector<128x32xf32>
    %cst_26 = arith.constant dense<0.000000e+00> : vector<128xf32>
    %46 = vector.multi_reduction <add>, %45, %cst_26 [1] : vector<128x32xf32> to vector<128xf32>
    %47 = vector.shape_cast %46 : vector<128xf32> to vector<128x1xf32>
    %48 = vector.broadcast %5 : vector<1x1xf32> to vector<128x1xf32>
    %49 = arith.addf %47, %48 : vector<128x1xf32>
    %c0_27 = arith.constant 0 : index
    %c0_28 = arith.constant 0 : index
    %50 = vector.load %arg8[%c0_27, %c0_28] : memref<128x128xf32, #tpu.memory_space<vmem>>, vector<128x128xf32>
    %cst_29 = arith.constant dense<0.000000e+00> : vector<1x128xf32>
    %51 = tpu.matmul %49, %50, %cst_29 {dimension_numbers = #tpu.dot_dimension_numbers<[0], [0], [1], [1], [0, 1, 1, 1], [], []>} : vector<128x1xf32>, vector<128x128xf32>, vector<1x128xf32> -> vector<1x128xf32>
    %52 = arith.index_cast %c1_i32 : i32 to index
    %c0_30 = arith.constant 0 : index
    %53 = vector.load %arg9[%52, %c0_30] : memref<8x128xf32, #tpu.memory_space<vmem>>, vector<1x128xf32>
    tpu.vector_store %arg9[%52, %c0_30], %51 {strides = array<i32>} : memref<8x128xf32, #tpu.memory_space<vmem>>, vector<1x128xf32>,
    %c2_i32 = arith.constant 2 : i32
    %c128_i32_31 = arith.constant 128 : i32
    %54 = arith.muli %c2_i32, %c128_i32_31 : i32
    %55 = tpu.assume_multiple %54, 128 : i32
    %56 = arith.index_cast %55 : i32 to index
    %c0_32 = arith.constant 0 : index
    %57 = vector.load %arg1[%56, %c0_32] : memref<1024x16xf32, #tpu.memory_space<vmem>>, vector<128x16xf32>
    %cst_33 = arith.constant dense<0.000000e+00> : vector<128x64xf32>
    %58 = tpu.matmul %57, %0, %cst_33 {dimension_numbers = #tpu.dot_dimension_numbers<[1], [0], [0], [1], [0, 0, 1, 1], [], []>} : vector<128x16xf32>, vector<16x64xf32>, vector<128x64xf32> -> vector<128x64xf32>
    %59 = vector.broadcast %1 : vector<1x64xf32> to vector<128x64xf32>
    %60 = arith.addf %58, %59 : vector<128x64xf32>
    %cst_34 = arith.constant 0.000000e+00 : f32
    %61 = vector.broadcast %cst_34 : f32 to vector<128x64xf32>
    %62 = arith.maximumf %60, %61 : vector<128x64xf32>
    %cst_35 = arith.constant dense<0.000000e+00> : vector<128x32xf32>
    %63 = tpu.matmul %62, %2, %cst_35 {dimension_numbers = #tpu.dot_dimension_numbers<[1], [0], [0], [1], [0, 0, 1, 1], [], []>} : vector<128x64xf32>, vector<64x32xf32>, vector<128x32xf32> -> vector<128x32xf32>
    %64 = vector.broadcast %3 : vector<1x32xf32> to vector<128x32xf32>
    %65 = arith.addf %63, %64 : vector<128x32xf32>
    %cst_36 = arith.constant 0.000000e+00 : f32
    %66 = vector.broadcast %cst_36 : f32 to vector<128x32xf32>
    %67 = arith.maximumf %65, %66 : vector<128x32xf32>
    %68 = vector.broadcast %4 : vector<1x32xf32> to vector<128x32xf32>
    %69 = arith.mulf %67, %68 : vector<128x32xf32>
    %cst_37 = arith.constant dense<0.000000e+00> : vector<128xf32>
    %70 = vector.multi_reduction <add>, %69, %cst_37 [1] : vector<128x32xf32> to vector<128xf32>
    %71 = vector.shape_cast %70 : vector<128xf32> to vector<128x1xf32>
    %72 = vector.broadcast %5 : vector<1x1xf32> to vector<128x1xf32>
    %73 = arith.addf %71, %72 : vector<128x1xf32>
    %c0_38 = arith.constant 0 : index
    %c0_39 = arith.constant 0 : index
    %74 = vector.load %arg8[%c0_38, %c0_39] : memref<128x128xf32, #tpu.memory_space<vmem>>, vector<128x128xf32>
    %cst_40 = arith.constant dense<0.000000e+00> : vector<1x128xf32>
    %75 = tpu.matmul %73, %74, %cst_40 {dimension_numbers = #tpu.dot_dimension_numbers<[0], [0], [1], [1], [0, 1, 1, 1], [], []>} : vector<128x1xf32>, vector<128x128xf32>, vector<1x128xf32> -> vector<1x128xf32>
    %76 = arith.index_cast %c2_i32 : i32 to index
    %c0_41 = arith.constant 0 : index
    %77 = vector.load %arg9[%76, %c0_41] : memref<8x128xf32, #tpu.memory_space<vmem>>, vector<1x128xf32>
    tpu.vector_store %arg9[%76, %c0_41], %75 {strides = array<i32>} : memref<8x128xf32, #tpu.memory_space<vmem>>, vector<1x128xf32>,
    %c3_i32 = arith.constant 3 : i32
    %c128_i32_42 = arith.constant 128 : i32
    %78 = arith.muli %c3_i32, %c128_i32_42 : i32
    %79 = tpu.assume_multiple %78, 128 : i32
    %80 = arith.index_cast %79 : i32 to index
    %c0_43 = arith.constant 0 : index
    %81 = vector.load %arg1[%80, %c0_43] : memref<1024x16xf32, #tpu.memory_space<vmem>>, vector<128x16xf32>
    %cst_44 = arith.constant dense<0.000000e+00> : vector<128x64xf32>
    %82 = tpu.matmul %81, %0, %cst_44 {dimension_numbers = #tpu.dot_dimension_numbers<[1], [0], [0], [1], [0, 0, 1, 1], [], []>} : vector<128x16xf32>, vector<16x64xf32>, vector<128x64xf32> -> vector<128x64xf32>
    %83 = vector.broadcast %1 : vector<1x64xf32> to vector<128x64xf32>
    %84 = arith.addf %82, %83 : vector<128x64xf32>
    %cst_45 = arith.constant 0.000000e+00 : f32
    %85 = vector.broadcast %cst_45 : f32 to vector<128x64xf32>
    %86 = arith.maximumf %84, %85 : vector<128x64xf32>
    %cst_46 = arith.constant dense<0.000000e+00> : vector<128x32xf32>
    %87 = tpu.matmul %86, %2, %cst_46 {dimension_numbers = #tpu.dot_dimension_numbers<[1], [0], [0], [1], [0, 0, 1, 1], [], []>} : vector<128x64xf32>, vector<64x32xf32>, vector<128x32xf32> -> vector<128x32xf32>
    %88 = vector.broadcast %3 : vector<1x32xf32> to vector<128x32xf32>
    %89 = arith.addf %87, %88 : vector<128x32xf32>
    %cst_47 = arith.constant 0.000000e+00 : f32
    %90 = vector.broadcast %cst_47 : f32 to vector<128x32xf32>
    %91 = arith.maximumf %89, %90 : vector<128x32xf32>
    %92 = vector.broadcast %4 : vector<1x32xf32> to vector<128x32xf32>
    %93 = arith.mulf %91, %92 : vector<128x32xf32>
    %cst_48 = arith.constant dense<0.000000e+00> : vector<128xf32>
    %94 = vector.multi_reduction <add>, %93, %cst_48 [1] : vector<128x32xf32> to vector<128xf32>
    %95 = vector.shape_cast %94 : vector<128xf32> to vector<128x1xf32>
    %96 = vector.broadcast %5 : vector<1x1xf32> to vector<128x1xf32>
    %97 = arith.addf %95, %96 : vector<128x1xf32>
    %c0_49 = arith.constant 0 : index
    %c0_50 = arith.constant 0 : index
    %98 = vector.load %arg8[%c0_49, %c0_50] : memref<128x128xf32, #tpu.memory_space<vmem>>, vector<128x128xf32>
    %cst_51 = arith.constant dense<0.000000e+00> : vector<1x128xf32>
    %99 = tpu.matmul %97, %98, %cst_51 {dimension_numbers = #tpu.dot_dimension_numbers<[0], [0], [1], [1], [0, 1, 1, 1], [], []>} : vector<128x1xf32>, vector<128x128xf32>, vector<1x128xf32> -> vector<1x128xf32>
    %100 = arith.index_cast %c3_i32 : i32 to index
    %c0_52 = arith.constant 0 : index
    %101 = vector.load %arg9[%100, %c0_52] : memref<8x128xf32, #tpu.memory_space<vmem>>, vector<1x128xf32>
    tpu.vector_store %arg9[%100, %c0_52], %99 {strides = array<i32>} : memref<8x128xf32, #tpu.memory_space<vmem>>, vector<1x128xf32>,
    %c4_i32 = arith.constant 4 : i32
    %c128_i32_53 = arith.constant 128 : i32
    %102 = arith.muli %c4_i32, %c128_i32_53 : i32
    %103 = tpu.assume_multiple %102, 128 : i32
    %104 = arith.index_cast %103 : i32 to index
    %c0_54 = arith.constant 0 : index
    %105 = vector.load %arg1[%104, %c0_54] : memref<1024x16xf32, #tpu.memory_space<vmem>>, vector<128x16xf32>
    %cst_55 = arith.constant dense<0.000000e+00> : vector<128x64xf32>
    %106 = tpu.matmul %105, %0, %cst_55 {dimension_numbers = #tpu.dot_dimension_numbers<[1], [0], [0], [1], [0, 0, 1, 1], [], []>} : vector<128x16xf32>, vector<16x64xf32>, vector<128x64xf32> -> vector<128x64xf32>
    %107 = vector.broadcast %1 : vector<1x64xf32> to vector<128x64xf32>
    %108 = arith.addf %106, %107 : vector<128x64xf32>
    %cst_56 = arith.constant 0.000000e+00 : f32
    %109 = vector.broadcast %cst_56 : f32 to vector<128x64xf32>
    %110 = arith.maximumf %108, %109 : vector<128x64xf32>
    %cst_57 = arith.constant dense<0.000000e+00> : vector<128x32xf32>
    %111 = tpu.matmul %110, %2, %cst_57 {dimension_numbers = #tpu.dot_dimension_numbers<[1], [0], [0], [1], [0, 0, 1, 1], [], []>} : vector<128x64xf32>, vector<64x32xf32>, vector<128x32xf32> -> vector<128x32xf32>
    %112 = vector.broadcast %3 : vector<1x32xf32> to vector<128x32xf32>
    %113 = arith.addf %111, %112 : vector<128x32xf32>
    %cst_58 = arith.constant 0.000000e+00 : f32
    %114 = vector.broadcast %cst_58 : f32 to vector<128x32xf32>
    %115 = arith.maximumf %113, %114 : vector<128x32xf32>
    %116 = vector.broadcast %4 : vector<1x32xf32> to vector<128x32xf32>
    %117 = arith.mulf %115, %116 : vector<128x32xf32>
    %cst_59 = arith.constant dense<0.000000e+00> : vector<128xf32>
    %118 = vector.multi_reduction <add>, %117, %cst_59 [1] : vector<128x32xf32> to vector<128xf32>
    %119 = vector.shape_cast %118 : vector<128xf32> to vector<128x1xf32>
    %120 = vector.broadcast %5 : vector<1x1xf32> to vector<128x1xf32>
    %121 = arith.addf %119, %120 : vector<128x1xf32>
    %c0_60 = arith.constant 0 : index
    %c0_61 = arith.constant 0 : index
    %122 = vector.load %arg8[%c0_60, %c0_61] : memref<128x128xf32, #tpu.memory_space<vmem>>, vector<128x128xf32>
    %cst_62 = arith.constant dense<0.000000e+00> : vector<1x128xf32>
    %123 = tpu.matmul %121, %122, %cst_62 {dimension_numbers = #tpu.dot_dimension_numbers<[0], [0], [1], [1], [0, 1, 1, 1], [], []>} : vector<128x1xf32>, vector<128x128xf32>, vector<1x128xf32> -> vector<1x128xf32>
    %124 = arith.index_cast %c4_i32 : i32 to index
    %c0_63 = arith.constant 0 : index
    %125 = vector.load %arg9[%124, %c0_63] : memref<8x128xf32, #tpu.memory_space<vmem>>, vector<1x128xf32>
    tpu.vector_store %arg9[%124, %c0_63], %123 {strides = array<i32>} : memref<8x128xf32, #tpu.memory_space<vmem>>, vector<1x128xf32>,
    %c5_i32 = arith.constant 5 : i32
    %c128_i32_64 = arith.constant 128 : i32
    %126 = arith.muli %c5_i32, %c128_i32_64 : i32
    %127 = tpu.assume_multiple %126, 128 : i32
    %128 = arith.index_cast %127 : i32 to index
    %c0_65 = arith.constant 0 : index
    %129 = vector.load %arg1[%128, %c0_65] : memref<1024x16xf32, #tpu.memory_space<vmem>>, vector<128x16xf32>
    %cst_66 = arith.constant dense<0.000000e+00> : vector<128x64xf32>
    %130 = tpu.matmul %129, %0, %cst_66 {dimension_numbers = #tpu.dot_dimension_numbers<[1], [0], [0], [1], [0, 0, 1, 1], [], []>} : vector<128x16xf32>, vector<16x64xf32>, vector<128x64xf32> -> vector<128x64xf32>
    %131 = vector.broadcast %1 : vector<1x64xf32> to vector<128x64xf32>
    %132 = arith.addf %130, %131 : vector<128x64xf32>
    %cst_67 = arith.constant 0.000000e+00 : f32
    %133 = vector.broadcast %cst_67 : f32 to vector<128x64xf32>
    %134 = arith.maximumf %132, %133 : vector<128x64xf32>
    %cst_68 = arith.constant dense<0.000000e+00> : vector<128x32xf32>
    %135 = tpu.matmul %134, %2, %cst_68 {dimension_numbers = #tpu.dot_dimension_numbers<[1], [0], [0], [1], [0, 0, 1, 1], [], []>} : vector<128x64xf32>, vector<64x32xf32>, vector<128x32xf32> -> vector<128x32xf32>
    %136 = vector.broadcast %3 : vector<1x32xf32> to vector<128x32xf32>
    %137 = arith.addf %135, %136 : vector<128x32xf32>
    %cst_69 = arith.constant 0.000000e+00 : f32
    %138 = vector.broadcast %cst_69 : f32 to vector<128x32xf32>
    %139 = arith.maximumf %137, %138 : vector<128x32xf32>
    %140 = vector.broadcast %4 : vector<1x32xf32> to vector<128x32xf32>
    %141 = arith.mulf %139, %140 : vector<128x32xf32>
    %cst_70 = arith.constant dense<0.000000e+00> : vector<128xf32>
    %142 = vector.multi_reduction <add>, %141, %cst_70 [1] : vector<128x32xf32> to vector<128xf32>
    %143 = vector.shape_cast %142 : vector<128xf32> to vector<128x1xf32>
    %144 = vector.broadcast %5 : vector<1x1xf32> to vector<128x1xf32>
    %145 = arith.addf %143, %144 : vector<128x1xf32>
    %c0_71 = arith.constant 0 : index
    %c0_72 = arith.constant 0 : index
    %146 = vector.load %arg8[%c0_71, %c0_72] : memref<128x128xf32, #tpu.memory_space<vmem>>, vector<128x128xf32>
    %cst_73 = arith.constant dense<0.000000e+00> : vector<1x128xf32>
    %147 = tpu.matmul %145, %146, %cst_73 {dimension_numbers = #tpu.dot_dimension_numbers<[0], [0], [1], [1], [0, 1, 1, 1], [], []>} : vector<128x1xf32>, vector<128x128xf32>, vector<1x128xf32> -> vector<1x128xf32>
    %148 = arith.index_cast %c5_i32 : i32 to index
    %c0_74 = arith.constant 0 : index
    %149 = vector.load %arg9[%148, %c0_74] : memref<8x128xf32, #tpu.memory_space<vmem>>, vector<1x128xf32>
    tpu.vector_store %arg9[%148, %c0_74], %147 {strides = array<i32>} : memref<8x128xf32, #tpu.memory_space<vmem>>, vector<1x128xf32>,
    %c6_i32 = arith.constant 6 : i32
    %c128_i32_75 = arith.constant 128 : i32
    %150 = arith.muli %c6_i32, %c128_i32_75 : i32
    %151 = tpu.assume_multiple %150, 128 : i32
    %152 = arith.index_cast %151 : i32 to index
    %c0_76 = arith.constant 0 : index
    %153 = vector.load %arg1[%152, %c0_76] : memref<1024x16xf32, #tpu.memory_space<vmem>>, vector<128x16xf32>
    %cst_77 = arith.constant dense<0.000000e+00> : vector<128x64xf32>
    %154 = tpu.matmul %153, %0, %cst_77 {dimension_numbers = #tpu.dot_dimension_numbers<[1], [0], [0], [1], [0, 0, 1, 1], [], []>} : vector<128x16xf32>, vector<16x64xf32>, vector<128x64xf32> -> vector<128x64xf32>
    %155 = vector.broadcast %1 : vector<1x64xf32> to vector<128x64xf32>
    %156 = arith.addf %154, %155 : vector<128x64xf32>
    %cst_78 = arith.constant 0.000000e+00 : f32
    %157 = vector.broadcast %cst_78 : f32 to vector<128x64xf32>
    %158 = arith.maximumf %156, %157 : vector<128x64xf32>
    %cst_79 = arith.constant dense<0.000000e+00> : vector<128x32xf32>
    %159 = tpu.matmul %158, %2, %cst_79 {dimension_numbers = #tpu.dot_dimension_numbers<[1], [0], [0], [1], [0, 0, 1, 1], [], []>} : vector<128x64xf32>, vector<64x32xf32>, vector<128x32xf32> -> vector<128x32xf32>
    %160 = vector.broadcast %3 : vector<1x32xf32> to vector<128x32xf32>
    %161 = arith.addf %159, %160 : vector<128x32xf32>
    %cst_80 = arith.constant 0.000000e+00 : f32
    %162 = vector.broadcast %cst_80 : f32 to vector<128x32xf32>
    %163 = arith.maximumf %161, %162 : vector<128x32xf32>
    %164 = vector.broadcast %4 : vector<1x32xf32> to vector<128x32xf32>
    %165 = arith.mulf %163, %164 : vector<128x32xf32>
    %cst_81 = arith.constant dense<0.000000e+00> : vector<128xf32>
    %166 = vector.multi_reduction <add>, %165, %cst_81 [1] : vector<128x32xf32> to vector<128xf32>
    %167 = vector.shape_cast %166 : vector<128xf32> to vector<128x1xf32>
    %168 = vector.broadcast %5 : vector<1x1xf32> to vector<128x1xf32>
    %169 = arith.addf %167, %168 : vector<128x1xf32>
    %c0_82 = arith.constant 0 : index
    %c0_83 = arith.constant 0 : index
    %170 = vector.load %arg8[%c0_82, %c0_83] : memref<128x128xf32, #tpu.memory_space<vmem>>, vector<128x128xf32>
    %cst_84 = arith.constant dense<0.000000e+00> : vector<1x128xf32>
    %171 = tpu.matmul %169, %170, %cst_84 {dimension_numbers = #tpu.dot_dimension_numbers<[0], [0], [1], [1], [0, 1, 1, 1], [], []>} : vector<128x1xf32>, vector<128x128xf32>, vector<1x128xf32> -> vector<1x128xf32>
    %172 = arith.index_cast %c6_i32 : i32 to index
    %c0_85 = arith.constant 0 : index
    %173 = vector.load %arg9[%172, %c0_85] : memref<8x128xf32, #tpu.memory_space<vmem>>, vector<1x128xf32>
    tpu.vector_store %arg9[%172, %c0_85], %171 {strides = array<i32>} : memref<8x128xf32, #tpu.memory_space<vmem>>, vector<1x128xf32>,
    %c7_i32 = arith.constant 7 : i32
    %c128_i32_86 = arith.constant 128 : i32
    %174 = arith.muli %c7_i32, %c128_i32_86 : i32
    %175 = tpu.assume_multiple %174, 128 : i32
    %176 = arith.index_cast %175 : i32 to index
    %c0_87 = arith.constant 0 : index
    %177 = vector.load %arg1[%176, %c0_87] : memref<1024x16xf32, #tpu.memory_space<vmem>>, vector<128x16xf32>
    %cst_88 = arith.constant dense<0.000000e+00> : vector<128x64xf32>
    %178 = tpu.matmul %177, %0, %cst_88 {dimension_numbers = #tpu.dot_dimension_numbers<[1], [0], [0], [1], [0, 0, 1, 1], [], []>} : vector<128x16xf32>, vector<16x64xf32>, vector<128x64xf32> -> vector<128x64xf32>
    %179 = vector.broadcast %1 : vector<1x64xf32> to vector<128x64xf32>
    %180 = arith.addf %178, %179 : vector<128x64xf32>
    %cst_89 = arith.constant 0.000000e+00 : f32
    %181 = vector.broadcast %cst_89 : f32 to vector<128x64xf32>
    %182 = arith.maximumf %180, %181 : vector<128x64xf32>
    %cst_90 = arith.constant dense<0.000000e+00> : vector<128x32xf32>
    %183 = tpu.matmul %182, %2, %cst_90 {dimension_numbers = #tpu.dot_dimension_numbers<[1], [0], [0], [1], [0, 0, 1, 1], [], []>} : vector<128x64xf32>, vector<64x32xf32>, vector<128x32xf32> -> vector<128x32xf32>
    %184 = vector.broadcast %3 : vector<1x32xf32> to vector<128x32xf32>
    %185 = arith.addf %183, %184 : vector<128x32xf32>
    %cst_91 = arith.constant 0.000000e+00 : f32
    %186 = vector.broadcast %cst_91 : f32 to vector<128x32xf32>
    %187 = arith.maximumf %185, %186 : vector<128x32xf32>
    %188 = vector.broadcast %4 : vector<1x32xf32> to vector<128x32xf32>
    %189 = arith.mulf %187, %188 : vector<128x32xf32>
    %cst_92 = arith.constant dense<0.000000e+00> : vector<128xf32>
    %190 = vector.multi_reduction <add>, %189, %cst_92 [1] : vector<128x32xf32> to vector<128xf32>
    %191 = vector.shape_cast %190 : vector<128xf32> to vector<128x1xf32>
    %192 = vector.broadcast %5 : vector<1x1xf32> to vector<128x1xf32>
    %193 = arith.addf %191, %192 : vector<128x1xf32>
    %c0_93 = arith.constant 0 : index
    %c0_94 = arith.constant 0 : index
    %194 = vector.load %arg8[%c0_93, %c0_94] : memref<128x128xf32, #tpu.memory_space<vmem>>, vector<128x128xf32>
    %cst_95 = arith.constant dense<0.000000e+00> : vector<1x128xf32>
    %195 = tpu.matmul %193, %194, %cst_95 {dimension_numbers = #tpu.dot_dimension_numbers<[0], [0], [1], [1], [0, 1, 1, 1], [], []>} : vector<128x1xf32>, vector<128x128xf32>, vector<1x128xf32> -> vector<1x128xf32>
    %196 = arith.index_cast %c7_i32 : i32 to index
    %c0_96 = arith.constant 0 : index
    %197 = vector.load %arg9[%196, %c0_96] : memref<8x128xf32, #tpu.memory_space<vmem>>, vector<1x128xf32>
    tpu.vector_store %arg9[%196, %c0_96], %195 {strides = array<i32>} : memref<8x128xf32, #tpu.memory_space<vmem>>, vector<1x128xf32>,
    %c8_i32 = arith.constant 8 : i32
    return
  }
  func.func @transform_0(%arg0: i32) -> (i32, i32) {
    %c0_i32 = arith.constant 0 : i32
    %c0_i32_0 = arith.constant 0 : i32
    return %arg0, %c0_i32 : i32, i32
  }
  func.func @transform_1(%arg0: i32) -> (i32, i32) {
    %c0_i32 = arith.constant 0 : i32
    %c0_i32_0 = arith.constant 0 : i32
    %c0_i32_1 = arith.constant 0 : i32
    return %c0_i32, %c0_i32_0 : i32, i32
  }
  func.func @transform_2(%arg0: i32) -> (i32, i32) {
    %c0_i32 = arith.constant 0 : i32
    %c0_i32_0 = arith.constant 0 : i32
    %c0_i32_1 = arith.constant 0 : i32
    return %c0_i32, %c0_i32_0 : i32, i32
  }
  func.func @transform_3(%arg0: i32) -> (i32, i32) {
    %c0_i32 = arith.constant 0 : i32
    %c0_i32_0 = arith.constant 0 : i32
    %c0_i32_1 = arith.constant 0 : i32
    return %c0_i32, %c0_i32_0 : i32, i32
  }
  func.func @transform_4(%arg0: i32) -> (i32, i32) {
    %c0_i32 = arith.constant 0 : i32
    %c0_i32_0 = arith.constant 0 : i32
    %c0_i32_1 = arith.constant 0 : i32
    return %c0_i32, %c0_i32_0 : i32, i32
  }
  func.func @transform_5(%arg0: i32) -> (i32, i32) {
    %c0_i32 = arith.constant 0 : i32
    %c0_i32_0 = arith.constant 0 : i32
    %c0_i32_1 = arith.constant 0 : i32
    return %c0_i32, %c0_i32_0 : i32, i32
  }
  func.func @transform_6(%arg0: i32) -> (i32, i32) {
    %c0_i32 = arith.constant 0 : i32
    %c0_i32_0 = arith.constant 0 : i32
    %c0_i32_1 = arith.constant 0 : i32
    return %c0_i32, %c0_i32_0 : i32, i32
  }
  func.func @transform_7(%arg0: i32) -> (i32, i32) {
    %c0_i32 = arith.constant 0 : i32
    %c0_i32_0 = arith.constant 0 : i32
    %c0_i32_1 = arith.constant 0 : i32
    return %c0_i32, %c0_i32_0 : i32, i32
  }
  func.func @transform_8(%arg0: i32) -> (i32, i32) {
    %c0_i32 = arith.constant 0 : i32
    %c0_i32_0 = arith.constant 0 : i32
    return %arg0, %c0_i32 : i32, i32
  }
}

</mosaic_0001>

<bundles_post_ra>
// kernel: tpu_custom_call.1
= control target key start
LH: loop header
LB: loop body
LE: loop exit
PB: predicated region body
PF: predicated region fallthrough
CT: control target
= control target key end

     0   :  { %s6314_s0 = inlined_call_operand.vmem [shape: f32[2048,16], index: 0, kind: input, shape index: {}]   ;;  %s6315_s1 = inlined_call_operand.vmem [shape: f32[16,64], index: 1, kind: input, shape index: {}]   ;;  %s6316_s2 = inlined_call_operand.vmem [shape: f32[1,64], index: 2, kind: input, shape index: {}]   ;;  %s6317_s3 = inlined_call_operand.vmem [shape: f32[64,32], index: 3, kind: input, shape index: {}]   ;;  %s6318_s4 = inlined_call_operand.vmem [shape: f32[1,32], index: 4, kind: input, shape index: {}]   ;;  %s6319_s5 = inlined_call_operand.vmem [shape: f32[1,32], index: 5, kind: input, shape index: {}]   ;;  %s6320_s6 = inlined_call_operand.<no memory space> [shape: f32[1,1], index: 6, kind: input, shape index: {}]   ;;  %s6321_s7 = inlined_call_operand.vmem [shape: f32[128,128], index: 7, kind: input, shape index: {}]   ;;  %s6322_s8 = inlined_call_operand.hbm [shape: f32[16,128], index: 8, kind: output, shape index: {}]  }
   0x1   :  { %v13_v0 = vstv %s6320_s6 }
   0x2   :  { %14 = vst [vmem:[#allocation2] sm:$0x1] %v13_v0 }
   0x3   :  { %15 = vsyncpa [#allocation4], 0 }
   0x4   :  { %17 = vsyncpa [#allocation4 + $0x1], 0  ;;  %s4530_s29 = smov 0   ;;  %s4532_s30 = smov 0  }
   0x5   :  { %s4534_s9 = smov 0   ;;  %s4536_s10 = smov 0  }
   0x6 LB: > { %s4551_s6 = sadd.s32 4294967295, %s4473_s10   ;;  %s3803_s11 = sadd.s32 4294967294, %s4473_s10   ;;  %s4473_s10 = sphi %s4536_s10, %s6328_s10   ;;  %s4469_s9 = sphi %s4534_s9, %s6327_s9   ;;  %s4465_s30 = sphi %s4532_s30, %s6326_s30   ;;  %s4461_s29 = sphi %s4530_s29, %s6325_s29  }
   0x7   : > { %s4555_s12 = sadd.s32 1, %s4473_s10   ;;  %s203_s13 = sadd.s32 1, %s4469_s9 }
   0x8   : > { %s200_s14 = ssub.s32 %s4473_s10, %s4555_s12  ;;  %p213_p0 = scmp.ne.s32.totalorder %s4469_s9, %s4465_s30 }
   0x9   : > { %p201_p1 = scmp.eq.s32.totalorder %s200_s14, 0  ;;  %p214_p2 = scmp.eq.s32.totalorder %s4551_s6, 1 }
   0xa   : > { %p219_p3 = scmp.ne.s32.totalorder %s4465_s30, %s4461_s29  ;;  %p220_p4 = scmp.eq.s32.totalorder %s3803_s11, 1 }
   0xb   : > { %s4566_s15 = scalar_select %p201_p1, %s4469_s9, %s203_s13  }
   0xc   : > { %p4568_p5 = por %p214_p2, %p213_p0  ;;  %p4572_p6 = por %p220_p4, %p219_p3 }
   0xd   : > { %p3806_p7 = scmp.ge.s32.totalorder %s4473_s10, 1  ;;  %p268_p8 = scmp.lt.s32.totalorder %s4473_s10, 3 }
   0xf   : > { %p269_p9 = pnand %p3806_p7, %p268_p8 }
  0x10   : > { %s3808_s22 = sshll.u32 (!%p269_p9), %s4551_s6, 7  ;;  %s299_s11 = sand.u32 (!%p269_p9), 1, %s4465_s30  }
  0x11   : > { %272 = sbr.rel (%p269_p9) target bundleno = 4586 (0x11ea), region = 52  ;;  %p303_p10 = scmp.lt.s32.totalorder (!%p269_p9), %s3808_s22, 255 }
  0x12   : > { %s3807_s13 = sshll.u32 (!%p269_p9), %s299_s11, 3  ;;  %s4179_s20 = sshll.u32 (!%p269_p9), %s4551_s6, 3 }
  0x13   : > { %s4921_s14 = scalar_lea.vmem (!%p269_p9), [#allocation3], %s3807_s13  ;;  %s3729_s27 = scalar_lea.sflag (!%p269_p9), [#allocation4], %s299_s11 }
  0x14   : > { %s3741_s24 = sshll.u32 (!%p269_p9), %s4921_s14, 4  ;;  %s3742_s24 = int_to_ptr.vmem [resolvable:$true] %s3741_s24 }
  0x16   : > { %v309_v1 = vld [vmem:[%s6315_s1 + $0x8] sm:$0xff]  ;;  %v308_v2 = vld [vmem:[%s6315_s1] sm:$0xff]  ;;  %s6330_s22 = smov (!%p303_p10, %s3808_s22), 255  ;;  %vm341_vm0 = vcmask 130048   ;;  %v4613_v13 = vld [vmem:[%s6317_s3 + $0x38] sm:$0xff]  ;;  %vm474_vm1 = vcmask 523264  }
  0x17   : > { %404 = vmatpush.msra.mxu0 %v309_v1  ;;  %839 = vmatpush.msra.mxu3 %v309_v1  ;;  %s3809_s23 = sshll.u32 %s6330_s22, 3  ;;  %v4618_v14 = vld [vmem:[%s6317_s3 + $0x30] sm:$0xff]  ;;  %v4624_v15 = vld [vmem:[%s6317_s3 + $0x28] sm:$0xff]  ;;  %v4630_v16 = vld [vmem:[%s6317_s3 + $0x20] sm:$0xff]  ;;  %vm623_vm2 = vcmask 261120  }
  0x18   : > { %s4588_s26 = scalar_lea.vmem %s6314_s0, %s3809_s23  ;;  %531 = vmatpush.msra.mxu1 %v4613_v13  ;;  %v4637_v18 = vld [vmem:[%s6317_s3 + $0x18] sm:$0xff]  ;;  %v4647_v20 = vld [vmem:[%s6317_s3 + $0x10] sm:$0xff]  ;;  %v4654_v22 = vld [vmem:[%s6317_s3 + $0x8] sm:$0xff]  ;;  %s3739_s23 = scalar_lea.hbm %s6322_s8, %s4179_s20 }
  0x19   : > { %405 = vmatpush.msra.mxu0 %v308_v2  ;;  %840 = vmatpush.msra.mxu3 %v308_v2  ;;  %v322_v3 = vld [vmem:[%s4588_s26] sm:$0xff]  ;;  %v323_v4 = vld [vmem:[%s4588_s26 + $0x8] sm:$0xff]  ;;  %v324_v5 = vld [vmem:[%s4588_s26 + $0x10] sm:$0xff]  ;;  %s3743_s25 = sshll.u32 %s3739_s23, 4  ;;  %s3744_s25 = int_to_ptr.hbm [resolvable:$true] %s3743_s25 }
  0x1a   : > { %3810 = vmatmul.msk.f32.vlgmr.msra.gmra.mxu0 %vm341_vm0, %v322_v3  ;;  %v325_v6 = vld [vmem:[%s4588_s26 + $0x18] sm:$0xff]  ;;  %v326_v7 = vld [vmem:[%s4588_s26 + $0x20] sm:$0xff]  ;;  %v327_v8 = vld [vmem:[%s4588_s26 + $0x28] sm:$0xff]  ;;  %532 = vmatpush.msra.mxu1 %v4618_v14  ;;  %s4425_s28 = sshra.s32 %s3744_s25, 4  ;;  %s4426_s28 = int_to_ptr.hbm [resolvable:$true] %s4425_s28 }
  0x1b   : > { %v328_v9 = vld [vmem:[%s4588_s26 + $0x30] sm:$0xff]  ;;  %v329_v10 = vld [vmem:[%s4588_s26 + $0x38] sm:$0xff]  ;;  %v330_v11 = vld [vmem:[%s4588_s26 + $0x40] sm:$0xff]  ;;  %s4427_s13 = scalar_lea.hbm %s4426_s28, 8  ;;  %p4432_p0 = scmp.lt.s32.totalorder %s4426_s28, %s6322_s8 }
  0x1c   : > { %v331_v12 = vld [vmem:[%s4588_s26 + $0x48] sm:$0xff]  ;;  %v332_v17 = vld [vmem:[%s4588_s26 + $0x50] sm:$0xff]  ;;  %533 = vmatpush.msra.mxu1 %v4624_v15  ;;  %v333_v19 = vld [vmem:[%s4588_s26 + $0x58] sm:$0xff]  ;;  %p4428_p11 = scmp.ne.s32.totalorder %s4426_s28, %s4427_s13 }
  0x1d   : > { %v334_v21 = vld [vmem:[%s4588_s26 + $0x60] sm:$0xff]  ;;  %v335_v24 = vld [vmem:[%s4588_s26 + $0x68] sm:$0xff]  ;;  %v336_v26 = vld [vmem:[%s4588_s26 + $0x70] sm:$0xff] }
  0x1e   : > { %534 = vmatpush.msra.mxu1 %v4630_v16  ;;  %v4661_v23 = vld [vmem:[%s6317_s3] sm:$0xff]  ;;  %v337_v30 = vld [vmem:[%s4588_s26 + $0x78] sm:$0xff]  ;;  %p4429_p12 = pnand %p4428_p11, %p4568_p5 }
  0x1f   : > { %v4669_v25 = vld [vmem:[%s6316_s2] ss:$0 sm:$0xff] }
  0x20   : > { %535 = vmatpush.msra.mxu1 %v4637_v18  ;;  %p4430_p13 = pneg %p4429_p12 }
  0x22   : > { %3811 = vmatmul.msk.f32.gmra.mxu0 %vm341_vm0, %v323_v4  ;;  %536 = vmatpush.msra.mxu1 %v4647_v20 }
  0x24   : > { %537 = vmatpush.msra.mxu1 %v4654_v22 }
  0x26   : > { %538 = vmatpush.msra.mxu1 %v4661_v23 }
  0x2a   : > { %3812 = vmatmul.msk.f32.gmra.mxu0 %vm341_vm0, %v324_v5 }
  0x32   : > { %3813 = vmatmul.msk.f32.gmra.mxu0 %vm341_vm0, %v325_v6 }
  0x3a   : > { %3814 = vmatmul.msk.f32.gmra.mxu0 %vm341_vm0, %v326_v7 }
  0x42   : > { %3815 = vmatmul.msk.f32.gmra.mxu0 %vm341_vm0, %v327_v8  ;;  %v4715_v8 = vld [vmem:[%s6318_s4] ss:$0 sm:$0xff] }
  0x4a   : > { %3816 = vmatmul.msk.f32.gmra.mxu0 %vm341_vm0, %v328_v9 }
  0x52   : > { %3817 = vmatmul.msk.f32.gmra.mxu0 %vm341_vm0, %v329_v10 }
  0x5a   : > { %3818 = vmatmul.msk.f32.gmra.mxu0 %vm341_vm0, %v330_v11 }
  0x62   : > { %3819 = vmatmul.msk.f32.gmra.mxu0 %vm341_vm0, %v331_v12  ;;  %v4722_v12 = vld [vmem:[%s6319_s5] ss:$0 sm:$0xff] }
  0x6a   : > { %3820 = vmatmul.msk.f32.gmra.mxu0 %vm341_vm0, %v332_v17 }
  0x72   : > { %3821 = vmatmul.msk.f32.gmra.mxu0 %vm341_vm0, %v333_v19 }
  0x7a   : > { %3822 = vmatmul.msk.f32.gmra.mxu0 %vm341_vm0, %v334_v21 }
  0x82   : > { %3823 = vmatmul.msk.f32.gmra.mxu0 %vm341_vm0, %v335_v24 }
  0x8a   : > { %3824 = vmatmul.msk.f32.gmra.mxu0 %vm341_vm0, %v336_v26 }
  0x92   : > { %3825 = vmatmul.msk.f32.gmra.mxu0 %vm341_vm0, %v337_v30 }
  0x97   : > { %v407_v27 = vpop.f32.mrf.mxu0 }
  0x98   : > { %v408_v28 = vadd.f32 %v4669_v25, %v407_v27 }
  0x9a   : > { %v455_v29 = vmax.f32 %v408_v28, 0.0 }
  0x9c   : > { %3826 = vmatmul.msk.f32.vlgmr.msra.gmra.mxu1 %vm474_vm1, %v455_v29 }
  0x9d   : > { %1386 = vmatpush.msra.mxu1 %v4613_v13 }
  0x9f   : > { %v410_v31 = vpop.f32.mrf.mxu0  ;;  %1387 = vmatpush.msra.mxu1 %v4618_v14 }
  0xa0   : > { %v411_v32 = vadd.f32 %v4669_v25, %v410_v31 }
  0xa1   : > { %1388 = vmatpush.msra.mxu1 %v4624_v15 }
  0xa2   : > { %v456_v33 = vmax.f32 %v411_v32, 0.0 }
  0xa3   : > { %1389 = vmatpush.msra.mxu1 %v4630_v16 }
  0xa4   : > { %3827 = vmatmul.msk.f32.gmra.mxu1 %vm474_vm1, %v456_v33 }
  0xa5   : > { %1390 = vmatpush.msra.mxu1 %v4637_v18 }
  0xa7   : > { %v413_v34 = vpop.f32.mrf.mxu0  ;;  %1391 = vmatpush.msra.mxu1 %v4647_v20 }
  0xa8   : > { %v414_v35 = vadd.f32 %v4669_v25, %v413_v34 }
  0xa9   : > { %1392 = vmatpush.msra.mxu1 %v4654_v22 }
  0xaa   : > { %v457_v36 = vmax.f32 %v414_v35, 0.0 }
  0xab   : > { %1393 = vmatpush.msra.mxu1 %v4661_v23 }
  0xac   : > { %3828 = vmatmul.msk.f32.gmra.mxu1 %vm474_vm1, %v457_v36 }
  0xaf   : > { %v416_v37 = vpop.f32.mrf.mxu0 }
  0xb0   : > { %v417_v38 = vadd.f32 %v4669_v25, %v416_v37 }
  0xb2   : > { %v458_v39 = vmax.f32 %v417_v38, 0.0 }
  0xb4   : > { %3829 = vmatmul.msk.f32.gmra.mxu1 %vm474_vm1, %v458_v39 }
  0xb7   : > { %v419_v40 = vpop.f32.mrf.mxu0 }
  0xb8   : > { %v420_v41 = vadd.f32 %v4669_v25, %v419_v40 }
  0xba   : > { %v459_v42 = vmax.f32 %v420_v41, 0.0 }
  0xbc   : > { %3830 = vmatmul.msk.f32.gmra.mxu1 %vm474_vm1, %v459_v42 }
  0xbf   : > { %v422_v43 = vpop.f32.mrf.mxu0 }
  0xc0   : > { %v423_v44 = vadd.f32 %v4669_v25, %v422_v43 }
  0xc2   : > { %v460_v45 = vmax.f32 %v423_v44, 0.0 }
  0xc4   : > { %3831 = vmatmul.msk.f32.gmra.mxu1 %vm474_vm1, %v460_v45 }
  0xc7   : > { %v425_v46 = vpop.f32.mrf.mxu0 }
  0xc8   : > { %v426_v47 = vadd.f32 %v4669_v25, %v425_v46 }
  0xca   : > { %v461_v48 = vmax.f32 %v426_v47, 0.0 }
  0xcc   : > { %3832 = vmatmul.msk.f32.gmra.mxu1 %vm474_vm1, %v461_v48 }
  0xcf   : > { %v428_v49 = vpop.f32.mrf.mxu0 }
  0xd0   : > { %v429_v50 = vadd.f32 %v4669_v25, %v428_v49 }
  0xd2   : > { %v462_v51 = vmax.f32 %v429_v50, 0.0 }
  0xd4   : > { %3833 = vmatmul.msk.f32.gmra.mxu1 %vm474_vm1, %v462_v51 }
  0xd7   : > { %v431_v52 = vpop.f32.mrf.mxu0 }
  0xd8   : > { %v432_v53 = vadd.f32 %v4669_v25, %v431_v52 }
  0xda   : > { %v463_v54 = vmax.f32 %v432_v53, 0.0 }
  0xdc   : > { %3834 = vmatmul.msk.f32.gmra.mxu1 %vm474_vm1, %v463_v54 }
  0xdf   : > { %v434_v55 = vpop.f32.mrf.mxu0 }
  0xe0   : > { %v435_v56 = vadd.f32 %v4669_v25, %v434_v55 }
  0xe2   : > { %v464_v57 = vmax.f32 %v435_v56, 0.0 }
  0xe4   : > { %3835 = vmatmul.msk.f32.gmra.mxu1 %vm474_vm1, %v464_v57 }
  0xe7   : > { %v437_v58 = vpop.f32.mrf.mxu0 }
  0xe8   : > { %v438_v59 = vadd.f32 %v4669_v25, %v437_v58 }
  0xea   : > { %v465_v60 = vmax.f32 %v438_v59, 0.0 }
  0xec   : > { %3836 = vmatmul.msk.f32.gmra.mxu1 %vm474_vm1, %v465_v60 }
  0xef   : > { %v440_v61 = vpop.f32.mrf.mxu0 }
  0xf0   : > { %v441_v62 = vadd.f32 %v4669_v25, %v440_v61 }
  0xf2   : > { %v466_v63 = vmax.f32 %v441_v62, 0.0 }
  0xf4   : > { %3837 = vmatmul.msk.f32.gmra.mxu1 %vm474_vm1, %v466_v63 }
  0xf7   : > { %v443_v0 = vpop.f32.mrf.mxu0 }
  0xf8   : > { %v444_v1 = vadd.f32 %v4669_v25, %v443_v0 }
  0xfa   : > { %v467_v2 = vmax.f32 %v444_v1, 0.0 }
  0xfc   : > { %3838 = vmatmul.msk.f32.gmra.mxu1 %vm474_vm1, %v467_v2 }
  0xff   : > { %v446_v3 = vpop.f32.mrf.mxu0 }
 0x100   : > { %v447_v4 = vadd.f32 %v4669_v25, %v446_v3 }
 0x102   : > { %v468_v5 = vmax.f32 %v447_v4, 0.0 }
 0x104   : > { %3839 = vmatmul.msk.f32.gmra.mxu1 %vm474_vm1, %v468_v5 }
 0x107   : > { %v449_v6 = vpop.f32.mrf.mxu0 }
 0x108   : > { %v450_v7 = vadd.f32 %v4669_v25, %v449_v6 }
 0x10a   : > { %v469_v9 = vmax.f32 %v450_v7, 0.0 }
 0x10c   : > { %3840 = vmatmul.msk.f32.gmra.mxu1 %vm474_vm1, %v469_v9 }
 0x10f   : > { %v452_v17 = vpop.f32.mrf.mxu0 }
 0x110   : > { %v453_v21 = vadd.f32 %v4669_v25, %v452_v17 }
 0x112   : > { %v470_v26 = vmax.f32 %v453_v21, 0.0 }
 0x114   : > { %3841 = vmatmul.msk.f32.gmra.mxu1 %vm474_vm1, %v470_v26 }
 0x119   : > { %v540_v10 = vpop.f32.mrf.mxu1 }
 0x11a   : > { %v541_v11 = vadd.f32 %v4715_v8, %v540_v10 }
 0x11c   : > { %v588_v19 = vmax.f32 %v541_v11, 0.0 }
 0x11e   : > { %v607_v24 = vmul.f32 %v4722_v12, %v588_v19 }
 0x120   : > { %v624_v27 = vsel %vm623_vm2, %v607_v24, 0.0 }
 0x121   : > { %v543_v28 = vpop.f32.mrf.mxu1  ;;  %625 = vadd.xlane.f32.xlu0 %v624_v27 }
 0x122   : > { %v544_v29 = vadd.f32 %v4715_v8, %v543_v28 }
 0x124   : > { %v589_v30 = vmax.f32 %v544_v29, 0.0 }
 0x126   : > { %v608_v31 = vmul.f32 %v4722_v12, %v589_v30 }
 0x128   : > { %v627_v32 = vsel %vm623_vm2, %v608_v31, 0.0 }
 0x129   : > { %v546_v33 = vpop.f32.mrf.mxu1  ;;  %628 = vadd.xlane.f32.xlu0 %v627_v32 }
 0x12a   : > { %v547_v34 = vadd.f32 %v4715_v8, %v546_v33 }
 0x12c   : > { %v590_v35 = vmax.f32 %v547_v34, 0.0 }
 0x12e   : > { %v609_v36 = vmul.f32 %v4722_v12, %v590_v35 }
 0x130   : > { %v630_v37 = vsel %vm623_vm2, %v609_v36, 0.0 }
 0x131   : > { %v549_v38 = vpop.f32.mrf.mxu1  ;;  %631 = vadd.xlane.f32.xlu1 %v630_v37 }
 0x132   : > { %v550_v39 = vadd.f32 %v4715_v8, %v549_v38 }
 0x134   : > { %v591_v40 = vmax.f32 %v550_v39, 0.0 }
 0x136   : > { %v610_v41 = vmul.f32 %v4722_v12, %v591_v40 }
 0x138   : > { %v633_v42 = vsel %vm623_vm2, %v610_v41, 0.0 }
 0x139   : > { %v552_v43 = vpop.f32.mrf.mxu1  ;;  %634 = vadd.xlane.f32.xlu1 %v633_v42 }
 0x13a   : > { %v553_v44 = vadd.f32 %v4715_v8, %v552_v43 }
 0x13c   : > { %v592_v45 = vmax.f32 %v553_v44, 0.0 }
 0x13e   : > { %v611_v46 = vmul.f32 %v4722_v12, %v592_v45 }
 0x140   : > { %v636_v47 = vsel %vm623_vm2, %v611_v46, 0.0 }
 0x141   : > { %v555_v48 = vpop.f32.mrf.mxu1  ;;  %637 = vadd.xlane.f32.xlu2 %v636_v47 }
 0x142   : > { %v556_v49 = vadd.f32 %v4715_v8, %v555_v48 }
 0x144   : > { %v593_v50 = vmax.f32 %v556_v49, 0.0 }
 0x146   : > { %v612_v51 = vmul.f32 %v4722_v12, %v593_v50 }
 0x148   : > { %v639_v52 = vsel %vm623_vm2, %v612_v51, 0.0  ;;  %v4773_v51 = vld [vmem:[#allocation2] ss:$0 sm:$0xff] }
 0x149   : > { %v558_v53 = vpop.f32.mrf.mxu1  ;;  %640 = vadd.xlane.f32.xlu2 %v639_v52 }
 0x14a   : > { %v559_v54 = vadd.f32 %v4715_v8, %v558_v53 }
 0x14c   : > { %v594_v55 = vmax.f32 %v559_v54, 0.0 }
 0x14e   : > { %v613_v56 = vmul.f32 %v4722_v12, %v594_v55 }
 0x150   : > { %v642_v57 = vsel %vm623_vm2, %v613_v56, 0.0  ;;  %v3842_v56 = vld [vmem:[%s4588_s26 + $0x80] sm:$0xff] }
 0x151   : > { %v561_v58 = vpop.f32.mrf.mxu1  ;;  %643 = vadd.xlane.f32.xlu0 %v642_v57  ;;  %3858 = vmatmul.msk.f32.vlgmr.msra.gmra.mxu3 %vm341_vm0, %v3842_v56  ;;  %v693_v56 = vld [vmem:[%s6321_s7 + $0x10] sm:$0xff] }
 0x152   : > { %v562_v59 = vadd.f32 %v4715_v8, %v561_v58  ;;  %v3843_v58 = vld [vmem:[%s4588_s26 + $0x88] sm:$0xff] }
 0x154   : > { %v595_v60 = vmax.f32 %v562_v59, 0.0 }
 0x156   : > { %v614_v61 = vmul.f32 %v4722_v12, %v595_v60 }
 0x158   : > { %v645_v62 = vsel %vm623_vm2, %v614_v61, 0.0 }
 0x159   : > { %v564_v63 = vpop.f32.mrf.mxu1  ;;  %646 = vadd.xlane.f32.xlu1 %v645_v62  ;;  %3859 = vmatmul.msk.f32.gmra.mxu3 %vm341_vm0, %v3843_v58  ;;  %v3844_v62 = vld [vmem:[%s4588_s26 + $0x90] sm:$0xff]  ;;  %v692_v58 = vld [vmem:[%s6321_s7 + $0x8] sm:$0xff] }
 0x15a   : > { %v565_v0 = vadd.f32 %v4715_v8, %v564_v63 }
 0x15c   : > { %v596_v1 = vmax.f32 %v565_v0, 0.0  ;;  %v3845_v0 = vld [vmem:[%s4588_s26 + $0x98] sm:$0xff] }
 0x15e   : > { %v615_v2 = vmul.f32 %v4722_v12, %v596_v1 }
 0x160   : > { %v648_v3 = vsel %vm623_vm2, %v615_v2, 0.0 }
 0x161   : > { %v567_v4 = vpop.f32.mrf.mxu1  ;;  %649 = vadd.xlane.f32.xlu2 %v648_v3  ;;  %3860 = vmatmul.msk.f32.gmra.mxu3 %vm341_vm0, %v3844_v62  ;;  %v3846_v3 = vld [vmem:[%s4588_s26 + $0xa0] sm:$0xff]  ;;  %v3857_v62 = vld [vmem:[%s4588_s26 + $0xf8] sm:$0xff] }
 0x162   : > { %v568_v5 = vadd.f32 %v4715_v8, %v567_v4 }
 0x164   : > { %v597_v6 = vmax.f32 %v568_v5, 0.0 }
 0x166   : > { %v616_v7 = vmul.f32 %v4722_v12, %v597_v6  ;;  %v3847_v6 = vld [vmem:[%s4588_s26 + $0xa8] sm:$0xff] }
 0x168   : > { %v651_v9 = vsel %vm623_vm2, %v616_v7, 0.0 }
 0x169   : > { %v570_v10 = vpop.f32.mrf.mxu1  ;;  %652 = vadd.xlane.f32.xlu0 %v651_v9  ;;  %3861 = vmatmul.msk.f32.gmra.mxu3 %vm341_vm0, %v3845_v0 }
 0x16a   : > { %v571_v11 = vadd.f32 %v4715_v8, %v570_v10  ;;  %v3848_v10 = vld [vmem:[%s4588_s26 + $0xb0] sm:$0xff] }
 0x16c   : > { %v598_v17 = vmax.f32 %v571_v11, 0.0 }
 0x16e   : > { %v617_v19 = vmul.f32 %v4722_v12, %v598_v17 }
 0x170   : > { %v654_v21 = vsel %vm623_vm2, %v617_v19, 0.0  ;;  %v3849_v19 = vld [vmem:[%s4588_s26 + $0xb8] sm:$0xff] }
 0x171   : > { %v573_v24 = vpop.f32.mrf.mxu1  ;;  %655 = vadd.xlane.f32.xlu1 %v654_v21  ;;  %3862 = vmatmul.msk.f32.gmra.mxu3 %vm341_vm0, %v3846_v3 }
 0x172   : > { %v574_v26 = vadd.f32 %v4715_v8, %v573_v24 }
 0x174   : > { %v599_v27 = vmax.f32 %v574_v26, 0.0  ;;  %v3850_v26 = vld [vmem:[%s4588_s26 + $0xc0] sm:$0xff] }
 0x176   : > { %v618_v28 = vmul.f32 %v4722_v12, %v599_v27 }
 0x178   : > { %v657_v29 = vsel %vm623_vm2, %v618_v28, 0.0 }
 0x179   : > { %v576_v30 = vpop.f32.mrf.mxu1  ;;  %658 = vadd.xlane.f32.xlu2 %v657_v29  ;;  %3863 = vmatmul.msk.f32.gmra.mxu3 %vm341_vm0, %v3847_v6  ;;  %v3851_v29 = vld [vmem:[%s4588_s26 + $0xc8] sm:$0xff] }
 0x17a   : > { %v577_v31 = vadd.f32 %v4715_v8, %v576_v30 }
 0x17c   : > { %v600_v32 = vmax.f32 %v577_v31, 0.0 }
 0x17e   : > { %v619_v33 = vmul.f32 %v4722_v12, %v600_v32  ;;  %v3852_v32 = vld [vmem:[%s4588_s26 + $0xd0] sm:$0xff] }
 0x180   : > { %v660_v34 = vsel %vm623_vm2, %v619_v33, 0.0  ;;  %v706_v33 = vld [vmem:[%s6321_s7 + $0x78] sm:$0xff] }
 0x181   : > { %v579_v35 = vpop.f32.mrf.mxu1  ;;  %661 = vadd.xlane.f32.xlu0 %v660_v34  ;;  %3864 = vmatmul.msk.f32.gmra.mxu3 %vm341_vm0, %v3848_v10  ;;  %v705_v34 = vld [vmem:[%s6321_s7 + $0x70] sm:$0xff] }
 0x182   : > { %v580_v36 = vadd.f32 %v4715_v8, %v579_v35  ;;  %739 = vmatpush.msra.mxu2 %v706_v33  ;;  %1163 = vmatpush.msra.mxu3 %v706_v33  ;;  %v704_v35 = vld [vmem:[%s6321_s7 + $0x68] sm:$0xff] }
 0x183   : > { %1587 = vmatpush.msra.mxu0 %v706_v33 }
 0x184   : > { %v601_v37 = vmax.f32 %v580_v36, 0.0  ;;  %740 = vmatpush.msra.mxu2 %v705_v34  ;;  %1164 = vmatpush.msra.mxu3 %v705_v34 }
 0x185   : > { %1588 = vmatpush.msra.mxu0 %v705_v34 }
 0x186   : > { %v620_v38 = vmul.f32 %v4722_v12, %v601_v37  ;;  %v703_v37 = vld [vmem:[%s6321_s7 + $0x60] sm:$0xff]  ;;  %741 = vmatpush.msra.mxu2 %v704_v35  ;;  %1165 = vmatpush.msra.mxu3 %v704_v35 }
 0x187   : > { %1589 = vmatpush.msra.mxu0 %v704_v35 }
 0x188   : > { %v663_v39 = vsel %vm623_vm2, %v620_v38, 0.0  ;;  %742 = vmatpush.msra.mxu2 %v703_v37  ;;  %1166 = vmatpush.msra.mxu3 %v703_v37 }
 0x189   : > { %664 = vadd.xlane.f32.xlu1 %v663_v39  ;;  %v582_v40 = vpop.f32.mrf.mxu1  ;;  %3865 = vmatmul.msk.f32.gmra.mxu3 %vm341_vm0, %v3849_v19  ;;  %v702_v39 = vld [vmem:[%s6321_s7 + $0x58] sm:$0xff] }
 0x18a   : > { %v583_v41 = vadd.f32 %v4715_v8, %v582_v40  ;;  %v3853_v40 = vld [vmem:[%s4588_s26 + $0xd8] sm:$0xff]  ;;  %743 = vmatpush.msra.mxu2 %v702_v39  ;;  %1590 = vmatpush.msra.mxu0 %v703_v37 }
 0x18b   : > { %1167 = vmatpush.msra.mxu3 %v702_v39 }
 0x18c   : > { %v602_v42 = vmax.f32 %v583_v41, 0.0  ;;  %v701_v41 = vld [vmem:[%s6321_s7 + $0x50] sm:$0xff]  ;;  %1591 = vmatpush.msra.mxu0 %v702_v39 }
 0x18d   : > { %744 = vmatpush.msra.mxu2 %v701_v41  ;;  %1168 = vmatpush.msra.mxu3 %v701_v41 }
 0x18e   : > { %v621_v43 = vmul.f32 %v4722_v12, %v602_v42  ;;  %v700_v42 = vld [vmem:[%s6321_s7 + $0x48] sm:$0xff]  ;;  %1592 = vmatpush.msra.mxu0 %v701_v41 }
 0x18f   : > { %745 = vmatpush.msra.mxu2 %v700_v42  ;;  %1169 = vmatpush.msra.mxu3 %v700_v42 }
 0x190   : > { %v666_v44 = vsel %vm623_vm2, %v621_v43, 0.0  ;;  %1593 = vmatpush.msra.mxu0 %v700_v42 }
 0x191   : > { %v585_v45 = vpop.f32.mrf.mxu1  ;;  %667 = vadd.xlane.f32.xlu2 %v666_v44  ;;  %3866 = vmatmul.msk.f32.gmra.mxu3 %vm341_vm0, %v3850_v26  ;;  %v699_v44 = vld [vmem:[%s6321_s7 + $0x40] sm:$0xff] }
 0x192   : > { %v586_v46 = vadd.f32 %v4715_v8, %v585_v45  ;;  %746 = vmatpush.msra.mxu2 %v699_v44  ;;  %1170 = vmatpush.msra.mxu3 %v699_v44 }
 0x194   : > { %v603_v47 = vmax.f32 %v586_v46, 0.0  ;;  %v626_v50 = vpop.xlane.xlu0 %625  ;;  %v698_v46 = vld [vmem:[%s6321_s7 + $0x38] sm:$0xff] }
 0x195   : > { %v675_v52 = vadd.f32 %v4773_v51, %v626_v50  ;;  %747 = vmatpush.msra.mxu2 %v698_v46  ;;  %v696_v50 = vld [vmem:[%s6321_s7 + $0x28] sm:$0xff]  ;;  %1171 = vmatpush.msra.mxu3 %v698_v46 }
 0x196   : > { %v622_v48 = vmul.f32 %v4722_v12, %v603_v47  ;;  %v3854_v47 = vld [vmem:[%s4588_s26 + $0xe0] sm:$0xff] }
 0x198   : > { %v669_v49 = vsel %vm623_vm2, %v622_v48, 0.0  ;;  %v697_v48 = vld [vmem:[%s6321_s7 + $0x30] sm:$0xff] }
 0x199   : > { %670 = vadd.xlane.f32.xlu0 %v669_v49  ;;  %3867 = vmatmul.msk.f32.gmra.mxu3 %vm341_vm0, %v3851_v29 }
 0x19a   : > { %748 = vmatpush.msra.mxu2 %v697_v48  ;;  %1172 = vmatpush.msra.mxu3 %v697_v48 }
 0x19c   : > { %v629_v53 = vpop.xlane.xlu0 %628  ;;  %749 = vmatpush.msra.mxu2 %v696_v50  ;;  %1173 = vmatpush.msra.mxu3 %v696_v50 }
 0x19d   : > { %v676_v54 = vadd.f32 %v4773_v51, %v629_v53  ;;  %v695_v53 = vld [vmem:[%s6321_s7 + $0x20] sm:$0xff] }
 0x19e   : > { %750 = vmatpush.msra.mxu2 %v695_v53  ;;  %1174 = vmatpush.msra.mxu3 %v695_v53 }
 0x1a1   : > { %3868 = vmatmul.msk.f32.gmra.mxu3 %vm341_vm0, %v3852_v32 }
 0x1a4   : > { %v632_v55 = vpop.xlane.xlu1 %631 }
 0x1a5   : > { %v677_v57 = vadd.f32 %v4773_v51, %v632_v55  ;;  %v3855_v55 = vld [vmem:[%s4588_s26 + $0xe8] sm:$0xff] }
 0x1a9   : > { %3869 = vmatmul.msk.f32.gmra.mxu3 %vm341_vm0, %v3853_v40 }
 0x1ac   : > { %v635_v59 = vpop.xlane.xlu1 %634 }
 0x1ad   : > { %v678_v60 = vadd.f32 %v4773_v51, %v635_v59 }
 0x1b1   : > { %3870 = vmatmul.msk.f32.gmra.mxu3 %vm341_vm0, %v3854_v47 }
 0x1b4   : > { %v638_v61 = vpop.xlane.xlu2 %637 }
 0x1b5   : > { %v679_v63 = vadd.f32 %v4773_v51, %v638_v61  ;;  %v3856_v61 = vld [vmem:[%s4588_s26 + $0xf0] sm:$0xff] }
 0x1b9   : > { %3871 = vmatmul.msk.f32.gmra.mxu3 %vm341_vm0, %v3855_v55 }
 0x1bc   : > { %v641_v1 = vpop.xlane.xlu2 %640 }
 0x1bd   : > { %v680_v2 = vadd.f32 %v4773_v51, %v641_v1 }
 0x1c1   : > { %3872 = vmatmul.msk.f32.gmra.mxu3 %vm341_vm0, %v3856_v61 }
 0x1c3   : > { %707 = vxpose.xlu1.b32.start [1/16] (narrow) %v675_v52, 8 }
 0x1c4   : > { %v644_v4 = vpop.xlane.xlu0 %643 }
 0x1c5   : > { %v681_v5 = vadd.f32 %v4773_v51, %v644_v4 }
 0x1c9   : > { %3873 = vmatmul.msk.f32.gmra.mxu3 %vm341_vm0, %v3857_v62 }
 0x1cb   : > { %708 = vxpose.xlu1.b32.cont [2/16] (narrow) %v676_v54, 8  ;;  %v694_v54 = vld [vmem:[%s6321_s7 + $0x18] sm:$0xff] }
 0x1cc   : > { %v647_v7 = vpop.xlane.xlu1 %646  ;;  %751 = vmatpush.msra.mxu2 %v694_v54  ;;  %1175 = vmatpush.msra.mxu3 %v694_v54 }
 0x1cd   : > { %v682_v9 = vadd.f32 %v4773_v51, %v647_v7 }
 0x1ce   : > { %752 = vmatpush.msra.mxu2 %v693_v56  ;;  %1176 = vmatpush.msra.mxu3 %v693_v56 }
 0x1d0   : > { %753 = vmatpush.msra.mxu2 %v692_v58  ;;  %1177 = vmatpush.msra.mxu3 %v692_v58 }
 0x1d3   : > { %709 = vxpose.xlu1.b32.cont [3/16] (narrow) %v677_v57, 8 }
 0x1d4   : > { %v650_v11 = vpop.xlane.xlu2 %649 }
 0x1d5   : > { %v683_v17 = vadd.f32 %v4773_v51, %v650_v11 }
 0x1db   : > { %710 = vxpose.xlu1.b32.cont [4/16] (narrow) %v678_v60, 8  ;;  %v691_v60 = vld [vmem:[%s6321_s7] sm:$0xff] }
 0x1dc   : > { %v653_v21 = vpop.xlane.xlu0 %652  ;;  %754 = vmatpush.msra.mxu2 %v691_v60  ;;  %1178 = vmatpush.msra.mxu3 %v691_v60 }
 0x1dd   : > { %v684_v24 = vadd.f32 %v4773_v51, %v653_v21 }
 0x1e3   : > { %711 = vxpose.xlu1.b32.cont [5/16] (narrow) %v679_v63, 8  ;;  %v842_v63 = vpop.f32.mrf.mxu3 }
 0x1e4   : > { %v656_v27 = vpop.xlane.xlu1 %655  ;;  %v843_v4 = vadd.f32 %v4669_v25, %v842_v63 }
 0x1e5   : > { %v685_v28 = vadd.f32 %v4773_v51, %v656_v27 }
 0x1eb   : > { %712 = vxpose.xlu1.b32.cont [6/16] (narrow) %v680_v2, 8  ;;  %v845_v0 = vpop.f32.mrf.mxu3 }
 0x1ec   : > { %v659_v30 = vpop.xlane.xlu2 %658  ;;  %v846_v7 = vadd.f32 %v4669_v25, %v845_v0 }
 0x1ed   : > { %v686_v31 = vadd.f32 %v4773_v51, %v659_v30 }
 0x1f3   : > { %713 = vxpose.xlu1.b32.cont [7/16] (narrow) %v681_v5, 8  ;;  %v848_v1 = vpop.f32.mrf.mxu3  ;;  %v890_v5 = vmax.f32 %v843_v4, 0.0 }
 0x1f4   : > { %v662_v36 = vpop.xlane.xlu0 %661  ;;  %v849_v10 = vadd.f32 %v4669_v25, %v848_v1 }
 0x1f5   : > { %v687_v38 = vadd.f32 %v4773_v51, %v662_v36 }
 0x1fb   : > { %714 = vxpose.xlu1.b32.cont [8/16] (narrow) %v682_v9, 8  ;;  %v851_v3 = vpop.f32.mrf.mxu3  ;;  %v891_v9 = vmax.f32 %v846_v7, 0.0 }
 0x1fc   : > { %v665_v43 = vpop.xlane.xlu1 %664 }
 0x1fd   : > { %v688_v45 = vadd.f32 %v4773_v51, %v665_v43 }
 0x203   : > { %715 = vxpose.xlu1.b32.cont [9/16] (narrow) %v683_v17, 8  ;;  %v854_v6 = vpop.f32.mrf.mxu3  ;;  %v892_v17 = vmax.f32 %v849_v10, 0.0 }
 0x204   : > { %v668_v49 = vpop.xlane.xlu2 %667 }
 0x205   : > { %v689_v52 = vadd.f32 %v4773_v51, %v668_v49 }
 0x20b   : > { %716 = vxpose.xlu1.b32.cont [10/16] (narrow) %v684_v24, 8  ;;  %v857_v11 = vpop.f32.mrf.mxu3 }
 0x20c   : > { %v671_v57 = vpop.xlane.xlu0 %670 }
 0x20d   : > { %v690_v59 = vadd.f32 %v4773_v51, %v671_v57 }
 0x213   : > { %717 = vxpose.xlu1.b32.cont [11/16] (narrow) %v685_v28, 8 }
 0x21b   : > { %718 = vxpose.xlu1.b32.cont [12/16] (narrow) %v686_v31, 8 }
 0x223   : > { %719 = vxpose.xlu1.b32.cont [13/16] (narrow) %v687_v38, 8 }
 0x22b   : > { %720 = vxpose.xlu1.b32.cont [14/16] (narrow) %v688_v45, 8 }
 0x233   : > { %721 = vxpose.xlu1.b32.cont [15/16] (narrow) %v689_v52, 8 }
 0x23b   : > { %722 = vxpose.xlu1.b32.end [16/16] (narrow) %v690_v59, 8 }
 0x267   : > { %v723_v2 = vpop.trf.xlu1 }
 0x268   : > { %755 = vmatmul.f32.vlgmr.msra.gmra.mxu2 %v723_v2 }
 0x269   : > { %962 = vmatpush.msra.mxu2 %v4613_v13 }
 0x26b   : > { %963 = vmatpush.msra.mxu2 %v4618_v14 }
 0x26d   : > { %964 = vmatpush.msra.mxu2 %v4624_v15 }
 0x26f   : > { %965 = vmatpush.msra.mxu2 %v4630_v16 }
 0x271   : > { %966 = vmatpush.msra.mxu2 %v4637_v18 }
 0x273   : > { %967 = vmatpush.msra.mxu2 %v4647_v20 }
 0x275   : > { %968 = vmatpush.msra.mxu2 %v4654_v22 }
 0x277   : > { %969 = vmatpush.msra.mxu2 %v4661_v23 }
 0x278   : > { %3874 = vmatmul.msk.f32.vlgmr.msra.gmra.mxu2 %vm474_vm1, %v890_v5 }
 0x279   : > { %1810 = vmatpush.msra.mxu2 %v4613_v13  ;;  %v852_v13 = vadd.f32 %v4669_v25, %v851_v3 }
 0x27b   : > { %1811 = vmatpush.msra.mxu2 %v4618_v14  ;;  %v860_v14 = vpop.f32.mrf.mxu3 }
 0x27d   : > { %1812 = vmatpush.msra.mxu2 %v4624_v15  ;;  %v893_v15 = vmax.f32 %v852_v13, 0.0 }
 0x27f   : > { %1813 = vmatpush.msra.mxu2 %v4630_v16  ;;  %v855_v16 = vadd.f32 %v4669_v25, %v854_v6 }
 0x280   : > { %3875 = vmatmul.msk.f32.gmra.mxu2 %vm474_vm1, %v891_v9 }
 0x281   : > { %1814 = vmatpush.msra.mxu2 %v4637_v18  ;;  %v894_v19 = vmax.f32 %v855_v16, 0.0  ;;  %v858_v18 = vadd.f32 %v4669_v25, %v857_v11 }
 0x283   : > { %1815 = vmatpush.msra.mxu2 %v4647_v20  ;;  %v863_v21 = vpop.f32.mrf.mxu3  ;;  %v895_v20 = vmax.f32 %v858_v18, 0.0 }
 0x284   : > { %v864_v26 = vadd.f32 %v4669_v25, %v863_v21 }
 0x285   : > { %1816 = vmatpush.msra.mxu2 %v4654_v22 }
 0x286   : > { %v897_v28 = vmax.f32 %v864_v26, 0.0 }
 0x287   : > { %1817 = vmatpush.msra.mxu2 %v4661_v23  ;;  %v861_v23 = vadd.f32 %v4669_v25, %v860_v14 }
 0x288   : > { %3876 = vmatmul.msk.f32.gmra.mxu2 %vm474_vm1, %v892_v17 }
 0x289   : > { %v896_v24 = vmax.f32 %v861_v23, 0.0 }
 0x28b   : > { %v866_v22 = vpop.f32.mrf.mxu3 }
 0x28c   : > { %v867_v29 = vadd.f32 %v4669_v25, %v866_v22 }
 0x28e   : > { %v898_v31 = vmax.f32 %v867_v29, 0.0 }
 0x290   : > { %3877 = vmatmul.msk.f32.gmra.mxu2 %vm474_vm1, %v893_v15 }
 0x293   : > { %v869_v27 = vpop.f32.mrf.mxu3 }
 0x294   : > { %v870_v32 = vadd.f32 %v4669_v25, %v869_v27 }
 0x296   : > { %v899_v33 = vmax.f32 %v870_v32, 0.0 }
 0x298   : > { %3878 = vmatmul.msk.f32.gmra.mxu2 %vm474_vm1, %v894_v19 }
 0x29b   : > { %v872_v30 = vpop.f32.mrf.mxu3 }
 0x29c   : > { %v873_v35 = vadd.f32 %v4669_v25, %v872_v30 }
 0x29e   : > { %v900_v36 = vmax.f32 %v873_v35, 0.0 }
 0x2a0   : > { %3879 = vmatmul.msk.f32.gmra.mxu2 %vm474_vm1, %v895_v20 }
 0x2a3   : > { %v875_v34 = vpop.f32.mrf.mxu3 }
 0x2a4   : > { %v876_v38 = vadd.f32 %v4669_v25, %v875_v34 }
 0x2a6   : > { %v901_v39 = vmax.f32 %v876_v38, 0.0 }
 0x2a8   : > { %3880 = vmatmul.msk.f32.gmra.mxu2 %vm474_vm1, %v896_v24 }
 0x2ab   : > { %v878_v37 = vpop.f32.mrf.mxu3 }
 0x2ac   : > { %v879_v40 = vadd.f32 %v4669_v25, %v878_v37 }
 0x2ae   : > { %v902_v42 = vmax.f32 %v879_v40, 0.0 }
 0x2b0   : > { %3881 = vmatmul.msk.f32.gmra.mxu2 %vm474_vm1, %v897_v28 }
 0x2b3   : > { %v881_v41 = vpop.f32.mrf.mxu3 }
 0x2b4   : > { %v882_v43 = vadd.f32 %v4669_v25, %v881_v41 }
 0x2b6   : > { %v903_v45 = vmax.f32 %v882_v43, 0.0 }
 0x2b8   : > { %3882 = vmatmul.msk.f32.gmra.mxu2 %vm474_vm1, %v898_v31 }
 0x2bb   : > { %v884_v44 = vpop.f32.mrf.mxu3 }
 0x2bc   : > { %v885_v46 = vadd.f32 %v4669_v25, %v884_v44 }
 0x2be   : > { %v904_v47 = vmax.f32 %v885_v46, 0.0 }
 0x2c0   : > { %3883 = vmatmul.msk.f32.gmra.mxu2 %vm474_vm1, %v899_v33 }
 0x2c3   : > { %v887_v48 = vpop.f32.mrf.mxu3 }
 0x2c4   : > { %v888_v49 = vadd.f32 %v4669_v25, %v887_v48 }
 0x2c6   : > { %v905_v52 = vmax.f32 %v888_v49, 0.0 }
 0x2c8   : > { %3884 = vmatmul.msk.f32.gmra.mxu2 %vm474_vm1, %v900_v36 }
 0x2d0   : > { %3885 = vmatmul.msk.f32.gmra.mxu2 %vm474_vm1, %v901_v39 }
 0x2d8   : > { %3886 = vmatmul.msk.f32.gmra.mxu2 %vm474_vm1, %v902_v42 }
 0x2e0   : > { %3887 = vmatmul.msk.f32.gmra.mxu2 %vm474_vm1, %v903_v45 }
 0x2e8   : > { %3888 = vmatmul.msk.f32.gmra.mxu2 %vm474_vm1, %v904_v47 }
 0x2eb   : > { %v756_v50 = vpop.f32.mrf.mxu2 }
 0x2ec   : > { %759 = vst [vmem:[%s4921_s14] sm:$0x1] %v756_v50 }
 0x2f0   : > { %3889 = vmatmul.msk.f32.gmra.mxu2 %vm474_vm1, %v905_v52 }
 0x2fb   : > { %v4925_v53 = vpop.f32.mrf.mxu2 }
 0x303   : > { %v4927_v54 = vpop.f32.mrf.mxu2 }
 0x30b   : > { %v4929_v55 = vpop.f32.mrf.mxu2 }
 0x30c   : > { %v978_v47 = vadd.f32 %v4715_v8, %v4929_v55 }
 0x30e   : > { %v1021_v52 = vmax.f32 %v978_v47, 0.0  ;;  %v3896_v47 = vld [vmem:[%s4588_s26 + $0x130] sm:$0xff] }
 0x313   : > { %v4931_v56 = vpop.f32.mrf.mxu2 }
 0x314   : > { %v981_v55 = vadd.f32 %v4715_v8, %v4931_v56 }
 0x31b   : > { %v983_v57 = vpop.f32.mrf.mxu2 }
 0x31c   : > { %v984_v38 = vadd.f32 %v4715_v8, %v983_v57 }
 0x31e   : > { %v1023_v43 = vmax.f32 %v984_v38, 0.0 }
 0x320   : > { %v1039_v50 = vmul.f32 %v4722_v12, %v1023_v43  ;;  %v3892_v43 = vld [vmem:[%s4588_s26 + $0x110] sm:$0xff] }
 0x323   : > { %v986_v58 = vpop.f32.mrf.mxu2 }
 0x324   : > { %v987_v48 = vadd.f32 %v4715_v8, %v986_v58 }
 0x326   : > { %v1024_v57 = vmax.f32 %v987_v48, 0.0  ;;  %v3897_v48 = vld [vmem:[%s4588_s26 + $0x138] sm:$0xff] }
 0x328   : > { %v1040_v58 = vmul.f32 %v4722_v12, %v1024_v57  ;;  %v3901_v57 = vld [vmem:[%s4588_s26 + $0x158] sm:$0xff] }
 0x32b   : > { %v989_v59 = vpop.f32.mrf.mxu2 }
 0x32c   : > { %v990_v31 = vadd.f32 %v4715_v8, %v989_v59 }
 0x32e   : > { %v1025_v34 = vmax.f32 %v990_v31, 0.0 }
 0x330   : > { %v1041_v41 = vmul.f32 %v4722_v12, %v1025_v34 }
 0x332   : > { %v1069_v46 = vsel %vm623_vm2, %v1041_v41, 0.0  ;;  %v5010_v41 = vld [vmem:[%s6315_s1] sm:$0xff] }
 0x333   : > { %v992_v25 = vpop.f32.mrf.mxu2 }
 0x334   : > { %v993_v39 = vadd.f32 %v4715_v8, %v992_v25  ;;  %v1063_v25 = vsel %vm623_vm2, %v1039_v50, 0.0  ;;  %v3899_v50 = vld [vmem:[%s4588_s26 + $0x148] sm:$0xff] }
 0x336   : > { %v1026_v44 = vmax.f32 %v993_v39, 0.0 }
 0x338   : > { %v1042_v49 = vmul.f32 %v4722_v12, %v1026_v44  ;;  %v3893_v44 = vld [vmem:[%s4588_s26 + $0x118] sm:$0xff] }
 0x33a   : > { %v1072_v59 = vsel %vm623_vm2, %v1042_v49, 0.0  ;;  %v3898_v49 = vld [vmem:[%s4588_s26 + $0x140] sm:$0xff] }
 0x33b   : > { %v995_v60 = vpop.f32.mrf.mxu2 }
 0x33c   : > { %v996_v61 = vadd.f32 %v4715_v8, %v995_v60  ;;  %v972_v60 = vadd.f32 %v4715_v8, %v4925_v53 }
 0x33e   : > { %v1027_v62 = vmax.f32 %v996_v61, 0.0  ;;  %v1037_v61 = vmul.f32 %v4722_v12, %v1021_v52  ;;  %v3900_v52 = vld [vmem:[%s4588_s26 + $0x150] sm:$0xff] }
 0x340   : > { %v1043_v63 = vmul.f32 %v4722_v12, %v1027_v62  ;;  %v1019_v62 = vmax.f32 %v972_v60, 0.0  ;;  %v3904_v60 = vld [vmem:[%s4588_s26 + $0x170] sm:$0xff] }
 0x342   : > { %v1075_v0 = vsel %vm623_vm2, %v1043_v63, 0.0  ;;  %v1022_v63 = vmax.f32 %v981_v55, 0.0  ;;  %v3905_v55 = vld [vmem:[%s4588_s26 + $0x178] sm:$0xff] }
 0x343   : > { %v998_v1 = vpop.f32.mrf.mxu2  ;;  %1076 = vadd.xlane.f32.xlu0 %v1075_v0  ;;  %v1066_v0 = vsel %vm623_vm2, %v1040_v58, 0.0 }
 0x344   : > { %v999_v2 = vadd.f32 %v4715_v8, %v998_v1  ;;  %v1057_v1 = vsel %vm623_vm2, %v1037_v61, 0.0  ;;  %v1038_v53 = vmul.f32 %v4722_v12, %v1022_v63 }
 0x346   : > { %v1028_v3 = vmax.f32 %v999_v2, 0.0  ;;  %v975_v2 = vadd.f32 %v4715_v8, %v4927_v54 }
 0x348   : > { %v1044_v4 = vmul.f32 %v4722_v12, %v1028_v3  ;;  %v1035_v3 = vmul.f32 %v4722_v12, %v1019_v62  ;;  %v1020_v56 = vmax.f32 %v975_v2, 0.0  ;;  %v5049_v62 = vld [vmem:[%s6316_s2] ss:$0 sm:$0xff] }
 0x34a   : > { %v1078_v5 = vsel %vm623_vm2, %v1044_v4, 0.0  ;;  %v1060_v4 = vsel %vm623_vm2, %v1038_v53, 0.0  ;;  %v4381_v53 = vld [vmem:[%s6317_s3 + $0x30] sm:$0xff] }
 0x34b   : > { %v1001_v6 = vpop.f32.mrf.mxu2  ;;  %1079 = vadd.xlane.f32.xlu2 %v1078_v5  ;;  %v1051_v5 = vsel %vm623_vm2, %v1035_v3, 0.0 }
 0x34c   : > { %v1002_v7 = vadd.f32 %v4715_v8, %v1001_v6  ;;  %v1036_v6 = vmul.f32 %v4722_v12, %v1020_v56  ;;  %v4382_v56 = vld [vmem:[%s6317_s3 + $0x28] sm:$0xff] }
 0x34e   : > { %v1029_v9 = vmax.f32 %v1002_v7, 0.0  ;;  %v1054_v7 = vsel %vm623_vm2, %v1036_v6, 0.0  ;;  %v4384_v6 = vld [vmem:[%s6317_s3 + $0x18] sm:$0xff] }
 0x350   : > { %v1045_v10 = vmul.f32 %v4722_v12, %v1029_v9 }
 0x352   : > { %v1081_v11 = vsel %vm623_vm2, %v1045_v10, 0.0 }
 0x353   : > { %v1004_v17 = vpop.f32.mrf.mxu2  ;;  %1082 = vadd.xlane.f32.xlu0 %v1081_v11 }
 0x354   : > { %v1005_v13 = vadd.f32 %v4715_v8, %v1004_v17 }
 0x356   : > { %v1030_v14 = vmax.f32 %v1005_v13, 0.0 }
 0x358   : > { %v1046_v15 = vmul.f32 %v4722_v12, %v1030_v14 }
 0x35a   : > { %v1084_v16 = vsel %vm623_vm2, %v1046_v15, 0.0 }
 0x35b   : > { %v1007_v19 = vpop.f32.mrf.mxu2  ;;  %1085 = vadd.xlane.f32.xlu2 %v1084_v16 }
 0x35c   : > { %v1008_v21 = vadd.f32 %v4715_v8, %v1007_v19 }
 0x35e   : > { %v1031_v18 = vmax.f32 %v1008_v21, 0.0 }
 0x360   : > { %v1047_v20 = vmul.f32 %v4722_v12, %v1031_v18 }
 0x362   : > { %v1087_v22 = vsel %vm623_vm2, %v1047_v20, 0.0 }
 0x363   : > { %v1010_v23 = vpop.f32.mrf.mxu2  ;;  %1088 = vadd.xlane.f32.xlu0 %v1087_v22 }
 0x364   : > { %v1011_v24 = vadd.f32 %v4715_v8, %v1010_v23 }
 0x366   : > { %v1032_v26 = vmax.f32 %v1011_v24, 0.0 }
 0x368   : > { %v1048_v27 = vmul.f32 %v4722_v12, %v1032_v26 }
 0x36a   : > { %v1090_v28 = vsel %vm623_vm2, %v1048_v27, 0.0 }
 0x36b   : > { %v1013_v29 = vpop.f32.mrf.mxu2  ;;  %1091 = vadd.xlane.f32.xlu2 %v1090_v28 }
 0x36c   : > { %v1014_v30 = vadd.f32 %v4715_v8, %v1013_v29 }
 0x36e   : > { %v1033_v32 = vmax.f32 %v1014_v30, 0.0 }
 0x370   : > { %v1049_v33 = vmul.f32 %v4722_v12, %v1033_v32 }
 0x372   : > { %v1093_v35 = vsel %vm623_vm2, %v1049_v33, 0.0 }
 0x373   : > { %v1016_v36 = vpop.f32.mrf.mxu2  ;;  %1094 = vadd.xlane.f32.xlu0 %v1093_v35 }
 0x374   : > { %v1017_v37 = vadd.f32 %v4715_v8, %v1016_v36 }
 0x376   : > { %v1034_v40 = vmax.f32 %v1017_v37, 0.0 }
 0x378   : > { %v1050_v42 = vmul.f32 %v4722_v12, %v1034_v40  ;;  %v5004_v40 = vld [vmem:[%s6315_s1 + $0x8] sm:$0xff] }
 0x37a   : > { %v1096_v45 = vsel %vm623_vm2, %v1050_v42, 0.0  ;;  %v3891_v42 = vld [vmem:[%s4588_s26 + $0x108] sm:$0xff] }
 0x37b   : > { %1097 = vadd.xlane.f32.xlu2 %v1096_v45  ;;  %1070 = vadd.xlane.f32.xlu0 %v1069_v46  ;;  %v3894_v45 = vld [vmem:[%s4588_s26 + $0x120] sm:$0xff]  ;;  %v3895_v46 = vld [vmem:[%s4588_s26 + $0x128] sm:$0xff] }
 0x383   : > { %1073 = vadd.xlane.f32.xlu2 %v1072_v59  ;;  %1064 = vadd.xlane.f32.xlu0 %v1063_v25  ;;  %v3902_v59 = vld [vmem:[%s4588_s26 + $0x160] sm:$0xff]  ;;  %v3903_v25 = vld [vmem:[%s4588_s26 + $0x168] sm:$0xff] }
 0x38b   : > { %1067 = vadd.xlane.f32.xlu2 %v1066_v0  ;;  %1058 = vadd.xlane.f32.xlu0 %v1057_v1  ;;  %v4380_v1 = vld [vmem:[%s6317_s3 + $0x38] sm:$0xff] }
 0x393   : > { %1061 = vadd.xlane.f32.xlu2 %v1060_v4  ;;  %1052 = vadd.xlane.f32.xlu0 %v1051_v5  ;;  %v4383_v5 = vld [vmem:[%s6317_s3 + $0x20] sm:$0xff] }
 0x39b   : > { %1055 = vadd.xlane.f32.xlu2 %v1054_v7 }
 0x3b6   : > { %v1077_v9 = vpop.xlane.xlu0 %1076 }
 0x3b7   : > { %v1107_v26 = vadd.f32 %v4773_v51, %v1077_v9  ;;  %v4385_v9 = vld [vmem:[%s6317_s3 + $0x10] sm:$0xff] }
 0x3be   : > { %v1080_v10 = vpop.xlane.xlu2 %1079 }
 0x3bf   : > { %v1108_v24 = vadd.f32 %v4773_v51, %v1080_v10 }
 0x3c6   : > { %v1083_v11 = vpop.xlane.xlu0 %1082 }
 0x3c7   : > { %v1109_v22 = vadd.f32 %v4773_v51, %v1083_v11  ;;  %v4386_v11 = vld [vmem:[%s6317_s3 + $0x8] sm:$0xff] }
 0x3ce   : > { %v1086_v8 = vpop.xlane.xlu2 %1085 }
 0x3cf   : > { %v1110_v20 = vadd.f32 %v4773_v51, %v1086_v8 }
 0x3d6   : > { %v1089_v54 = vpop.xlane.xlu0 %1088 }
 0x3d7   : > { %v1111_v12 = vadd.f32 %v4773_v51, %v1089_v54  ;;  %v4387_v54 = vld [vmem:[%s6317_s3] sm:$0xff] }
 0x3de   : > { %v1092_v17 = vpop.xlane.xlu2 %1091 }
 0x3df   : > { %v1112_v21 = vadd.f32 %v4773_v51, %v1092_v17 }
 0x3e6   : > { %v1095_v13 = vpop.xlane.xlu0 %1094 }
 0x3e7   : > { %v1113_v19 = vadd.f32 %v4773_v51, %v1095_v13 }
 0x3ee   : > { %v1098_v14 = vpop.xlane.xlu2 %1097  ;;  %v1071_v16 = vpop.xlane.xlu0 %1070 }
 0x3ef   : > { %v1114_v15 = vadd.f32 %v4773_v51, %v1098_v14  ;;  %v1105_v29 = vadd.f32 %v4773_v51, %v1071_v16 }
 0x3f1   : > { %4280 = vmatpush.lsf.msrb.mxu3 %v1114_v15 }
 0x3f3   : > { %4281 = vmatpush.lsf.msrb.mxu3 %v1113_v19 }
 0x3f5   : > { %4282 = vmatpush.lsf.msrb.mxu3 %v1112_v21 }
 0x3f6   : > { %v1074_v18 = vpop.xlane.xlu2 %1073  ;;  %v1065_v23 = vpop.xlane.xlu0 %1064 }
 0x3f7   : > { %4283 = vmatpush.lsf.msrb.mxu3 %v1111_v12  ;;  %v1106_v28 = vadd.f32 %v4773_v51, %v1074_v18  ;;  %v1103_v32 = vadd.f32 %v4773_v51, %v1065_v23 }
 0x3f9   : > { %4284 = vmatpush.lsf.msrb.mxu3 %v1110_v20 }
 0x3fb   : > { %4285 = vmatpush.lsf.msrb.mxu3 %v1109_v22 }
 0x3fd   : > { %4286 = vmatpush.lsf.msrb.mxu3 %v1108_v24 }
 0x3fe   : > { %v1068_v27 = vpop.xlane.xlu2 %1067  ;;  %v1059_v31 = vpop.xlane.xlu0 %1058 }
 0x3ff   : > { %4287 = vmatpush.lsf.msrb.mxu3 %v1107_v26  ;;  %v1104_v30 = vadd.f32 %v4773_v51, %v1068_v27  ;;  %v1101_v35 = vadd.f32 %v4773_v51, %v1059_v31 }
 0x401   : > { %4288 = vmatpush.lsf.msrb.mxu3 %v1106_v28 }
 0x403   : > { %4289 = vmatpush.lsf.msrb.mxu3 %v1105_v29 }
 0x405   : > { %4290 = vmatpush.lsf.msrb.mxu3 %v1104_v30 }
 0x406   : > { %v1062_v33 = vpop.xlane.xlu2 %1061  ;;  %v1053_v36 = vpop.xlane.xlu0 %1052 }
 0x407   : > { %v1102_v34 = vadd.f32 %v4773_v51, %v1062_v33  ;;  %4291 = vmatpush.lsf.msrb.mxu3 %v1103_v32  ;;  %v1099_v39 = vadd.f32 %v4773_v51, %v1053_v36 }
 0x409   : > { %4292 = vmatpush.lsf.msrb.mxu3 %v1102_v34 }
 0x40b   : > { %4293 = vmatpush.lsf.msrb.mxu3 %v1101_v35 }
 0x40e   : > { %v1056_v37 = vpop.xlane.xlu2 %1055 }
 0x40f   : > { %v1100_v38 = vadd.f32 %v4773_v51, %v1056_v37  ;;  %v3890_v51 = vld [vmem:[%s4588_s26 + $0x100] sm:$0xff] }
 0x411   : > { %4294 = vmatpush.lsf.msrb.mxu3 %v1100_v38 }
 0x413   : > { %4295 = vmatpush.lsf.msrb.mxu3 %v1099_v39 }
 0x414   : > { %4296 = vllmr.1.mxu3 }
 0x435   : > { %4297 = vmatmul.lmr.bf16.vlgmr.msra.gmra.1.mxu3 }
 0x436   : > { %1263 = vmatpush.msra.mxu3 %v5004_v40 }
 0x438   : > { %1264 = vmatpush.msra.mxu3 %v5010_v41 }
 0x43d   : > { %3906 = vmatmul.msk.f32.vlgmr.msra.gmra.mxu3 %vm341_vm0, %v3890_v51 }
 0x445   : > { %3907 = vmatmul.msk.f32.gmra.mxu3 %vm341_vm0, %v3891_v42 }
 0x44d   : > { %3908 = vmatmul.msk.f32.gmra.mxu3 %vm341_vm0, %v3892_v43 }
 0x455   : > { %3909 = vmatmul.msk.f32.gmra.mxu3 %vm341_vm0, %v3893_v44 }
 0x45d   : > { %3910 = vmatmul.msk.f32.gmra.mxu3 %vm341_vm0, %v3894_v45 }
 0x465   : > { %3911 = vmatmul.msk.f32.gmra.mxu3 %vm341_vm0, %v3895_v46 }
 0x46d   : > { %3912 = vmatmul.msk.f32.gmra.mxu3 %vm341_vm0, %v3896_v47 }
 0x475   : > { %3913 = vmatmul.msk.f32.gmra.mxu3 %vm341_vm0, %v3897_v48 }
 0x47d   : > { %3914 = vmatmul.msk.f32.gmra.mxu3 %vm341_vm0, %v3898_v49 }
 0x485   : > { %3915 = vmatmul.msk.f32.gmra.mxu3 %vm341_vm0, %v3899_v50 }
 0x48d   : > { %3916 = vmatmul.msk.f32.gmra.mxu3 %vm341_vm0, %v3900_v52 }
 0x495   : > { %3917 = vmatmul.msk.f32.gmra.mxu3 %vm341_vm0, %v3901_v57 }
 0x49d   : > { %3918 = vmatmul.msk.f32.gmra.mxu3 %vm341_vm0, %v3902_v59 }
 0x4a5   : > { %3919 = vmatmul.msk.f32.gmra.mxu3 %vm341_vm0, %v3903_v25 }
 0x4ad   : > { %3920 = vmatmul.msk.f32.gmra.mxu3 %vm341_vm0, %v3904_v60 }
 0x4b5   : > { %3921 = vmatmul.msk.f32.gmra.mxu3 %vm341_vm0, %v3905_v55 }
 0x4b8   : > { %v1180_v58 = vpop.f32.mrf.mxu3 }
 0x4b9   : > { %1183 = vst [vmem:[%s4921_s14 + $0x1] sm:$0x1] %v1180_v58 }
 0x4c0   : > { %v1266_v61 = vpop.f32.mrf.mxu3 }
 0x4c1   : > { %v1267_v63 = vadd.f32 %v5049_v62, %v1266_v61 }
 0x4c3   : > { %v1314_v0 = vmax.f32 %v1267_v63, 0.0 }
 0x4c5   : > { %3922 = vmatmul.msk.f32.vlgmr.msra.gmra.mxu1 %vm474_vm1, %v1314_v0 }
 0x4c6   : > { %2234 = vmatpush.msra.mxu1 %v4380_v1 }
 0x4c8   : > { %v1269_v2 = vpop.f32.mrf.mxu3  ;;  %2235 = vmatpush.msra.mxu1 %v4381_v53 }
 0x4c9   : > { %v1270_v3 = vadd.f32 %v5049_v62, %v1269_v2  ;;  %v5120_v2 = vld [vmem:[%s6318_s4] ss:$0 sm:$0xff] }
 0x4ca   : > { %2236 = vmatpush.msra.mxu1 %v4382_v56  ;;  %v5126_v56 = vld [vmem:[%s6319_s5] ss:$0 sm:$0xff] }
 0x4cb   : > { %v1315_v4 = vmax.f32 %v1270_v3, 0.0 }
 0x4cc   : > { %2237 = vmatpush.msra.mxu1 %v4383_v5 }
 0x4cd   : > { %3923 = vmatmul.msk.f32.gmra.mxu1 %vm474_vm1, %v1315_v4 }
 0x4ce   : > { %2238 = vmatpush.msra.mxu1 %v4384_v6 }
 0x4d0   : > { %v1272_v7 = vpop.f32.mrf.mxu3  ;;  %2239 = vmatpush.msra.mxu1 %v4385_v9 }
 0x4d1   : > { %v1273_v10 = vadd.f32 %v5049_v62, %v1272_v7 }
 0x4d2   : > { %2240 = vmatpush.msra.mxu1 %v4386_v11 }
 0x4d3   : > { %v1316_v8 = vmax.f32 %v1273_v10, 0.0 }
 0x4d4   : > { %2241 = vmatpush.msra.mxu1 %v4387_v54 }
 0x4d5   : > { %3924 = vmatmul.msk.f32.gmra.mxu1 %vm474_vm1, %v1316_v8 }
 0x4d8   : > { %v1275_v17 = vpop.f32.mrf.mxu3 }
 0x4d9   : > { %v1276_v13 = vadd.f32 %v5049_v62, %v1275_v17 }
 0x4db   : > { %v1317_v14 = vmax.f32 %v1276_v13, 0.0 }
 0x4dd   : > { %3925 = vmatmul.msk.f32.gmra.mxu1 %vm474_vm1, %v1317_v14 }
 0x4e0   : > { %v1278_v15 = vpop.f32.mrf.mxu3 }
 0x4e1   : > { %v1279_v16 = vadd.f32 %v5049_v62, %v1278_v15 }
 0x4e3   : > { %v1318_v19 = vmax.f32 %v1279_v16, 0.0 }
 0x4e5   : > { %3926 = vmatmul.msk.f32.gmra.mxu1 %vm474_vm1, %v1318_v19 }
 0x4e8   : > { %v1281_v21 = vpop.f32.mrf.mxu3 }
 0x4e9   : > { %v1282_v12 = vadd.f32 %v5049_v62, %v1281_v21 }
 0x4eb   : > { %v1319_v18 = vmax.f32 %v1282_v12, 0.0 }
 0x4ed   : > { %3927 = vmatmul.msk.f32.gmra.mxu1 %vm474_vm1, %v1319_v18 }
 0x4f0   : > { %v1284_v20 = vpop.f32.mrf.mxu3 }
 0x4f1   : > { %v1285_v22 = vadd.f32 %v5049_v62, %v1284_v20 }
 0x4f3   : > { %v1320_v23 = vmax.f32 %v1285_v22, 0.0 }
 0x4f5   : > { %3928 = vmatmul.msk.f32.gmra.mxu1 %vm474_vm1, %v1320_v23 }
 0x4f8   : > { %v1287_v24 = vpop.f32.mrf.mxu3 }
 0x4f9   : > { %v1288_v26 = vadd.f32 %v5049_v62, %v1287_v24 }
 0x4fb   : > { %v1321_v27 = vmax.f32 %v1288_v26, 0.0 }
 0x4fd   : > { %3929 = vmatmul.msk.f32.gmra.mxu1 %vm474_vm1, %v1321_v27 }
 0x500   : > { %v1290_v28 = vpop.f32.mrf.mxu3 }
 0x501   : > { %v1291_v29 = vadd.f32 %v5049_v62, %v1290_v28 }
 0x503   : > { %v1322_v30 = vmax.f32 %v1291_v29, 0.0 }
 0x505   : > { %3930 = vmatmul.msk.f32.gmra.mxu1 %vm474_vm1, %v1322_v30 }
 0x508   : > { %v1293_v31 = vpop.f32.mrf.mxu3 }
 0x509   : > { %v1294_v32 = vadd.f32 %v5049_v62, %v1293_v31 }
 0x50b   : > { %v1323_v33 = vmax.f32 %v1294_v32, 0.0 }
 0x50d   : > { %3931 = vmatmul.msk.f32.gmra.mxu1 %vm474_vm1, %v1323_v33 }
 0x510   : > { %v1296_v34 = vpop.f32.mrf.mxu3 }
 0x511   : > { %v1297_v35 = vadd.f32 %v5049_v62, %v1296_v34 }
 0x513   : > { %v1324_v36 = vmax.f32 %v1297_v35, 0.0 }
 0x515   : > { %3932 = vmatmul.msk.f32.gmra.mxu1 %vm474_vm1, %v1324_v36 }
 0x518   : > { %v1299_v37 = vpop.f32.mrf.mxu3 }
 0x519   : > { %v1300_v38 = vadd.f32 %v5049_v62, %v1299_v37 }
 0x51b   : > { %v1325_v39 = vmax.f32 %v1300_v38, 0.0 }
 0x51d   : > { %3933 = vmatmul.msk.f32.gmra.mxu1 %vm474_vm1, %v1325_v39 }
 0x520   : > { %v1302_v51 = vpop.f32.mrf.mxu3 }
 0x521   : > { %v1303_v42 = vadd.f32 %v5049_v62, %v1302_v51 }
 0x523   : > { %v1326_v43 = vmax.f32 %v1303_v42, 0.0 }
 0x525   : > { %3934 = vmatmul.msk.f32.gmra.mxu1 %vm474_vm1, %v1326_v43 }
 0x528   : > { %v1305_v44 = vpop.f32.mrf.mxu3 }
 0x529   : > { %v1306_v45 = vadd.f32 %v5049_v62, %v1305_v44 }
 0x52b   : > { %v1327_v46 = vmax.f32 %v1306_v45, 0.0 }
 0x52d   : > { %3935 = vmatmul.msk.f32.gmra.mxu1 %vm474_vm1, %v1327_v46 }
 0x530   : > { %v1308_v47 = vpop.f32.mrf.mxu3 }
 0x531   : > { %v1309_v48 = vadd.f32 %v5049_v62, %v1308_v47 }
 0x533   : > { %v1328_v49 = vmax.f32 %v1309_v48, 0.0 }
 0x535   : > { %3936 = vmatmul.msk.f32.gmra.mxu1 %vm474_vm1, %v1328_v49 }
 0x538   : > { %v1311_v50 = vpop.f32.mrf.mxu3 }
 0x539   : > { %v1312_v52 = vadd.f32 %v5049_v62, %v1311_v50 }
 0x53b   : > { %v1329_v57 = vmax.f32 %v1312_v52, 0.0 }
 0x53d   : > { %3937 = vmatmul.msk.f32.gmra.mxu1 %vm474_vm1, %v1329_v57 }
 0x542   : > { %v5107_v59 = vpop.f32.mrf.mxu1 }
 0x54a   : > { %v5109_v25 = vpop.f32.mrf.mxu1 }
 0x552   : > { %v5111_v60 = vpop.f32.mrf.mxu1 }
 0x553   : > { %v1402_v50 = vadd.f32 %v5120_v2, %v5111_v60 }
 0x55a   : > { %v5113_v55 = vpop.f32.mrf.mxu1 }
 0x55b   : > { %v1405_v60 = vadd.f32 %v5120_v2, %v5113_v55 }
 0x562   : > { %v1407_v58 = vpop.f32.mrf.mxu1 }
 0x563   : > { %v1408_v51 = vadd.f32 %v5120_v2, %v1407_v58 }
 0x565   : > { %v1447_v46 = vmax.f32 %v1408_v51, 0.0 }
 0x567   : > { %v1463_v58 = vmul.f32 %v5126_v56, %v1447_v46 }
 0x56a   : > { %v5115_v61 = vpop.f32.mrf.mxu1 }
 0x56b   : > { %v1411_v52 = vadd.f32 %v5120_v2, %v5115_v61 }
 0x572   : > { %v1413_v63 = vpop.f32.mrf.mxu1 }
 0x573   : > { %v1414_v33 = vadd.f32 %v5120_v2, %v1413_v63  ;;  %v1445_v63 = vmax.f32 %v1402_v50, 0.0 }
 0x575   : > { %v1449_v36 = vmax.f32 %v1414_v33, 0.0 }
 0x577   : > { %v1465_v44 = vmul.f32 %v5126_v56, %v1449_v36 }
 0x579   : > { %v1493_v49 = vsel %vm623_vm2, %v1465_v44, 0.0 }
 0x57a   : > { %v1416_v0 = vpop.f32.mrf.mxu1 }
 0x57b   : > { %v1417_v42 = vadd.f32 %v5120_v2, %v1416_v0  ;;  %v1448_v0 = vmax.f32 %v1411_v52, 0.0 }
 0x57d   : > { %v1450_v47 = vmax.f32 %v1417_v42, 0.0  ;;  %v1464_v61 = vmul.f32 %v5126_v56, %v1448_v0 }
 0x57f   : > { %v1466_v57 = vmul.f32 %v5126_v56, %v1450_v47 }
 0x582   : > { %v1419_v1 = vpop.f32.mrf.mxu1 }
 0x583   : > { %v1420_v53 = vadd.f32 %v5120_v2, %v1419_v1  ;;  %v1496_v1 = vsel %vm623_vm2, %v1466_v57, 0.0 }
 0x585   : > { %v1451_v3 = vmax.f32 %v1420_v53, 0.0  ;;  %v1487_v53 = vsel %vm623_vm2, %v1463_v58, 0.0 }
 0x587   : > { %v1467_v4 = vmul.f32 %v5126_v56, %v1451_v3  ;;  %v1396_v3 = vadd.f32 %v5120_v2, %v5107_v59 }
 0x589   : > { %v1499_v5 = vsel %vm623_vm2, %v1467_v4, 0.0  ;;  %v1461_v4 = vmul.f32 %v5126_v56, %v1445_v63 }
 0x58a   : > { %v1422_v6 = vpop.f32.mrf.mxu1  ;;  %1500 = vadd.xlane.f32.xlu0 %v1499_v5  ;;  %v1443_v5 = vmax.f32 %v1396_v3, 0.0  ;;  %v3939_v3 = vld [vmem:[%s4588_s26 + $0x188] sm:$0xff] }
 0x58b   : > { %v1423_v7 = vadd.f32 %v5120_v2, %v1422_v6  ;;  %v1446_v6 = vmax.f32 %v1405_v60, 0.0  ;;  %v3940_v60 = vld [vmem:[%s4588_s26 + $0x190] sm:$0xff] }
 0x58d   : > { %v1452_v9 = vmax.f32 %v1423_v7, 0.0  ;;  %v1490_v7 = vsel %vm623_vm2, %v1464_v61, 0.0  ;;  %v1462_v59 = vmul.f32 %v5126_v56, %v1446_v6  ;;  %v3941_v61 = vld [vmem:[%s4588_s26 + $0x198] sm:$0xff]  ;;  %v3944_v6 = vld [vmem:[%s4588_s26 + $0x1b0] sm:$0xff] }
 0x58f   : > { %v1468_v10 = vmul.f32 %v5126_v56, %v1452_v9  ;;  %v1481_v9 = vsel %vm623_vm2, %v1461_v4, 0.0  ;;  %v3942_v4 = vld [vmem:[%s4588_s26 + $0x1a0] sm:$0xff] }
 0x591   : > { %v1502_v11 = vsel %vm623_vm2, %v1468_v10, 0.0  ;;  %v1399_v10 = vadd.f32 %v5120_v2, %v5109_v25  ;;  %v5183_v25 = vld [vmem:[%s6321_s7 + $0x40] sm:$0xff] }
 0x592   : > { %v1425_v8 = vpop.f32.mrf.mxu1  ;;  %1503 = vadd.xlane.f32.xlu2 %v1502_v11  ;;  %v1459_v11 = vmul.f32 %v5126_v56, %v1443_v5  ;;  %1594 = vmatpush.msra.mxu0 %v5183_v25  ;;  %v3943_v5 = vld [vmem:[%s4588_s26 + $0x1a8] sm:$0xff] }
 0x593   : > { %v1426_v54 = vadd.f32 %v5120_v2, %v1425_v8  ;;  %v1444_v55 = vmax.f32 %v1399_v10, 0.0  ;;  %v1484_v8 = vsel %vm623_vm2, %v1462_v59, 0.0  ;;  %v3947_v10 = vld [vmem:[%s4588_s26 + $0x1c8] sm:$0xff]  ;;  %v3948_v59 = vld [vmem:[%s4588_s26 + $0x1d0] sm:$0xff] }
 0x595   : > { %v1453_v17 = vmax.f32 %v1426_v54, 0.0  ;;  %v1475_v54 = vsel %vm623_vm2, %v1459_v11, 0.0  ;;  %v3949_v11 = vld [vmem:[%s4588_s26 + $0x1d8] sm:$0xff] }
 0x597   : > { %v1469_v13 = vmul.f32 %v5126_v56, %v1453_v17  ;;  %v1460_v17 = vmul.f32 %v5126_v56, %v1444_v55  ;;  %v3950_v55 = vld [vmem:[%s4588_s26 + $0x1e0] sm:$0xff] }
 0x599   : > { %v1505_v14 = vsel %vm623_vm2, %v1469_v13, 0.0  ;;  %v1478_v13 = vsel %vm623_vm2, %v1460_v17, 0.0 }
 0x59a   : > { %v1428_v15 = vpop.f32.mrf.mxu1  ;;  %1506 = vadd.xlane.f32.xlu0 %v1505_v14 }
 0x59b   : > { %v1429_v16 = vadd.f32 %v5120_v2, %v1428_v15  ;;  %v5189_v15 = vld [vmem:[%s6321_s7 + $0x38] sm:$0xff] }
 0x59c   : > { %1595 = vmatpush.msra.mxu0 %v5189_v15 }
 0x59d   : > { %v1454_v19 = vmax.f32 %v1429_v16, 0.0 }
 0x59f   : > { %v1470_v21 = vmul.f32 %v5126_v56, %v1454_v19 }
 0x5a1   : > { %v1508_v12 = vsel %vm623_vm2, %v1470_v21, 0.0  ;;  %v5195_v21 = vld [vmem:[%s6321_s7 + $0x30] sm:$0xff] }
 0x5a2   : > { %v1431_v18 = vpop.f32.mrf.mxu1  ;;  %1509 = vadd.xlane.f32.xlu2 %v1508_v12  ;;  %1596 = vmatpush.msra.mxu0 %v5195_v21 }
 0x5a3   : > { %v1432_v20 = vadd.f32 %v5120_v2, %v1431_v18 }
 0x5a5   : > { %v1455_v22 = vmax.f32 %v1432_v20, 0.0  ;;  %v5201_v20 = vld [vmem:[%s6321_s7 + $0x28] sm:$0xff] }
 0x5a6   : > { %1597 = vmatpush.msra.mxu0 %v5201_v20 }
 0x5a7   : > { %v1471_v23 = vmul.f32 %v5126_v56, %v1455_v22 }
 0x5a9   : > { %v1511_v24 = vsel %vm623_vm2, %v1471_v23, 0.0 }
 0x5aa   : > { %v1434_v26 = vpop.f32.mrf.mxu1  ;;  %1512 = vadd.xlane.f32.xlu0 %v1511_v24  ;;  %v5207_v24 = vld [vmem:[%s6321_s7 + $0x20] sm:$0xff] }
 0x5ab   : > { %v1435_v27 = vadd.f32 %v5120_v2, %v1434_v26  ;;  %1598 = vmatpush.msra.mxu0 %v5207_v24 }
 0x5ad   : > { %v1456_v28 = vmax.f32 %v1435_v27, 0.0  ;;  %v5210_v27 = vld [vmem:[#allocation2] ss:$0 sm:$0xff] }
 0x5af   : > { %v1472_v29 = vmul.f32 %v5126_v56, %v1456_v28 }
 0x5b1   : > { %v1514_v30 = vsel %vm623_vm2, %v1472_v29, 0.0 }
 0x5b2   : > { %v1437_v31 = vpop.f32.mrf.mxu1  ;;  %1515 = vadd.xlane.f32.xlu2 %v1514_v30 }
 0x5b3   : > { %v1438_v32 = vadd.f32 %v5120_v2, %v1437_v31 }
 0x5b5   : > { %v1457_v34 = vmax.f32 %v1438_v32, 0.0  ;;  %v5218_v32 = vld [vmem:[%s6321_s7 + $0x18] sm:$0xff] }
 0x5b7   : > { %v1473_v35 = vmul.f32 %v5126_v56, %v1457_v34  ;;  %v5224_v34 = vld [vmem:[%s6321_s7 + $0x10] sm:$0xff] }
 0x5b9   : > { %v1517_v37 = vsel %vm623_vm2, %v1473_v35, 0.0 }
 0x5ba   : > { %v1440_v38 = vpop.f32.mrf.mxu1  ;;  %1518 = vadd.xlane.f32.xlu0 %v1517_v37  ;;  %v5231_v37 = vld [vmem:[%s6321_s7 + $0x8] sm:$0xff] }
 0x5bb   : > { %v1441_v39 = vadd.f32 %v5120_v2, %v1440_v38 }
 0x5bd   : > { %v1458_v43 = vmax.f32 %v1441_v39, 0.0  ;;  %v5238_v39 = vld [vmem:[%s6321_s7] sm:$0xff] }
 0x5bf   : > { %v1474_v45 = vmul.f32 %v5126_v56, %v1458_v43 }
 0x5c1   : > { %v1520_v48 = vsel %vm623_vm2, %v1474_v45, 0.0 }
 0x5c2   : > { %1521 = vadd.xlane.f32.xlu2 %v1520_v48  ;;  %1494 = vadd.xlane.f32.xlu0 %v1493_v49 }
 0x5ca   : > { %1497 = vadd.xlane.f32.xlu2 %v1496_v1  ;;  %1488 = vadd.xlane.f32.xlu0 %v1487_v53  ;;  %v3938_v53 = vld [vmem:[%s4588_s26 + $0x180] sm:$0xff] }
 0x5d2   : > { %1491 = vadd.xlane.f32.xlu2 %v1490_v7  ;;  %1482 = vadd.xlane.f32.xlu0 %v1481_v9  ;;  %v3945_v7 = vld [vmem:[%s4588_s26 + $0x1b8] sm:$0xff]  ;;  %v3946_v9 = vld [vmem:[%s4588_s26 + $0x1c0] sm:$0xff] }
 0x5da   : > { %1485 = vadd.xlane.f32.xlu2 %v1484_v8  ;;  %1476 = vadd.xlane.f32.xlu0 %v1475_v54  ;;  %v3951_v8 = vld [vmem:[%s4588_s26 + $0x1e8] sm:$0xff]  ;;  %v3952_v54 = vld [vmem:[%s4588_s26 + $0x1f0] sm:$0xff] }
 0x5e2   : > { %1479 = vadd.xlane.f32.xlu2 %v1478_v13  ;;  %v3953_v13 = vld [vmem:[%s4588_s26 + $0x1f8] sm:$0xff] }
 0x5fd   : > { %v1501_v14 = vpop.xlane.xlu0 %1500 }
 0x5fe   : > { %v1531_v43 = vadd.f32 %v5210_v27, %v1501_v14 }
 0x605   : > { %v1504_v16 = vpop.xlane.xlu2 %1503 }
 0x606   : > { %v1532_v42 = vadd.f32 %v5210_v27, %v1504_v16 }
 0x60d   : > { %v1507_v19 = vpop.xlane.xlu0 %1506 }
 0x60e   : > { %v1533_v38 = vadd.f32 %v5210_v27, %v1507_v19 }
 0x615   : > { %v1510_v12 = vpop.xlane.xlu2 %1509 }
 0x616   : > { %v1534_v36 = vadd.f32 %v5210_v27, %v1510_v12 }
 0x61d   : > { %v1513_v18 = vpop.xlane.xlu0 %1512 }
 0x61e   : > { %v1535_v33 = vadd.f32 %v5210_v27, %v1513_v18 }
 0x625   : > { %v1516_v22 = vpop.xlane.xlu2 %1515 }
 0x626   : > { %v1536_v31 = vadd.f32 %v5210_v27, %v1516_v22 }
 0x62d   : > { %v1519_v23 = vpop.xlane.xlu0 %1518 }
 0x62e   : > { %v1537_v30 = vadd.f32 %v5210_v27, %v1519_v23 }
 0x635   : > { %v1522_v26 = vpop.xlane.xlu2 %1521  ;;  %v1495_v29 = vpop.xlane.xlu0 %1494 }
 0x636   : > { %v1538_v28 = vadd.f32 %v5210_v27, %v1522_v26  ;;  %v1529_v46 = vadd.f32 %v5210_v27, %v1495_v29 }
 0x638   : > { %4190 = vmatpush.lsf.msrb.mxu0 %v1538_v28 }
 0x63a   : > { %4191 = vmatpush.lsf.msrb.mxu0 %v1537_v30 }
 0x63c   : > { %4192 = vmatpush.lsf.msrb.mxu0 %v1536_v31 }
 0x63d   : > { %v1498_v35 = vpop.xlane.xlu2 %1497  ;;  %v1489_v51 = vpop.xlane.xlu0 %1488 }
 0x63e   : > { %1599 = vmatpush.msra.mxu0 %v5218_v32  ;;  %v1530_v45 = vadd.f32 %v5210_v27, %v1498_v35  ;;  %v1527_v49 = vadd.f32 %v5210_v27, %v1489_v51 }
 0x640   : > { %4193 = vmatpush.lsf.msrb.mxu0 %v1535_v33 }
 0x642   : > { %1600 = vmatpush.msra.mxu0 %v5224_v34 }
 0x644   : > { %4194 = vmatpush.lsf.msrb.mxu0 %v1534_v36 }
 0x645   : > { %v1492_v44 = vpop.xlane.xlu2 %1491  ;;  %v1483_v48 = vpop.xlane.xlu0 %1482 }
 0x646   : > { %1601 = vmatpush.msra.mxu0 %v5231_v37  ;;  %v1528_v47 = vadd.f32 %v5210_v27, %v1492_v44  ;;  %v1525_v57 = vadd.f32 %v5210_v27, %v1483_v48 }
 0x648   : > { %4195 = vmatpush.lsf.msrb.mxu0 %v1533_v38 }
 0x64a   : > { %1602 = vmatpush.msra.mxu0 %v5238_v39 }
 0x64c   : > { %4196 = vmatpush.lsf.msrb.mxu0 %v1532_v42 }
 0x64d   : > { %v1486_v50 = vpop.xlane.xlu2 %1485  ;;  %v1477_v58 = vpop.xlane.xlu0 %1476 }
 0x64e   : > { %4197 = vmatpush.lsf.msrb.mxu0 %v1531_v43  ;;  %v1526_v52 = vadd.f32 %v5210_v27, %v1486_v50  ;;  %v1523_v1 = vadd.f32 %v5210_v27, %v1477_v58 }
 0x650   : > { %4198 = vmatpush.lsf.msrb.mxu0 %v1530_v45 }
 0x652   : > { %4199 = vmatpush.lsf.msrb.mxu0 %v1529_v46 }
 0x654   : > { %4200 = vmatpush.lsf.msrb.mxu0 %v1528_v47 }
 0x655   : > { %v1480_v63 = vpop.xlane.xlu2 %1479 }
 0x656   : > { %4201 = vmatpush.lsf.msrb.mxu0 %v1527_v49  ;;  %v1524_v0 = vadd.f32 %v5210_v27, %v1480_v63 }
 0x658   : > { %4202 = vmatpush.lsf.msrb.mxu0 %v1526_v52 }
 0x65a   : > { %4203 = vmatpush.lsf.msrb.mxu0 %v1525_v57 }
 0x65c   : > { %4204 = vmatpush.lsf.msrb.mxu0 %v1524_v0 }
 0x65e   : > { %4205 = vmatpush.lsf.msrb.mxu0 %v1523_v1 }
 0x65f   : > { %4206 = vllmr.1.mxu0 }
 0x680   : > { %4207 = vmatmul.lmr.bf16.vlgmr.msra.gmra.1.mxu0 }
 0x681   : > { %1687 = vmatpush.msra.mxu0 %v5004_v40 }
 0x683   : > { %1688 = vmatpush.msra.mxu0 %v5010_v41 }
 0x688   : > { %3954 = vmatmul.msk.f32.vlgmr.msra.gmra.mxu0 %vm341_vm0, %v3938_v53 }
 0x690   : > { %3955 = vmatmul.msk.f32.gmra.mxu0 %vm341_vm0, %v3939_v3 }
 0x698   : > { %3956 = vmatmul.msk.f32.gmra.mxu0 %vm341_vm0, %v3940_v60 }
 0x6a0   : > { %3957 = vmatmul.msk.f32.gmra.mxu0 %vm341_vm0, %v3941_v61 }
 0x6a8   : > { %3958 = vmatmul.msk.f32.gmra.mxu0 %vm341_vm0, %v3942_v4 }
 0x6b0   : > { %3959 = vmatmul.msk.f32.gmra.mxu0 %vm341_vm0, %v3943_v5 }
 0x6b8   : > { %3960 = vmatmul.msk.f32.gmra.mxu0 %vm341_vm0, %v3944_v6 }
 0x6c0   : > { %3961 = vmatmul.msk.f32.gmra.mxu0 %vm341_vm0, %v3945_v7 }
 0x6c8   : > { %3962 = vmatmul.msk.f32.gmra.mxu0 %vm341_vm0, %v3946_v9 }
 0x6d0   : > { %3963 = vmatmul.msk.f32.gmra.mxu0 %vm341_vm0, %v3947_v10 }
 0x6d8   : > { %3964 = vmatmul.msk.f32.gmra.mxu0 %vm341_vm0, %v3948_v59 }
 0x6e0   : > { %3965 = vmatmul.msk.f32.gmra.mxu0 %vm341_vm0, %v3949_v11 }
 0x6e8   : > { %3966 = vmatmul.msk.f32.gmra.mxu0 %vm341_vm0, %v3950_v55 }
 0x6f0   : > { %3967 = vmatmul.msk.f32.gmra.mxu0 %vm341_vm0, %v3951_v8 }
 0x6f8   : > { %3968 = vmatmul.msk.f32.gmra.mxu0 %vm341_vm0, %v3952_v54 }
 0x6fd   : > { %v1604_v17 = vpop.f32.mrf.mxu0 }
 0x6fe   : > { %1607 = vst [vmem:[%s4921_s14 + $0x2] sm:$0x1] %v1604_v17 }
 0x700   : > { %3969 = vmatmul.msk.f32.gmra.mxu0 %vm341_vm0, %v3953_v13 }
 0x705   : > { %v1690_v14 = vpop.f32.mrf.mxu0 }
 0x706   : > { %v1691_v16 = vadd.f32 %v5049_v62, %v1690_v14 }
 0x708   : > { %v1738_v19 = vmax.f32 %v1691_v16, 0.0 }
 0x70a   : > { %3970 = vmatmul.msk.f32.vlgmr.msra.gmra.mxu2 %vm474_vm1, %v1738_v19 }
 0x70b   : > { %4182 = vmatpush.msra.mxu2 %v5004_v40 }
 0x70d   : > { %v1693_v12 = vpop.f32.mrf.mxu0  ;;  %4183 = vmatpush.msra.mxu2 %v5010_v41 }
 0x70e   : > { %v1694_v18 = vadd.f32 %v5049_v62, %v1693_v12 }
 0x710   : > { %v1739_v22 = vmax.f32 %v1694_v18, 0.0 }
 0x712   : > { %3971 = vmatmul.msk.f32.gmra.mxu2 %vm474_vm1, %v1739_v22 }
 0x715   : > { %v1696_v23 = vpop.f32.mrf.mxu0 }
 0x716   : > { %v1697_v26 = vadd.f32 %v5049_v62, %v1696_v23 }
 0x718   : > { %v1740_v28 = vmax.f32 %v1697_v26, 0.0 }
 0x71a   : > { %3972 = vmatmul.msk.f32.gmra.mxu2 %vm474_vm1, %v1740_v28 }
 0x71d   : > { %v1699_v29 = vpop.f32.mrf.mxu0 }
 0x71e   : > { %v1700_v30 = vadd.f32 %v5049_v62, %v1699_v29 }
 0x720   : > { %v1741_v31 = vmax.f32 %v1700_v30, 0.0 }
 0x722   : > { %3973 = vmatmul.msk.f32.gmra.mxu2 %vm474_vm1, %v1741_v31 }
 0x725   : > { %v1702_v40 = vpop.f32.mrf.mxu0 }
 0x726   : > { %v1703_v41 = vadd.f32 %v5049_v62, %v1702_v40 }
 0x728   : > { %v1742_v33 = vmax.f32 %v1703_v41, 0.0 }
 0x72a   : > { %3974 = vmatmul.msk.f32.gmra.mxu2 %vm474_vm1, %v1742_v33 }
 0x72d   : > { %v1705_v35 = vpop.f32.mrf.mxu0 }
 0x72e   : > { %v1706_v36 = vadd.f32 %v5049_v62, %v1705_v35 }
 0x730   : > { %v1743_v38 = vmax.f32 %v1706_v36, 0.0 }
 0x732   : > { %3975 = vmatmul.msk.f32.gmra.mxu2 %vm474_vm1, %v1743_v38 }
 0x735   : > { %v1708_v51 = vpop.f32.mrf.mxu0 }
 0x736   : > { %v1709_v42 = vadd.f32 %v5049_v62, %v1708_v51 }
 0x738   : > { %v1744_v43 = vmax.f32 %v1709_v42, 0.0 }
 0x73a   : > { %3976 = vmatmul.msk.f32.gmra.mxu2 %vm474_vm1, %v1744_v43 }
 0x73d   : > { %v1711_v44 = vpop.f32.mrf.mxu0 }
 0x73e   : > { %v1712_v45 = vadd.f32 %v5049_v62, %v1711_v44 }
 0x740   : > { %v1745_v46 = vmax.f32 %v1712_v45, 0.0 }
 0x742   : > { %3977 = vmatmul.msk.f32.gmra.mxu2 %vm474_vm1, %v1745_v46 }
 0x745   : > { %v1714_v47 = vpop.f32.mrf.mxu0 }
 0x746   : > { %v1715_v48 = vadd.f32 %v5049_v62, %v1714_v47 }
 0x748   : > { %v1746_v49 = vmax.f32 %v1715_v48, 0.0 }
 0x74a   : > { %3978 = vmatmul.msk.f32.gmra.mxu2 %vm474_vm1, %v1746_v49 }
 0x74d   : > { %v1717_v50 = vpop.f32.mrf.mxu0 }
 0x74e   : > { %v1718_v52 = vadd.f32 %v5049_v62, %v1717_v50 }
 0x750   : > { %v1747_v57 = vmax.f32 %v1718_v52, 0.0 }
 0x752   : > { %3979 = vmatmul.msk.f32.gmra.mxu2 %vm474_vm1, %v1747_v57 }
 0x755   : > { %v1720_v58 = vpop.f32.mrf.mxu0 }
 0x756   : > { %v1721_v63 = vadd.f32 %v5049_v62, %v1720_v58 }
 0x758   : > { %v1748_v0 = vmax.f32 %v1721_v63, 0.0 }
 0x75a   : > { %3980 = vmatmul.msk.f32.gmra.mxu2 %vm474_vm1, %v1748_v0 }
 0x75d   : > { %v1723_v1 = vpop.f32.mrf.mxu0 }
 0x75e   : > { %v1724_v53 = vadd.f32 %v5049_v62, %v1723_v1 }
 0x760   : > { %v1749_v3 = vmax.f32 %v1724_v53, 0.0 }
 0x762   : > { %3981 = vmatmul.msk.f32.gmra.mxu2 %vm474_vm1, %v1749_v3 }
 0x765   : > { %v1726_v60 = vpop.f32.mrf.mxu0 }
 0x766   : > { %v1727_v61 = vadd.f32 %v5049_v62, %v1726_v60 }
 0x768   : > { %v1750_v4 = vmax.f32 %v1727_v61, 0.0 }
 0x76a   : > { %3982 = vmatmul.msk.f32.gmra.mxu2 %vm474_vm1, %v1750_v4 }
 0x76d   : > { %v1729_v5 = vpop.f32.mrf.mxu0 }
 0x76e   : > { %v1730_v6 = vadd.f32 %v5049_v62, %v1729_v5 }
 0x770   : > { %v1751_v7 = vmax.f32 %v1730_v6, 0.0 }
 0x772   : > { %3983 = vmatmul.msk.f32.gmra.mxu2 %vm474_vm1, %v1751_v7 }
 0x775   : > { %v1732_v9 = vpop.f32.mrf.mxu0 }
 0x776   : > { %v1733_v10 = vadd.f32 %v5049_v62, %v1732_v9 }
 0x778   : > { %v1752_v59 = vmax.f32 %v1733_v10, 0.0 }
 0x77a   : > { %3984 = vmatmul.msk.f32.gmra.mxu2 %vm474_vm1, %v1752_v59 }
 0x77d   : > { %v1735_v11 = vpop.f32.mrf.mxu0 }
 0x77e   : > { %v1736_v55 = vadd.f32 %v5049_v62, %v1735_v11 }
 0x780   : > { %v1753_v8 = vmax.f32 %v1736_v55, 0.0 }
 0x782   : > { %3985 = vmatmul.msk.f32.gmra.mxu2 %vm474_vm1, %v1753_v8 }
 0x78d   : > { %v5321_v54 = vpop.f32.mrf.mxu2 }
 0x795   : > { %v5323_v17 = vpop.f32.mrf.mxu2 }
 0x79d   : > { %v1825_v13 = vpop.f32.mrf.mxu2 }
 0x79e   : > { %v1826_v14 = vadd.f32 %v5120_v2, %v1825_v13 }
 0x7a0   : > { %v1869_v16 = vmax.f32 %v1826_v14, 0.0 }
 0x7a2   : > { %v1885_v19 = vmul.f32 %v5126_v56, %v1869_v16 }
 0x7a4   : > { %v1905_v12 = vsel %vm623_vm2, %v1885_v19, 0.0 }
 0x7a5   : > { %v5328_v18 = vpop.f32.mrf.mxu2  ;;  %1906 = vadd.xlane.f32.xlu1 %v1905_v12  ;;  %v1978_v12 = vld [vmem:[%s6321_s7 + $0x78] sm:$0xff] }
 0x7a6   : > { %2011 = vmatpush.msra.mxu3 %v1978_v12  ;;  %2435 = vmatpush.msra.mxu0 %v1978_v12  ;;  %v5427_v12 = vld [vmem:[%s6315_s1 + $0x8] sm:$0xff] }
 0x7ad   : > { %v1831_v22 = vpop.f32.mrf.mxu2 }
 0x7b5   : > { %v1834_v62 = vpop.f32.mrf.mxu2 }
 0x7bd   : > { %v1837_v23 = vpop.f32.mrf.mxu2 }
 0x7be   : > { %v1838_v10 = vadd.f32 %v5120_v2, %v1837_v23  ;;  %v1977_v23 = vld [vmem:[%s6321_s7 + $0x70] sm:$0xff] }
 0x7bf   : > { %2012 = vmatpush.msra.mxu3 %v1977_v23  ;;  %2436 = vmatpush.msra.mxu0 %v1977_v23  ;;  %v5433_v23 = vld [vmem:[%s6315_s1] sm:$0xff] }
 0x7c0   : > { %v1873_v13 = vmax.f32 %v1838_v10, 0.0 }
 0x7c5   : > { %v1840_v26 = vpop.f32.mrf.mxu2 }
 0x7c6   : > { %v1841_v59 = vadd.f32 %v5120_v2, %v1840_v26  ;;  %v1832_v26 = vadd.f32 %v5120_v2, %v1831_v22  ;;  %v1829_v22 = vadd.f32 %v5120_v2, %v5328_v18 }
 0x7c8   : > { %v1874_v14 = vmax.f32 %v1841_v59, 0.0 }
 0x7cd   : > { %v1843_v28 = vpop.f32.mrf.mxu2 }
 0x7ce   : > { %v1844_v60 = vadd.f32 %v5120_v2, %v1843_v28  ;;  %v1835_v28 = vadd.f32 %v5120_v2, %v1834_v62 }
 0x7d0   : > { %v1875_v5 = vmax.f32 %v1844_v60, 0.0 }
 0x7d2   : > { %v1891_v55 = vmul.f32 %v5126_v56, %v1875_v5 }
 0x7d4   : > { %v1923_v19 = vsel %vm623_vm2, %v1891_v55, 0.0 }
 0x7d5   : > { %v1846_v29 = vpop.f32.mrf.mxu2 }
 0x7d6   : > { %v1847_v30 = vadd.f32 %v5120_v2, %v1846_v29  ;;  %v1890_v29 = vmul.f32 %v5126_v56, %v1874_v14 }
 0x7d8   : > { %v1876_v31 = vmax.f32 %v1847_v30, 0.0  ;;  %v1889_v30 = vmul.f32 %v5126_v56, %v1873_v13 }
 0x7da   : > { %v1892_v40 = vmul.f32 %v5126_v56, %v1876_v31  ;;  %v1871_v31 = vmax.f32 %v1832_v26, 0.0  ;;  %v3987_v26 = vld [vmem:[%s4588_s26 + $0x208] sm:$0xff] }
 0x7dc   : > { %v1926_v41 = vsel %vm623_vm2, %v1892_v40, 0.0  ;;  %v1872_v40 = vmax.f32 %v1835_v28, 0.0  ;;  %v3988_v28 = vld [vmem:[%s4588_s26 + $0x210] sm:$0xff] }
 0x7dd   : > { %v1849_v33 = vpop.f32.mrf.mxu2  ;;  %1927 = vadd.xlane.f32.xlu2 %v1926_v41  ;;  %v1920_v41 = vsel %vm623_vm2, %v1890_v29, 0.0  ;;  %v3989_v29 = vld [vmem:[%s4588_s26 + $0x218] sm:$0xff] }
 0x7de   : > { %v1850_v35 = vadd.f32 %v5120_v2, %v1849_v33  ;;  %v1917_v33 = vsel %vm623_vm2, %v1889_v30, 0.0  ;;  %v1888_v62 = vmul.f32 %v5126_v56, %v1872_v40  ;;  %v3990_v30 = vld [vmem:[%s4588_s26 + $0x220] sm:$0xff]  ;;  %v3992_v40 = vld [vmem:[%s4588_s26 + $0x230] sm:$0xff] }
 0x7e0   : > { %v1877_v36 = vmax.f32 %v1850_v35, 0.0  ;;  %v1823_v35 = vadd.f32 %v5120_v2, %v5323_v17 }
 0x7e2   : > { %v1893_v38 = vmul.f32 %v5126_v56, %v1877_v36  ;;  %v1887_v36 = vmul.f32 %v5126_v56, %v1871_v31  ;;  %v3991_v31 = vld [vmem:[%s4588_s26 + $0x228] sm:$0xff] }
 0x7e4   : > { %v1929_v51 = vsel %vm623_vm2, %v1893_v38, 0.0  ;;  %v1868_v38 = vmax.f32 %v1823_v35, 0.0  ;;  %v3995_v35 = vld [vmem:[%s4588_s26 + $0x248] sm:$0xff] }
 0x7e5   : > { %v1852_v42 = vpop.f32.mrf.mxu2  ;;  %1930 = vadd.xlane.f32.xlu0 %v1929_v51  ;;  %v1870_v51 = vmax.f32 %v1829_v22, 0.0  ;;  %v3996_v22 = vld [vmem:[%s4588_s26 + $0x250] sm:$0xff] }
 0x7e6   : > { %v1853_v43 = vadd.f32 %v5120_v2, %v1852_v42  ;;  %v1914_v42 = vsel %vm623_vm2, %v1888_v62, 0.0  ;;  %v3997_v62 = vld [vmem:[%s4588_s26 + $0x258] sm:$0xff] }
 0x7e7   : > { %v1886_v17 = vmul.f32 %v5126_v56, %v1870_v51  ;;  %v4000_v51 = vld [vmem:[%s4588_s26 + $0x270] sm:$0xff] }
 0x7e8   : > { %v1878_v44 = vmax.f32 %v1853_v43, 0.0  ;;  %v1911_v43 = vsel %vm623_vm2, %v1887_v36, 0.0  ;;  %v3998_v36 = vld [vmem:[%s4588_s26 + $0x260] sm:$0xff] }
 0x7ea   : > { %v1894_v45 = vmul.f32 %v5126_v56, %v1878_v44  ;;  %v1820_v44 = vadd.f32 %v5120_v2, %v5321_v54  ;;  %v1975_v54 = vld [vmem:[%s6321_s7 + $0x60] sm:$0xff] }
 0x7ec   : > { %v1932_v46 = vsel %vm623_vm2, %v1894_v45, 0.0  ;;  %v1884_v45 = vmul.f32 %v5126_v56, %v1868_v38  ;;  %v1867_v18 = vmax.f32 %v1820_v44, 0.0  ;;  %v3999_v38 = vld [vmem:[%s4588_s26 + $0x268] sm:$0xff] }
 0x7ed   : > { %v1855_v47 = vpop.f32.mrf.mxu2  ;;  %1933 = vadd.xlane.f32.xlu2 %v1932_v46  ;;  %v1908_v46 = vsel %vm623_vm2, %v1886_v17, 0.0  ;;  %v5472_v17 = vld [vmem:[%s6316_s2] ss:$0 sm:$0xff] }
 0x7ee   : > { %v1856_v48 = vadd.f32 %v5120_v2, %v1855_v47  ;;  %v1902_v47 = vsel %vm623_vm2, %v1884_v45, 0.0 }
 0x7f0   : > { %v1879_v49 = vmax.f32 %v1856_v48, 0.0  ;;  %v1883_v48 = vmul.f32 %v5126_v56, %v1867_v18 }
 0x7f2   : > { %v1895_v50 = vmul.f32 %v5126_v56, %v1879_v49  ;;  %v1899_v49 = vsel %vm623_vm2, %v1883_v48, 0.0 }
 0x7f4   : > { %v1935_v52 = vsel %vm623_vm2, %v1895_v50, 0.0  ;;  %v1974_v50 = vld [vmem:[%s6321_s7 + $0x58] sm:$0xff] }
 0x7f5   : > { %v1858_v57 = vpop.f32.mrf.mxu2  ;;  %1936 = vadd.xlane.f32.xlu0 %v1935_v52  ;;  %v1972_v52 = vld [vmem:[%s6321_s7 + $0x48] sm:$0xff] }
 0x7f6   : > { %v1859_v58 = vadd.f32 %v5120_v2, %v1858_v57 }
 0x7f8   : > { %v1880_v63 = vmax.f32 %v1859_v58, 0.0 }
 0x7fa   : > { %v1896_v0 = vmul.f32 %v5126_v56, %v1880_v63 }
 0x7fc   : > { %v1938_v1 = vsel %vm623_vm2, %v1896_v0, 0.0 }
 0x7fd   : > { %v1861_v53 = vpop.f32.mrf.mxu2  ;;  %1939 = vadd.xlane.f32.xlu2 %v1938_v1 }
 0x7fe   : > { %v1862_v3 = vadd.f32 %v5120_v2, %v1861_v53 }
 0x800   : > { %v1881_v61 = vmax.f32 %v1862_v3, 0.0 }
 0x802   : > { %v1897_v4 = vmul.f32 %v5126_v56, %v1881_v61 }
 0x804   : > { %v1941_v6 = vsel %vm623_vm2, %v1897_v4, 0.0 }
 0x805   : > { %v1864_v7 = vpop.f32.mrf.mxu2  ;;  %1942 = vadd.xlane.f32.xlu0 %v1941_v6 }
 0x806   : > { %v1865_v9 = vadd.f32 %v5120_v2, %v1864_v7  ;;  %v1976_v2 = vld [vmem:[%s6321_s7 + $0x68] sm:$0xff] }
 0x807   : > { %2013 = vmatpush.msra.mxu3 %v1976_v2  ;;  %2437 = vmatpush.msra.mxu0 %v1976_v2 }
 0x808   : > { %v1882_v11 = vmax.f32 %v1865_v9, 0.0 }
 0x809   : > { %2014 = vmatpush.msra.mxu3 %v1975_v54  ;;  %2438 = vmatpush.msra.mxu0 %v1975_v54 }
 0x80a   : > { %v1898_v8 = vmul.f32 %v5126_v56, %v1882_v11  ;;  %v1973_v56 = vld [vmem:[%s6321_s7 + $0x50] sm:$0xff] }
 0x80b   : > { %2015 = vmatpush.msra.mxu3 %v1974_v50  ;;  %2439 = vmatpush.msra.mxu0 %v1974_v50 }
 0x80c   : > { %v1944_v16 = vsel %vm623_vm2, %v1898_v8, 0.0 }
 0x80d   : > { %1945 = vadd.xlane.f32.xlu2 %v1944_v16  ;;  %1924 = vadd.xlane.f32.xlu0 %v1923_v19 }
 0x80e   : > { %2016 = vmatpush.msra.mxu3 %v1973_v56  ;;  %2440 = vmatpush.msra.mxu0 %v1973_v56 }
 0x810   : > { %2017 = vmatpush.msra.mxu3 %v1972_v52  ;;  %2441 = vmatpush.msra.mxu0 %v1972_v52 }
 0x812   : > { %2018 = vmatpush.msra.mxu3 %v5183_v25 }
 0x814   : > { %2019 = vmatpush.msra.mxu3 %v5189_v15 }
 0x815   : > { %1921 = vadd.xlane.f32.xlu2 %v1920_v41  ;;  %1918 = vadd.xlane.f32.xlu0 %v1917_v33  ;;  %v3993_v41 = vld [vmem:[%s4588_s26 + $0x238] sm:$0xff]  ;;  %v3994_v33 = vld [vmem:[%s4588_s26 + $0x240] sm:$0xff] }
 0x816   : > { %2020 = vmatpush.msra.mxu3 %v5195_v21 }
 0x818   : > { %2021 = vmatpush.msra.mxu3 %v5201_v20  ;;  %v1907_v59 = vpop.xlane.xlu1 %1906 }
 0x819   : > { %v1949_v13 = vadd.f32 %v5210_v27, %v1907_v59 }
 0x81a   : > { %2022 = vmatpush.msra.mxu3 %v5207_v24 }
 0x81c   : > { %2023 = vmatpush.msra.mxu3 %v5218_v32 }
 0x81d   : > { %1915 = vadd.xlane.f32.xlu2 %v1914_v42  ;;  %1912 = vadd.xlane.f32.xlu0 %v1911_v43  ;;  %v4001_v42 = vld [vmem:[%s4588_s26 + $0x278] sm:$0xff] }
 0x81e   : > { %2024 = vmatpush.msra.mxu3 %v5224_v34 }
 0x820   : > { %2025 = vmatpush.msra.mxu3 %v5231_v37 }
 0x822   : > { %2026 = vmatpush.msra.mxu3 %v5238_v39 }
 0x825   : > { %1909 = vadd.xlane.f32.xlu2 %v1908_v46  ;;  %1903 = vadd.xlane.f32.xlu0 %v1902_v47 }
 0x82d   : > { %1900 = vadd.xlane.f32.xlu2 %v1899_v49 }
 0x850   : > { %v1928_v57 = vpop.xlane.xlu2 %1927 }
 0x851   : > { %v1956_v60 = vadd.f32 %v5210_v27, %v1928_v57 }
 0x858   : > { %v1931_v58 = vpop.xlane.xlu0 %1930 }
 0x859   : > { %v1957_v3 = vadd.f32 %v5210_v27, %v1931_v58 }
 0x860   : > { %v1934_v63 = vpop.xlane.xlu2 %1933 }
 0x861   : > { %v1958_v53 = vadd.f32 %v5210_v27, %v1934_v63 }
 0x868   : > { %v1937_v25 = vpop.xlane.xlu0 %1936 }
 0x869   : > { %v1959_v34 = vadd.f32 %v5210_v27, %v1937_v25 }
 0x870   : > { %v1940_v0 = vpop.xlane.xlu2 %1939 }
 0x871   : > { %v1960_v32 = vadd.f32 %v5210_v27, %v1940_v0 }
 0x878   : > { %v1943_v15 = vpop.xlane.xlu0 %1942 }
 0x879   : > { %v1961_v24 = vadd.f32 %v5210_v27, %v1943_v15 }
 0x880   : > { %v1946_v1 = vpop.xlane.xlu2 %1945  ;;  %v1925_v21 = vpop.xlane.xlu0 %1924 }
 0x881   : > { %v1962_v20 = vadd.f32 %v5210_v27, %v1946_v1  ;;  %v1955_v61 = vadd.f32 %v5210_v27, %v1925_v21 }
 0x883   : > { %4298 = vmatpush.lsf.msrb.mxu3 %v1962_v20 }
 0x885   : > { %4299 = vmatpush.lsf.msrb.mxu3 %v1961_v24 }
 0x887   : > { %4300 = vmatpush.lsf.msrb.mxu3 %v1960_v32 }
 0x888   : > { %v1922_v37 = vpop.xlane.xlu2 %1921  ;;  %v1919_v39 = vpop.xlane.xlu0 %1918 }
 0x889   : > { %4301 = vmatpush.lsf.msrb.mxu3 %v1959_v34  ;;  %v1954_v6 = vadd.f32 %v5210_v27, %v1922_v37  ;;  %v1953_v7 = vadd.f32 %v5210_v27, %v1919_v39 }
 0x88b   : > { %4302 = vmatpush.lsf.msrb.mxu3 %v1958_v53 }
 0x88d   : > { %4303 = vmatpush.lsf.msrb.mxu3 %v1957_v3 }
 0x88f   : > { %4304 = vmatpush.lsf.msrb.mxu3 %v1956_v60 }
 0x890   : > { %v1916_v4 = vpop.xlane.xlu2 %1915  ;;  %v1913_v5 = vpop.xlane.xlu0 %1912 }
 0x891   : > { %4305 = vmatpush.lsf.msrb.mxu3 %v1955_v61  ;;  %v1952_v9 = vadd.f32 %v5210_v27, %v1916_v4  ;;  %v1951_v10 = vadd.f32 %v5210_v27, %v1913_v5 }
 0x893   : > { %4306 = vmatpush.lsf.msrb.mxu3 %v1954_v6 }
 0x895   : > { %4307 = vmatpush.lsf.msrb.mxu3 %v1953_v7 }
 0x897   : > { %4308 = vmatpush.lsf.msrb.mxu3 %v1952_v9 }
 0x898   : > { %v1910_v11 = vpop.xlane.xlu2 %1909  ;;  %v1904_v8 = vpop.xlane.xlu0 %1903 }
 0x899   : > { %v1950_v55 = vadd.f32 %v5210_v27, %v1910_v11  ;;  %4309 = vmatpush.lsf.msrb.mxu3 %v1951_v10  ;;  %v1948_v14 = vadd.f32 %v5210_v27, %v1904_v8 }
 0x89b   : > { %4310 = vmatpush.lsf.msrb.mxu3 %v1950_v55 }
 0x89d   : > { %4311 = vmatpush.lsf.msrb.mxu3 %v1949_v13 }
 0x89f   : > { %4312 = vmatpush.lsf.msrb.mxu3 %v1948_v14 }
 0x8a0   : > { %v1901_v16 = vpop.xlane.xlu2 %1900 }
 0x8a1   : > { %v1947_v19 = vadd.f32 %v5210_v27, %v1901_v16  ;;  %v3986_v27 = vld [vmem:[%s4588_s26 + $0x200] sm:$0xff] }
 0x8a3   : > { %4313 = vmatpush.lsf.msrb.mxu3 %v1947_v19 }
 0x8a4   : > { %4314 = vllmr.1.mxu3 }
 0x8c5   : > { %4315 = vmatmul.lmr.bf16.vlgmr.msra.gmra.1.mxu3 }
 0x8c6   : > { %2111 = vmatpush.msra.mxu3 %v5427_v12 }
 0x8c8   : > { %2112 = vmatpush.msra.mxu3 %v5433_v23 }
 0x8cd   : > { %4002 = vmatmul.msk.f32.vlgmr.msra.gmra.mxu3 %vm341_vm0, %v3986_v27 }
 0x8d5   : > { %4003 = vmatmul.msk.f32.gmra.mxu3 %vm341_vm0, %v3987_v26 }
 0x8dd   : > { %4004 = vmatmul.msk.f32.gmra.mxu3 %vm341_vm0, %v3988_v28 }
 0x8e5   : > { %4005 = vmatmul.msk.f32.gmra.mxu3 %vm341_vm0, %v3989_v29 }
 0x8ed   : > { %4006 = vmatmul.msk.f32.gmra.mxu3 %vm341_vm0, %v3990_v30 }
 0x8f5   : > { %4007 = vmatmul.msk.f32.gmra.mxu3 %vm341_vm0, %v3991_v31 }
 0x8fd   : > { %4008 = vmatmul.msk.f32.gmra.mxu3 %vm341_vm0, %v3992_v40 }
 0x905   : > { %4009 = vmatmul.msk.f32.gmra.mxu3 %vm341_vm0, %v3993_v41 }
 0x90d   : > { %4010 = vmatmul.msk.f32.gmra.mxu3 %vm341_vm0, %v3994_v33 }
 0x915   : > { %4011 = vmatmul.msk.f32.gmra.mxu3 %vm341_vm0, %v3995_v35 }
 0x91d   : > { %4012 = vmatmul.msk.f32.gmra.mxu3 %vm341_vm0, %v3996_v22 }
 0x925   : > { %4013 = vmatmul.msk.f32.gmra.mxu3 %vm341_vm0, %v3997_v62 }
 0x92d   : > { %4014 = vmatmul.msk.f32.gmra.mxu3 %vm341_vm0, %v3998_v36 }
 0x935   : > { %4015 = vmatmul.msk.f32.gmra.mxu3 %vm341_vm0, %v3999_v38  ;;  %v5521_v38 = vld [vmem:[%s6318_s4] ss:$0 sm:$0xff] }
 0x93d   : > { %4016 = vmatmul.msk.f32.gmra.mxu3 %vm341_vm0, %v4000_v51 }
 0x945   : > { %4017 = vmatmul.msk.f32.gmra.mxu3 %vm341_vm0, %v4001_v42 }
 0x948   : > { %v2028_v43 = vpop.f32.mrf.mxu3 }
 0x949   : > { %2031 = vst [vmem:[%s4921_s14 + $0x3] sm:$0x1] %v2028_v43  ;;  %v5527_v43 = vld [vmem:[%s6319_s5] ss:$0 sm:$0xff] }
 0x950   : > { %v2114_v44 = vpop.f32.mrf.mxu3 }
 0x951   : > { %v2115_v45 = vadd.f32 %v5472_v17, %v2114_v44 }
 0x953   : > { %v2162_v18 = vmax.f32 %v2115_v45, 0.0 }
 0x955   : > { %4018 = vmatmul.msk.f32.vlgmr.msra.gmra.mxu1 %vm474_vm1, %v2162_v18 }
 0x956   : > { %2959 = vmatpush.msra.mxu1 %v5427_v12 }
 0x958   : > { %v2117_v46 = vpop.f32.mrf.mxu3  ;;  %2960 = vmatpush.msra.mxu1 %v5433_v23 }
 0x959   : > { %v2118_v47 = vadd.f32 %v5472_v17, %v2117_v46 }
 0x95b   : > { %v2163_v48 = vmax.f32 %v2118_v47, 0.0 }
 0x95d   : > { %4019 = vmatmul.msk.f32.gmra.mxu1 %vm474_vm1, %v2163_v48 }
 0x960   : > { %v2120_v49 = vpop.f32.mrf.mxu3 }
 0x961   : > { %v2121_v2 = vadd.f32 %v5472_v17, %v2120_v49 }
 0x963   : > { %v2164_v54 = vmax.f32 %v2121_v2, 0.0 }
 0x965   : > { %4020 = vmatmul.msk.f32.gmra.mxu1 %vm474_vm1, %v2164_v54 }
 0x968   : > { %v2123_v50 = vpop.f32.mrf.mxu3 }
 0x969   : > { %v2124_v56 = vadd.f32 %v5472_v17, %v2123_v50 }
 0x96b   : > { %v2165_v52 = vmax.f32 %v2124_v56, 0.0 }
 0x96d   : > { %4021 = vmatmul.msk.f32.gmra.mxu1 %vm474_vm1, %v2165_v52 }
 0x970   : > { %v2126_v57 = vpop.f32.mrf.mxu3 }
 0x971   : > { %v2127_v58 = vadd.f32 %v5472_v17, %v2126_v57 }
 0x973   : > { %v2166_v63 = vmax.f32 %v2127_v58, 0.0 }
 0x975   : > { %4022 = vmatmul.msk.f32.gmra.mxu1 %vm474_vm1, %v2166_v63 }
 0x978   : > { %v2129_v25 = vpop.f32.mrf.mxu3 }
 0x979   : > { %v2130_v0 = vadd.f32 %v5472_v17, %v2129_v25 }
 0x97b   : > { %v2167_v15 = vmax.f32 %v2130_v0, 0.0 }
 0x97d   : > { %4023 = vmatmul.msk.f32.gmra.mxu1 %vm474_vm1, %v2167_v15 }
 0x980   : > { %v2132_v1 = vpop.f32.mrf.mxu3 }
 0x981   : > { %v2133_v21 = vadd.f32 %v5472_v17, %v2132_v1 }
 0x983   : > { %v2168_v20 = vmax.f32 %v2133_v21, 0.0 }
 0x985   : > { %4024 = vmatmul.msk.f32.gmra.mxu1 %vm474_vm1, %v2168_v20 }
 0x988   : > { %v2135_v24 = vpop.f32.mrf.mxu3 }
 0x989   : > { %v2136_v32 = vadd.f32 %v5472_v17, %v2135_v24 }
 0x98b   : > { %v2169_v34 = vmax.f32 %v2136_v32, 0.0 }
 0x98d   : > { %4025 = vmatmul.msk.f32.gmra.mxu1 %vm474_vm1, %v2169_v34 }
 0x990   : > { %v2138_v37 = vpop.f32.mrf.mxu3 }
 0x991   : > { %v2139_v39 = vadd.f32 %v5472_v17, %v2138_v37 }
 0x993   : > { %v2170_v53 = vmax.f32 %v2139_v39, 0.0 }
 0x995   : > { %4026 = vmatmul.msk.f32.gmra.mxu1 %vm474_vm1, %v2170_v53 }
 0x998   : > { %v2141_v3 = vpop.f32.mrf.mxu3 }
 0x999   : > { %v2142_v60 = vadd.f32 %v5472_v17, %v2141_v3 }
 0x99b   : > { %v2171_v61 = vmax.f32 %v2142_v60, 0.0 }
 0x99d   : > { %4027 = vmatmul.msk.f32.gmra.mxu1 %vm474_vm1, %v2171_v61 }
 0x9a0   : > { %v2144_v4 = vpop.f32.mrf.mxu3 }
 0x9a1   : > { %v2145_v5 = vadd.f32 %v5472_v17, %v2144_v4 }
 0x9a3   : > { %v2172_v6 = vmax.f32 %v2145_v5, 0.0 }
 0x9a5   : > { %4028 = vmatmul.msk.f32.gmra.mxu1 %vm474_vm1, %v2172_v6 }
 0x9a8   : > { %v2147_v7 = vpop.f32.mrf.mxu3 }
 0x9a9   : > { %v2148_v9 = vadd.f32 %v5472_v17, %v2147_v7 }
 0x9ab   : > { %v2173_v10 = vmax.f32 %v2148_v9, 0.0 }
 0x9ad   : > { %4029 = vmatmul.msk.f32.gmra.mxu1 %vm474_vm1, %v2173_v10 }
 0x9b0   : > { %v2150_v59 = vpop.f32.mrf.mxu3 }
 0x9b1   : > { %v2151_v11 = vadd.f32 %v5472_v17, %v2150_v59 }
 0x9b3   : > { %v2174_v55 = vmax.f32 %v2151_v11, 0.0 }
 0x9b5   : > { %4030 = vmatmul.msk.f32.gmra.mxu1 %vm474_vm1, %v2174_v55 }
 0x9b8   : > { %v2153_v8 = vpop.f32.mrf.mxu3 }
 0x9b9   : > { %v2154_v13 = vadd.f32 %v5472_v17, %v2153_v8 }
 0x9bb   : > { %v2175_v14 = vmax.f32 %v2154_v13, 0.0 }
 0x9bd   : > { %4031 = vmatmul.msk.f32.gmra.mxu1 %vm474_vm1, %v2175_v14 }
 0x9c0   : > { %v2156_v16 = vpop.f32.mrf.mxu3 }
 0x9c1   : > { %v2157_v19 = vadd.f32 %v5472_v17, %v2156_v16 }
 0x9c3   : > { %v2176_v27 = vmax.f32 %v2157_v19, 0.0 }
 0x9c5   : > { %4032 = vmatmul.msk.f32.gmra.mxu1 %vm474_vm1, %v2176_v27 }
 0x9c8   : > { %v2159_v26 = vpop.f32.mrf.mxu3 }
 0x9c9   : > { %v2160_v28 = vadd.f32 %v5472_v17, %v2159_v26 }
 0x9cb   : > { %v2177_v29 = vmax.f32 %v2160_v28, 0.0 }
 0x9cd   : > { %4033 = vmatmul.msk.f32.gmra.mxu1 %vm474_vm1, %v2177_v29 }
 0x9d2   : > { %v5508_v30 = vpop.f32.mrf.mxu1 }
 0x9da   : > { %v5510_v31 = vpop.f32.mrf.mxu1 }
 0x9e2   : > { %v5512_v40 = vpop.f32.mrf.mxu1 }
 0x9e3   : > { %v2250_v26 = vadd.f32 %v5521_v38, %v5512_v40 }
 0x9ea   : > { %v5514_v41 = vpop.f32.mrf.mxu1 }
 0x9eb   : > { %v2253_v40 = vadd.f32 %v5521_v38, %v5514_v41 }
 0x9f2   : > { %v2255_v33 = vpop.f32.mrf.mxu1 }
 0x9f3   : > { %v2256_v59 = vadd.f32 %v5521_v38, %v2255_v33 }
 0x9f5   : > { %v2295_v14 = vmax.f32 %v2256_v59, 0.0 }
 0x9f7   : > { %v2311_v33 = vmul.f32 %v5527_v43, %v2295_v14 }
 0x9fa   : > { %v5516_v35 = vpop.f32.mrf.mxu1 }
 0x9fb   : > { %v2259_v28 = vadd.f32 %v5521_v38, %v5516_v35 }
 0xa02   : > { %v2261_v22 = vpop.f32.mrf.mxu1 }
 0xa03   : > { %v2262_v61 = vadd.f32 %v5521_v38, %v2261_v22  ;;  %v2293_v22 = vmax.f32 %v2250_v26, 0.0 }
 0xa05   : > { %v2297_v6 = vmax.f32 %v2262_v61, 0.0 }
 0xa07   : > { %v2313_v8 = vmul.f32 %v5527_v43, %v2297_v6 }
 0xa09   : > { %v2341_v27 = vsel %vm623_vm2, %v2313_v8, 0.0 }
 0xa0a   : > { %v2264_v62 = vpop.f32.mrf.mxu1 }
 0xa0b   : > { %v2265_v11 = vadd.f32 %v5521_v38, %v2264_v62  ;;  %v2296_v62 = vmax.f32 %v2259_v28, 0.0 }
 0xa0d   : > { %v2298_v16 = vmax.f32 %v2265_v11, 0.0  ;;  %v2312_v35 = vmul.f32 %v5527_v43, %v2296_v62 }
 0xa0f   : > { %v2314_v29 = vmul.f32 %v5527_v43, %v2298_v16 }
 0xa12   : > { %v2267_v36 = vpop.f32.mrf.mxu1 }
 0xa13   : > { %v2268_v51 = vadd.f32 %v5521_v38, %v2267_v36  ;;  %v2344_v36 = vsel %vm623_vm2, %v2314_v29, 0.0 }
 0xa15   : > { %v2299_v42 = vmax.f32 %v2268_v51, 0.0  ;;  %v2335_v51 = vsel %vm623_vm2, %v2311_v33, 0.0 }
 0xa17   : > { %v2315_v44 = vmul.f32 %v5527_v43, %v2299_v42  ;;  %v2244_v42 = vadd.f32 %v5521_v38, %v5508_v30 }
 0xa19   : > { %v2347_v45 = vsel %vm623_vm2, %v2315_v44, 0.0  ;;  %v2309_v44 = vmul.f32 %v5527_v43, %v2293_v22 }
 0xa1a   : > { %v2270_v18 = vpop.f32.mrf.mxu1  ;;  %2348 = vadd.xlane.f32.xlu2 %v2347_v45  ;;  %v2291_v45 = vmax.f32 %v2244_v42, 0.0  ;;  %v4037_v42 = vld [vmem:[%s4588_s26 + $0x298] sm:$0xff] }
 0xa1b   : > { %v2271_v46 = vadd.f32 %v5521_v38, %v2270_v18  ;;  %v2294_v18 = vmax.f32 %v2253_v40, 0.0  ;;  %v4038_v40 = vld [vmem:[%s4588_s26 + $0x2a0] sm:$0xff] }
 0xa1d   : > { %v2300_v47 = vmax.f32 %v2271_v46, 0.0  ;;  %v2338_v46 = vsel %vm623_vm2, %v2312_v35, 0.0  ;;  %v2310_v30 = vmul.f32 %v5527_v43, %v2294_v18  ;;  %v4034_v35 = vld [vmem:[%s4588_s26 + $0x280] sm:$0xff]  ;;  %v5681_v18 = vld [vmem:[%s6317_s3 + $0x28] sm:$0xff] }
 0xa1f   : > { %v2316_v48 = vmul.f32 %v5527_v43, %v2300_v47  ;;  %v2329_v47 = vsel %vm623_vm2, %v2309_v44, 0.0  ;;  %v4039_v44 = vld [vmem:[%s4588_s26 + $0x2a8] sm:$0xff] }
 0xa21   : > { %v2350_v49 = vsel %vm623_vm2, %v2316_v48, 0.0  ;;  %v2247_v48 = vadd.f32 %v5521_v38, %v5510_v31  ;;  %v5584_v31 = vld [vmem:[%s6321_s7 + $0x40] sm:$0xff] }
 0xa22   : > { %v2273_v2 = vpop.f32.mrf.mxu1  ;;  %2351 = vadd.xlane.f32.xlu0 %v2350_v49  ;;  %v2307_v49 = vmul.f32 %v5527_v43, %v2291_v45  ;;  %2442 = vmatpush.msra.mxu0 %v5584_v31  ;;  %v5668_v45 = vld [vmem:[%s6317_s3 + $0x38] sm:$0xff] }
 0xa23   : > { %v2274_v54 = vadd.f32 %v5521_v38, %v2273_v2  ;;  %v2292_v41 = vmax.f32 %v2247_v48, 0.0  ;;  %v2332_v2 = vsel %vm623_vm2, %v2310_v30, 0.0  ;;  %v5696_v48 = vld [vmem:[%s6317_s3 + $0x18] sm:$0xff]  ;;  %v5702_v30 = vld [vmem:[%s6317_s3 + $0x10] sm:$0xff] }
 0xa25   : > { %v2301_v50 = vmax.f32 %v2274_v54, 0.0  ;;  %v2323_v54 = vsel %vm623_vm2, %v2307_v49, 0.0  ;;  %v5708_v49 = vld [vmem:[%s6317_s3 + $0x8] sm:$0xff] }
 0xa27   : > { %v2317_v56 = vmul.f32 %v5527_v43, %v2301_v50  ;;  %v2308_v50 = vmul.f32 %v5527_v43, %v2292_v41  ;;  %v4041_v41 = vld [vmem:[%s4588_s26 + $0x2b8] sm:$0xff] }
 0xa29   : > { %v2353_v52 = vsel %vm623_vm2, %v2317_v56, 0.0  ;;  %v2326_v56 = vsel %vm623_vm2, %v2308_v50, 0.0  ;;  %v4043_v50 = vld [vmem:[%s4588_s26 + $0x2c8] sm:$0xff] }
 0xa2a   : > { %v2276_v57 = vpop.f32.mrf.mxu1  ;;  %2354 = vadd.xlane.f32.xlu2 %v2353_v52 }
 0xa2b   : > { %v2277_v58 = vadd.f32 %v5521_v38, %v2276_v57  ;;  %v5590_v57 = vld [vmem:[%s6321_s7 + $0x38] sm:$0xff] }
 0xa2c   : > { %2443 = vmatpush.msra.mxu0 %v5590_v57 }
 0xa2d   : > { %v2302_v63 = vmax.f32 %v2277_v58, 0.0 }
 0xa2f   : > { %v2318_v25 = vmul.f32 %v5527_v43, %v2302_v63 }
 0xa31   : > { %v2356_v0 = vsel %vm623_vm2, %v2318_v25, 0.0  ;;  %v5596_v25 = vld [vmem:[%s6321_s7 + $0x30] sm:$0xff] }
 0xa32   : > { %v2279_v15 = vpop.f32.mrf.mxu1  ;;  %2357 = vadd.xlane.f32.xlu0 %v2356_v0  ;;  %2444 = vmatpush.msra.mxu0 %v5596_v25 }
 0xa33   : > { %v2280_v1 = vadd.f32 %v5521_v38, %v2279_v15 }
 0xa35   : > { %v2303_v21 = vmax.f32 %v2280_v1, 0.0  ;;  %v5602_v1 = vld [vmem:[%s6321_s7 + $0x28] sm:$0xff] }
 0xa36   : > { %2445 = vmatpush.msra.mxu0 %v5602_v1 }
 0xa37   : > { %v2319_v20 = vmul.f32 %v5527_v43, %v2303_v21 }
 0xa39   : > { %v2359_v24 = vsel %vm623_vm2, %v2319_v20, 0.0 }
 0xa3a   : > { %v2282_v32 = vpop.f32.mrf.mxu1  ;;  %2360 = vadd.xlane.f32.xlu2 %v2359_v24  ;;  %v5608_v24 = vld [vmem:[%s6321_s7 + $0x20] sm:$0xff] }
 0xa3b   : > { %v2283_v34 = vadd.f32 %v5521_v38, %v2282_v32  ;;  %2446 = vmatpush.msra.mxu0 %v5608_v24 }
 0xa3d   : > { %v2304_v37 = vmax.f32 %v2283_v34, 0.0  ;;  %v5611_v34 = vld [vmem:[#allocation2] ss:$0 sm:$0xff] }
 0xa3f   : > { %v2320_v39 = vmul.f32 %v5527_v43, %v2304_v37 }
 0xa41   : > { %v2362_v53 = vsel %vm623_vm2, %v2320_v39, 0.0 }
 0xa42   : > { %v2285_v3 = vpop.f32.mrf.mxu1  ;;  %2363 = vadd.xlane.f32.xlu0 %v2362_v53 }
 0xa43   : > { %v2286_v60 = vadd.f32 %v5521_v38, %v2285_v3 }
 0xa45   : > { %v2305_v4 = vmax.f32 %v2286_v60, 0.0  ;;  %v5619_v60 = vld [vmem:[%s6321_s7 + $0x18] sm:$0xff] }
 0xa47   : > { %v2321_v5 = vmul.f32 %v5527_v43, %v2305_v4  ;;  %v5625_v4 = vld [vmem:[%s6321_s7 + $0x10] sm:$0xff] }
 0xa49   : > { %v2365_v7 = vsel %vm623_vm2, %v2321_v5, 0.0 }
 0xa4a   : > { %v2288_v9 = vpop.f32.mrf.mxu1  ;;  %2366 = vadd.xlane.f32.xlu2 %v2365_v7  ;;  %v5632_v7 = vld [vmem:[%s6321_s7 + $0x8] sm:$0xff] }
 0xa4b   : > { %v2289_v10 = vadd.f32 %v5521_v38, %v2288_v9 }
 0xa4d   : > { %v2306_v55 = vmax.f32 %v2289_v10, 0.0  ;;  %v5639_v10 = vld [vmem:[%s6321_s7] sm:$0xff] }
 0xa4f   : > { %v2322_v13 = vmul.f32 %v5527_v43, %v2306_v55 }
 0xa51   : > { %v2368_v19 = vsel %vm623_vm2, %v2322_v13, 0.0 }
 0xa52   : > { %2369 = vadd.xlane.f32.xlu0 %v2368_v19  ;;  %2342 = vadd.xlane.f32.xlu2 %v2341_v27 }
 0xa5a   : > { %2345 = vadd.xlane.f32.xlu0 %v2344_v36  ;;  %2336 = vadd.xlane.f32.xlu2 %v2335_v51  ;;  %v4036_v51 = vld [vmem:[%s4588_s26 + $0x290] sm:$0xff] }
 0xa5b   : > { %4052 = vmatmul.msk.f32.vlgmr.msra.gmra.mxu2 %vm341_vm0, %v4036_v51 }
 0xa62   : > { %2339 = vadd.xlane.f32.xlu0 %v2338_v46  ;;  %2330 = vadd.xlane.f32.xlu2 %v2329_v47  ;;  %v4040_v46 = vld [vmem:[%s4588_s26 + $0x2b0] sm:$0xff]  ;;  %v5688_v47 = vld [vmem:[%s6317_s3 + $0x20] sm:$0xff] }
 0xa63   : > { %4053 = vmatmul.msk.f32.gmra.mxu2 %vm341_vm0, %v4037_v42 }
 0xa6a   : > { %2333 = vadd.xlane.f32.xlu0 %v2332_v2  ;;  %2324 = vadd.xlane.f32.xlu2 %v2323_v54  ;;  %v5715_v2 = vld [vmem:[%s6317_s3] sm:$0xff] }
 0xa6b   : > { %4054 = vmatmul.msk.f32.gmra.mxu2 %vm341_vm0, %v4038_v40  ;;  %v4042_v54 = vld [vmem:[%s4588_s26 + $0x2c0] sm:$0xff] }
 0xa72   : > { %2327 = vadd.xlane.f32.xlu0 %v2326_v56  ;;  %v4044_v56 = vld [vmem:[%s4588_s26 + $0x2d0] sm:$0xff] }
 0xa73   : > { %4055 = vmatmul.msk.f32.gmra.mxu2 %vm341_vm0, %v4039_v44 }
 0xa7b   : > { %4056 = vmatmul.msk.f32.gmra.mxu2 %vm341_vm0, %v4040_v46 }
 0xa83   : > { %4057 = vmatmul.msk.f32.gmra.mxu2 %vm341_vm0, %v4041_v41 }
 0xa8b   : > { %4058 = vmatmul.msk.f32.gmra.mxu2 %vm341_vm0, %v4042_v54 }
 0xa8d   : > { %v2349_v52 = vpop.xlane.xlu2 %2348 }
 0xa8e   : > { %v2379_v55 = vadd.f32 %v5611_v34, %v2349_v52  ;;  %v4045_v52 = vld [vmem:[%s4588_s26 + $0x2d8] sm:$0xff] }
 0xa93   : > { %4059 = vmatmul.msk.f32.gmra.mxu2 %vm341_vm0, %v4043_v50 }
 0xa95   : > { %v2352_v58 = vpop.xlane.xlu0 %2351 }
 0xa96   : > { %v2380_v11 = vadd.f32 %v5611_v34, %v2352_v58  ;;  %v4046_v58 = vld [vmem:[%s4588_s26 + $0x2e0] sm:$0xff] }
 0xa9b   : > { %4060 = vmatmul.msk.f32.gmra.mxu2 %vm341_vm0, %v4044_v56 }
 0xa9d   : > { %v2355_v63 = vpop.xlane.xlu2 %2354 }
 0xa9e   : > { %v2381_v9 = vadd.f32 %v5611_v34, %v2355_v63  ;;  %v4047_v63 = vld [vmem:[%s4588_s26 + $0x2e8] sm:$0xff] }
 0xaa3   : > { %4061 = vmatmul.msk.f32.gmra.mxu2 %vm341_vm0, %v4045_v52 }
 0xaa5   : > { %v2358_v0 = vpop.xlane.xlu0 %2357 }
 0xaa6   : > { %v2382_v6 = vadd.f32 %v5611_v34, %v2358_v0  ;;  %v4048_v0 = vld [vmem:[%s4588_s26 + $0x2f0] sm:$0xff] }
 0xaab   : > { %4062 = vmatmul.msk.f32.gmra.mxu2 %vm341_vm0, %v4046_v58 }
 0xaad   : > { %v2361_v15 = vpop.xlane.xlu2 %2360 }
 0xaae   : > { %v2383_v61 = vadd.f32 %v5611_v34, %v2361_v15  ;;  %v4049_v15 = vld [vmem:[%s4588_s26 + $0x2f8] sm:$0xff] }
 0xab3   : > { %4063 = vmatmul.msk.f32.gmra.mxu2 %vm341_vm0, %v4047_v63 }
 0xab5   : > { %v2364_v21 = vpop.xlane.xlu0 %2363 }
 0xab6   : > { %v2384_v3 = vadd.f32 %v5611_v34, %v2364_v21 }
 0xabb   : > { %4064 = vmatmul.msk.f32.gmra.mxu2 %vm341_vm0, %v4048_v0 }
 0xabd   : > { %v2367_v20 = vpop.xlane.xlu2 %2366 }
 0xabe   : > { %v2385_v53 = vadd.f32 %v5611_v34, %v2367_v20 }
 0xac3   : > { %4065 = vmatmul.msk.f32.gmra.mxu2 %vm341_vm0, %v4049_v15 }
 0xac5   : > { %v2370_v32 = vpop.xlane.xlu0 %2369  ;;  %v2343_v39 = vpop.xlane.xlu2 %2342 }
 0xac6   : > { %v2386_v37 = vadd.f32 %v5611_v34, %v2370_v32  ;;  %v2377_v14 = vadd.f32 %v5611_v34, %v2343_v39 }
 0xac8   : > { %4208 = vmatpush.lsf.msrb.mxu0 %v2386_v37 }
 0xaca   : > { %4209 = vmatpush.lsf.msrb.mxu0 %v2385_v53 }
 0xacc   : > { %4210 = vmatpush.lsf.msrb.mxu0 %v2384_v3 }
 0xacd   : > { %v2346_v5 = vpop.xlane.xlu0 %2345  ;;  %v2337_v59 = vpop.xlane.xlu2 %2336 }
 0xace   : > { %2447 = vmatpush.msra.mxu0 %v5619_v60  ;;  %v2378_v13 = vadd.f32 %v5611_v34, %v2346_v5  ;;  %v2375_v27 = vadd.f32 %v5611_v34, %v2337_v59 }
 0xad0   : > { %4211 = vmatpush.lsf.msrb.mxu0 %v2383_v61 }
 0xad2   : > { %2448 = vmatpush.msra.mxu0 %v5625_v4 }
 0xad4   : > { %4212 = vmatpush.lsf.msrb.mxu0 %v2382_v6 }
 0xad5   : > { %v2340_v8 = vpop.xlane.xlu0 %2339  ;;  %v2331_v19 = vpop.xlane.xlu2 %2330 }
 0xad6   : > { %2449 = vmatpush.msra.mxu0 %v5632_v7  ;;  %v2376_v16 = vadd.f32 %v5611_v34, %v2340_v8  ;;  %v2373_v29 = vadd.f32 %v5611_v34, %v2331_v19 }
 0xad8   : > { %4213 = vmatpush.lsf.msrb.mxu0 %v2381_v9 }
 0xada   : > { %2450 = vmatpush.msra.mxu0 %v5639_v10 }
 0xadc   : > { %4214 = vmatpush.lsf.msrb.mxu0 %v2380_v11 }
 0xadd   : > { %v2334_v26 = vpop.xlane.xlu0 %2333  ;;  %v2325_v33 = vpop.xlane.xlu2 %2324 }
 0xade   : > { %4215 = vmatpush.lsf.msrb.mxu0 %v2379_v55  ;;  %v2374_v28 = vadd.f32 %v5611_v34, %v2334_v26  ;;  %v2371_v36 = vadd.f32 %v5611_v34, %v2325_v33  ;;  %v2544_v21 = vpop.f32.mrf.mxu2 }
 0xadf   : > { %v2545_v9 = vadd.f32 %v5472_v17, %v2544_v21 }
 0xae0   : > { %4216 = vmatpush.lsf.msrb.mxu0 %v2378_v13 }
 0xae1   : > { %v2588_v11 = vmax.f32 %v2545_v9, 0.0 }
 0xae2   : > { %4217 = vmatpush.lsf.msrb.mxu0 %v2377_v14 }
 0xae4   : > { %4218 = vmatpush.lsf.msrb.mxu0 %v2376_v16 }
 0xae5   : > { %v2328_v22 = vpop.xlane.xlu0 %2327 }
 0xae6   : > { %4219 = vmatpush.lsf.msrb.mxu0 %v2375_v27  ;;  %v2372_v62 = vadd.f32 %v5611_v34, %v2328_v22  ;;  %v2547_v32 = vpop.f32.mrf.mxu2 }
 0xae7   : > { %v2548_v55 = vadd.f32 %v5472_v17, %v2547_v32 }
 0xae8   : > { %4220 = vmatpush.lsf.msrb.mxu0 %v2374_v28 }
 0xae9   : > { %v2589_v13 = vmax.f32 %v2548_v55, 0.0 }
 0xaea   : > { %4221 = vmatpush.lsf.msrb.mxu0 %v2373_v29 }
 0xaec   : > { %4222 = vmatpush.lsf.msrb.mxu0 %v2372_v62 }
 0xaee   : > { %4223 = vmatpush.lsf.msrb.mxu0 %v2371_v36  ;;  %v2550_v3 = vpop.f32.mrf.mxu2 }
 0xaef   : > { %4224 = vllmr.1.mxu0  ;;  %v2551_v14 = vadd.f32 %v5472_v17, %v2550_v3 }
 0xaf1   : > { %v2590_v16 = vmax.f32 %v2551_v14, 0.0 }
 0xaf6   : > { %v2553_v59 = vpop.f32.mrf.mxu2 }
 0xaf7   : > { %v2554_v27 = vadd.f32 %v5472_v17, %v2553_v59 }
 0xaf9   : > { %v2591_v26 = vmax.f32 %v2554_v27, 0.0 }
 0xafe   : > { %v2556_v8 = vpop.f32.mrf.mxu2 }
 0xaff   : > { %v2557_v29 = vadd.f32 %v5472_v17, %v2556_v8 }
 0xb01   : > { %v2592_v33 = vmax.f32 %v2557_v29, 0.0 }
 0xb06   : > { %v2559_v19 = vpop.f32.mrf.mxu2 }
 0xb07   : > { %v2560_v22 = vadd.f32 %v5472_v17, %v2559_v19 }
 0xb09   : > { %v2593_v36 = vmax.f32 %v2560_v22, 0.0 }
 0xb0e   : > { %v2562_v28 = vpop.f32.mrf.mxu2 }
 0xb0f   : > { %v2563_v51 = vadd.f32 %v5472_v17, %v2562_v28 }
 0xb10   : > { %4225 = vmatmul.lmr.bf16.vlgmr.msra.gmra.1.mxu0 }
 0xb11   : > { %2535 = vmatpush.msra.mxu0 %v5427_v12  ;;  %v5674_v12 = vld [vmem:[%s6317_s3 + $0x30] sm:$0xff]  ;;  %v2594_v40 = vmax.f32 %v2563_v51, 0.0 }
 0xb13   : > { %2536 = vmatpush.msra.mxu0 %v5433_v23  ;;  %v4035_v23 = vld [vmem:[%s4588_s26 + $0x288] sm:$0xff] }
 0xb16   : > { %v2565_v62 = vpop.f32.mrf.mxu2 }
 0xb18   : > { %4050 = vmatmul.msk.f32.vlgmr.msra.gmra.mxu0 %vm341_vm0, %v4034_v35  ;;  %v2566_v35 = vadd.f32 %v5472_v17, %v2565_v62 }
 0xb19   : > { %2658 = vmatpush.msra.mxu0 %v5668_v45 }
 0xb1a   : > { %v2595_v44 = vmax.f32 %v2566_v35, 0.0 }
 0xb1b   : > { %2659 = vmatpush.msra.mxu0 %v5674_v12 }
 0xb1d   : > { %2660 = vmatpush.msra.mxu0 %v5681_v18 }
 0xb1e   : > { %v2568_v42 = vpop.f32.mrf.mxu2 }
 0xb1f   : > { %2661 = vmatpush.msra.mxu0 %v5688_v47  ;;  %v2569_v46 = vadd.f32 %v5472_v17, %v2568_v42 }
 0xb20   : > { %4051 = vmatmul.msk.f32.gmra.mxu0 %vm341_vm0, %v4035_v23 }
 0xb21   : > { %2662 = vmatpush.msra.mxu0 %v5696_v48  ;;  %v2596_v41 = vmax.f32 %v2569_v46, 0.0 }
 0xb23   : > { %2663 = vmatpush.msra.mxu0 %v5702_v30 }
 0xb25   : > { %2664 = vmatpush.msra.mxu0 %v5708_v49 }
 0xb26   : > { %v2571_v23 = vpop.f32.mrf.mxu2 }
 0xb27   : > { %2665 = vmatpush.msra.mxu0 %v5715_v2  ;;  %v2572_v50 = vadd.f32 %v5472_v17, %v2571_v23 }
 0xb29   : > { %v2597_v56 = vmax.f32 %v2572_v50, 0.0 }
 0xb2e   : > { %v2574_v54 = vpop.f32.mrf.mxu2 }
 0xb2f   : > { %v2575_v52 = vadd.f32 %v5472_v17, %v2574_v54 }
 0xb31   : > { %v2598_v63 = vmax.f32 %v2575_v52, 0.0 }
 0xb36   : > { %v2577_v58 = vpop.f32.mrf.mxu2 }
 0xb37   : > { %v2578_v0 = vadd.f32 %v5472_v17, %v2577_v58 }
 0xb39   : > { %v2599_v21 = vmax.f32 %v2578_v0, 0.0 }
 0xb3e   : > { %v2580_v15 = vpop.f32.mrf.mxu2 }
 0xb8d   : > { %v2452_v20 = vpop.f32.mrf.mxu0 }
 0xb8e   : > { %2455 = vst [vmem:[%s4921_s14 + $0x4] sm:$0x1] %v2452_v20  ;;  %v2581_v20 = vadd.f32 %v5472_v17, %v2580_v15 }
 0xb90   : > { %v2600_v32 = vmax.f32 %v2581_v20, 0.0 }
 0xb95   : > { %v2538_v37 = vpop.f32.mrf.mxu0 }
 0xb96   : > { %v2539_v39 = vadd.f32 %v5472_v17, %v2538_v37  ;;  %v2583_v37 = vpop.f32.mrf.mxu2 }
 0xb98   : > { %v2586_v53 = vmax.f32 %v2539_v39, 0.0  ;;  %v2584_v39 = vadd.f32 %v5472_v17, %v2583_v37 }
 0xb9a   : > { %4066 = vmatmul.msk.f32.vlgmr.msra.gmra.mxu0 %vm474_vm1, %v2586_v53  ;;  %v2601_v53 = vmax.f32 %v2584_v39, 0.0 }
 0xb9b   : > { %3506 = vmatpush.msra.mxu0 %v5668_v45 }
 0xb9d   : > { %v2541_v61 = vpop.f32.mrf.mxu0  ;;  %3507 = vmatpush.msra.mxu0 %v5674_v12 }
 0xb9e   : > { %v2542_v5 = vadd.f32 %v5472_v17, %v2541_v61 }
 0xb9f   : > { %3508 = vmatpush.msra.mxu0 %v5681_v18 }
 0xba0   : > { %v2587_v6 = vmax.f32 %v2542_v5, 0.0 }
 0xba1   : > { %3509 = vmatpush.msra.mxu0 %v5688_v47 }
 0xba2   : > { %4067 = vmatmul.msk.f32.gmra.mxu0 %vm474_vm1, %v2587_v6 }
 0xba3   : > { %3510 = vmatpush.msra.mxu0 %v5696_v48 }
 0xba5   : > { %3511 = vmatpush.msra.mxu0 %v5702_v30 }
 0xba7   : > { %3512 = vmatpush.msra.mxu0 %v5708_v49 }
 0xba9   : > { %3513 = vmatpush.msra.mxu0 %v5715_v2 }
 0xbaa   : > { %4068 = vmatmul.msk.f32.gmra.mxu0 %vm474_vm1, %v2588_v11 }
 0xbb2   : > { %4069 = vmatmul.msk.f32.gmra.mxu0 %vm474_vm1, %v2589_v13 }
 0xbba   : > { %4070 = vmatmul.msk.f32.gmra.mxu0 %vm474_vm1, %v2590_v16 }
 0xbc2   : > { %4071 = vmatmul.msk.f32.gmra.mxu0 %vm474_vm1, %v2591_v26 }
 0xbca   : > { %4072 = vmatmul.msk.f32.gmra.mxu0 %vm474_vm1, %v2592_v33 }
 0xbd2   : > { %4073 = vmatmul.msk.f32.gmra.mxu0 %vm474_vm1, %v2593_v36 }
 0xbda   : > { %4074 = vmatmul.msk.f32.gmra.mxu0 %vm474_vm1, %v2594_v40 }
 0xbe2   : > { %4075 = vmatmul.msk.f32.gmra.mxu0 %vm474_vm1, %v2595_v44 }
 0xbea   : > { %4076 = vmatmul.msk.f32.gmra.mxu0 %vm474_vm1, %v2596_v41 }
 0xbf2   : > { %4077 = vmatmul.msk.f32.gmra.mxu0 %vm474_vm1, %v2597_v56 }
 0xbfa   : > { %4078 = vmatmul.msk.f32.gmra.mxu0 %vm474_vm1, %v2598_v63 }
 0xc02   : > { %4079 = vmatmul.msk.f32.gmra.mxu0 %vm474_vm1, %v2599_v21 }
 0xc0a   : > { %4080 = vmatmul.msk.f32.gmra.mxu0 %vm474_vm1, %v2600_v32 }
 0xc12   : > { %4081 = vmatmul.msk.f32.gmra.mxu0 %vm474_vm1, %v2601_v53 }
 0xc17   : > { %v2667_v3 = vpop.f32.mrf.mxu0 }
 0xc18   : > { %v2668_v51 = vadd.f32 %v5521_v38, %v2667_v3 }
 0xc1a   : > { %v2715_v40 = vmax.f32 %v2668_v51, 0.0 }
 0xc1c   : > { %v2731_v41 = vmul.f32 %v5527_v43, %v2715_v40 }
 0xc1e   : > { %v2747_v56 = vsel %vm623_vm2, %v2731_v41, 0.0 }
 0xc1f   : > { %v5776_v61 = vpop.f32.mrf.mxu0 }
 0xc27   : > { %v5778_v5 = vpop.f32.mrf.mxu0 }
 0xc2f   : > { %v2676_v6 = vpop.f32.mrf.mxu0 }
 0xc30   : > { %v2677_v29 = vadd.f32 %v5521_v38, %v2676_v6 }
 0xc32   : > { %v2718_v22 = vmax.f32 %v2677_v29, 0.0 }
 0xc34   : > { %v2734_v42 = vmul.f32 %v5527_v43, %v2718_v22 }
 0xc36   : > { %v2756_v35 = vsel %vm623_vm2, %v2734_v42, 0.0 }
 0xc37   : > { %v5780_v9 = vpop.f32.mrf.mxu0 }
 0xc3f   : > { %v5782_v59 = vpop.f32.mrf.mxu0 }
 0xc47   : > { %v2685_v11 = vpop.f32.mrf.mxu0 }
 0xc48   : > { %v2686_v17 = vadd.f32 %v5521_v38, %v2685_v11 }
 0xc4a   : > { %v2721_v27 = vmax.f32 %v2686_v17, 0.0 }
 0xc4c   : > { %v2737_v33 = vmul.f32 %v5527_v43, %v2721_v27 }
 0xc4e   : > { %v2765_v62 = vsel %vm623_vm2, %v2737_v33, 0.0  ;;  %v2826_v33 = vld [vmem:[%s6321_s7 + $0x78] sm:$0xff] }
 0xc4f   : > { %v2688_v55 = vpop.f32.mrf.mxu0  ;;  %2859 = vmatpush.msra.mxu3 %v2826_v33  ;;  %3283 = vmatpush.msra.mxu2 %v2826_v33  ;;  %v4093_v33 = vld [vmem:[%s4588_s26 + $0x358] sm:$0xff] }
 0xc57   : > { %v2691_v8 = vpop.f32.mrf.mxu0 }
 0xc58   : > { %v2692_v22 = vadd.f32 %v5521_v38, %v2691_v8 }
 0xc5a   : > { %v2723_v42 = vmax.f32 %v2692_v22, 0.0 }
 0xc5c   : > { %v2739_v8 = vmul.f32 %v5527_v43, %v2723_v42 }
 0xc5f   : > { %v2694_v13 = vpop.f32.mrf.mxu0 }
 0xc60   : > { %v2695_v14 = vadd.f32 %v5521_v38, %v2694_v13  ;;  %v2689_v13 = vadd.f32 %v5521_v38, %v2688_v55  ;;  %v2680_v55 = vadd.f32 %v5521_v38, %v5780_v9  ;;  %v2683_v9 = vadd.f32 %v5521_v38, %v5782_v59 }
 0xc62   : > { %v2724_v16 = vmax.f32 %v2695_v14, 0.0  ;;  %v2722_v27 = vmax.f32 %v2689_v13, 0.0  ;;  %v2719_v51 = vmax.f32 %v2680_v55, 0.0  ;;  %v2720_v41 = vmax.f32 %v2683_v9, 0.0  ;;  %v4088_v13 = vld [vmem:[%s4588_s26 + $0x330] sm:$0xff] }
 0xc64   : > { %v2740_v19 = vmul.f32 %v5527_v43, %v2724_v16 }
 0xc66   : > { %v2774_v26 = vsel %vm623_vm2, %v2740_v19, 0.0 }
 0xc67   : > { %v2697_v28 = vpop.f32.mrf.mxu0  ;;  %2775 = vadd.xlane.f32.xlu1 %v2774_v26 }
 0xc68   : > { %v2698_v32 = vadd.f32 %v5521_v38, %v2697_v28 }
 0xc6a   : > { %v2725_v53 = vmax.f32 %v2698_v32, 0.0  ;;  %v4084_v32 = vld [vmem:[%s4588_s26 + $0x310] sm:$0xff] }
 0xc6c   : > { %v2741_v16 = vmul.f32 %v5527_v43, %v2725_v53  ;;  %v2821_v53 = vld [vmem:[%s6321_s7 + $0x50] sm:$0xff] }
 0xc6e   : > { %v2777_v29 = vsel %vm623_vm2, %v2741_v16, 0.0 }
 0xc6f   : > { %v2700_v36 = vpop.f32.mrf.mxu0  ;;  %2766 = vadd.xlane.f32.xlu1 %v2765_v62 }
 0xc70   : > { %v2701_v14 = vadd.f32 %v5521_v38, %v2700_v36  ;;  %v2738_v36 = vmul.f32 %v5527_v43, %v2722_v27 }
 0xc72   : > { %v2726_v26 = vmax.f32 %v2701_v14, 0.0  ;;  %v4091_v14 = vld [vmem:[%s4588_s26 + $0x348] sm:$0xff] }
 0xc74   : > { %v2742_v62 = vmul.f32 %v5527_v43, %v2726_v26 }
 0xc76   : > { %v2780_v40 = vsel %vm623_vm2, %v2742_v62, 0.0 }
 0xc77   : > { %v2703_v44 = vpop.f32.mrf.mxu0  ;;  %2757 = vadd.xlane.f32.xlu1 %v2756_v35  ;;  %v2768_v35 = vsel %vm623_vm2, %v2738_v36, 0.0 }
 0xc78   : > { %v2704_v23 = vadd.f32 %v5521_v38, %v2703_v44  ;;  %v2671_v44 = vadd.f32 %v5521_v38, %v5776_v61  ;;  %v2736_v61 = vmul.f32 %v5527_v43, %v2720_v41  ;;  %v4095_v41 = vld [vmem:[%s4588_s26 + $0x368] sm:$0xff] }
 0xc7a   : > { %v2727_v46 = vmax.f32 %v2704_v23, 0.0  ;;  %v2735_v23 = vmul.f32 %v5527_v43, %v2719_v51 }
 0xc7c   : > { %v2743_v54 = vmul.f32 %v5527_v43, %v2727_v46  ;;  %v2716_v46 = vmax.f32 %v2671_v44, 0.0 }
 0xc7e   : > { %v2783_v50 = vsel %vm623_vm2, %v2743_v54, 0.0  ;;  %v2771_v54 = vsel %vm623_vm2, %v2739_v8, 0.0  ;;  %v2732_v59 = vmul.f32 %v5527_v43, %v2716_v46 }
 0xc7f   : > { %v2706_v52 = vpop.f32.mrf.mxu0  ;;  %2784 = vadd.xlane.f32.xlu2 %v2783_v50  ;;  %2748 = vadd.xlane.f32.xlu1 %v2747_v56  ;;  %v2759_v50 = vsel %vm623_vm2, %v2735_v23, 0.0  ;;  %v2674_v56 = vadd.f32 %v5521_v38, %v5778_v5  ;;  %v4082_v5 = vld [vmem:[%s4588_s26 + $0x300] sm:$0xff] }
 0xc80   : > { %v2707_v58 = vadd.f32 %v5521_v38, %v2706_v52  ;;  %4098 = vmatmul.msk.f32.vlgmr.msra.gmra.mxu1 %vm341_vm0, %v4082_v5 }
 0xc81   : > { %v2717_v52 = vmax.f32 %v2674_v56, 0.0 }
 0xc82   : > { %v2728_v63 = vmax.f32 %v2707_v58, 0.0  ;;  %v2762_v58 = vsel %vm623_vm2, %v2736_v61, 0.0 }
 0xc84   : > { %v2744_v0 = vmul.f32 %v5527_v43, %v2728_v63  ;;  %v2750_v63 = vsel %vm623_vm2, %v2732_v59, 0.0 }
 0xc86   : > { %v2786_v15 = vsel %vm623_vm2, %v2744_v0, 0.0  ;;  %v2733_v0 = vmul.f32 %v5527_v43, %v2717_v52 }
 0xc87   : > { %v2709_v21 = vpop.f32.mrf.mxu0  ;;  %2787 = vadd.xlane.f32.xlu0 %v2786_v15 }
 0xc88   : > { %v2710_v20 = vadd.f32 %v5521_v38, %v2709_v21  ;;  %v2753_v15 = vsel %vm623_vm2, %v2733_v0, 0.0  ;;  %v2824_v21 = vld [vmem:[%s6321_s7 + $0x68] sm:$0xff]  ;;  %v4097_v0 = vld [vmem:[%s4588_s26 + $0x378] sm:$0xff] }
 0xc8a   : > { %v2729_v37 = vmax.f32 %v2710_v20, 0.0  ;;  %v4083_v20 = vld [vmem:[%s4588_s26 + $0x308] sm:$0xff] }
 0xc8b   : > { %4099 = vmatmul.msk.f32.gmra.mxu1 %vm341_vm0, %v4083_v20 }
 0xc8c   : > { %v2745_v39 = vmul.f32 %v5527_v43, %v2729_v37  ;;  %v2822_v37 = vld [vmem:[%s6321_s7 + $0x58] sm:$0xff] }
 0xc8e   : > { %v2789_v3 = vsel %vm623_vm2, %v2745_v39, 0.0  ;;  %v4085_v39 = vld [vmem:[%s4588_s26 + $0x318] sm:$0xff] }
 0xc8f   : > { %v2712_v6 = vpop.f32.mrf.mxu0  ;;  %2790 = vadd.xlane.f32.xlu2 %v2789_v3  ;;  %v4086_v3 = vld [vmem:[%s4588_s26 + $0x320] sm:$0xff] }
 0xc90   : > { %v2713_v11 = vadd.f32 %v5521_v38, %v2712_v6  ;;  %v2825_v38 = vld [vmem:[%s6321_s7 + $0x70] sm:$0xff]  ;;  %v2820_v6 = vld [vmem:[%s6321_s7 + $0x48] sm:$0xff] }
 0xc91   : > { %2860 = vmatpush.msra.mxu3 %v2825_v38  ;;  %3284 = vmatpush.msra.mxu2 %v2825_v38 }
 0xc92   : > { %v2730_v17 = vmax.f32 %v2713_v11, 0.0  ;;  %v4087_v11 = vld [vmem:[%s4588_s26 + $0x328] sm:$0xff] }
 0xc93   : > { %2861 = vmatpush.msra.mxu3 %v2824_v21  ;;  %3285 = vmatpush.msra.mxu2 %v2824_v21 }
 0xc94   : > { %v2746_v19 = vmul.f32 %v5527_v43, %v2730_v17  ;;  %v2823_v43 = vld [vmem:[%s6321_s7 + $0x60] sm:$0xff]  ;;  %4100 = vmatmul.msk.f32.gmra.mxu1 %vm341_vm0, %v4084_v32 }
 0xc95   : > { %2862 = vmatpush.msra.mxu3 %v2823_v43  ;;  %3286 = vmatpush.msra.mxu2 %v2823_v43 }
 0xc96   : > { %v2792_v28 = vsel %vm623_vm2, %v2746_v19, 0.0  ;;  %v4092_v19 = vld [vmem:[%s4588_s26 + $0x350] sm:$0xff] }
 0xc97   : > { %2793 = vadd.xlane.f32.xlu0 %v2792_v28  ;;  %2778 = vadd.xlane.f32.xlu2 %v2777_v29 }
 0xc98   : > { %2863 = vmatpush.msra.mxu3 %v2822_v37  ;;  %3287 = vmatpush.msra.mxu2 %v2822_v37 }
 0xc9a   : > { %2864 = vmatpush.msra.mxu3 %v2821_v53  ;;  %3288 = vmatpush.msra.mxu2 %v2821_v53 }
 0xc9c   : > { %4101 = vmatmul.msk.f32.gmra.mxu1 %vm341_vm0, %v4085_v39  ;;  %2865 = vmatpush.msra.mxu3 %v2820_v6 }
 0xc9d   : > { %3289 = vmatpush.msra.mxu2 %v2820_v6 }
 0xc9e   : > { %2866 = vmatpush.msra.mxu3 %v5584_v31  ;;  %v4089_v31 = vld [vmem:[%s4588_s26 + $0x338] sm:$0xff] }
 0xc9f   : > { %2781 = vadd.xlane.f32.xlu0 %v2780_v40  ;;  %2769 = vadd.xlane.f32.xlu2 %v2768_v35  ;;  %v4094_v40 = vld [vmem:[%s4588_s26 + $0x360] sm:$0xff] }
 0xca0   : > { %2867 = vmatpush.msra.mxu3 %v5590_v57 }
 0xca2   : > { %2868 = vmatpush.msra.mxu3 %v5596_v25  ;;  %v4090_v25 = vld [vmem:[%s4588_s26 + $0x340] sm:$0xff] }
 0xca4   : > { %4102 = vmatmul.msk.f32.gmra.mxu1 %vm341_vm0, %v4086_v3  ;;  %2869 = vmatpush.msra.mxu3 %v5602_v1 }
 0xca6   : > { %2870 = vmatpush.msra.mxu3 %v5608_v24 }
 0xca7   : > { %2772 = vadd.xlane.f32.xlu0 %v2771_v54  ;;  %2760 = vadd.xlane.f32.xlu2 %v2759_v50 }
 0xca8   : > { %2871 = vmatpush.msra.mxu3 %v5619_v60 }
 0xcaa   : > { %2872 = vmatpush.msra.mxu3 %v5625_v4 }
 0xcac   : > { %4103 = vmatmul.msk.f32.gmra.mxu1 %vm341_vm0, %v4087_v11  ;;  %2873 = vmatpush.msra.mxu3 %v5632_v7 }
 0xcae   : > { %2874 = vmatpush.msra.mxu3 %v5639_v10 }
 0xcaf   : > { %2763 = vadd.xlane.f32.xlu0 %v2762_v58  ;;  %2751 = vadd.xlane.f32.xlu2 %v2750_v63  ;;  %v4096_v58 = vld [vmem:[%s4588_s26 + $0x370] sm:$0xff] }
 0xcb4   : > { %4104 = vmatmul.msk.f32.gmra.mxu1 %vm341_vm0, %v4088_v13 }
 0xcb7   : > { %2754 = vadd.xlane.f32.xlu0 %v2753_v15 }
 0xcbc   : > { %4105 = vmatmul.msk.f32.gmra.mxu1 %vm341_vm0, %v4089_v31 }
 0xcc4   : > { %4106 = vmatmul.msk.f32.gmra.mxu1 %vm341_vm0, %v4090_v25 }
 0xccc   : > { %4107 = vmatmul.msk.f32.gmra.mxu1 %vm341_vm0, %v4091_v14 }
 0xcd4   : > { %4108 = vmatmul.msk.f32.gmra.mxu1 %vm341_vm0, %v4092_v19 }
 0xcda   : > { %v2776_v17 = vpop.xlane.xlu1 %2775 }
 0xcdb   : > { %v2804_v22 = vadd.f32 %v5611_v34, %v2776_v17 }
 0xcdc   : > { %4109 = vmatmul.msk.f32.gmra.mxu1 %vm341_vm0, %v4093_v33 }
 0xce2   : > { %v2767_v62 = vpop.xlane.xlu1 %2766 }
 0xce3   : > { %v2801_v35 = vadd.f32 %v5611_v34, %v2767_v62 }
 0xce4   : > { %4110 = vmatmul.msk.f32.gmra.mxu1 %vm341_vm0, %v4094_v40 }
 0xcea   : > { %v2758_v9 = vpop.xlane.xlu1 %2757 }
 0xceb   : > { %v2798_v54 = vadd.f32 %v5611_v34, %v2758_v9 }
 0xcec   : > { %4111 = vmatmul.msk.f32.gmra.mxu1 %vm341_vm0, %v4095_v41 }
 0xcf2   : > { %v2785_v57 = vpop.xlane.xlu2 %2784  ;;  %v2749_v59 = vpop.xlane.xlu1 %2748 }
 0xcf3   : > { %v2807_v27 = vadd.f32 %v5611_v34, %v2785_v57  ;;  %v2795_v63 = vadd.f32 %v5611_v34, %v2749_v59 }
 0xcf4   : > { %4112 = vmatmul.msk.f32.gmra.mxu1 %vm341_vm0, %v4096_v58  ;;  %v5971_v58 = vld [vmem:[%s6318_s4] ss:$0 sm:$0xff] }
 0xcfa   : > { %v2788_v1 = vpop.xlane.xlu0 %2787 }
 0xcfb   : > { %v2808_v16 = vadd.f32 %v5611_v34, %v2788_v1 }
 0xcfc   : > { %4113 = vmatmul.msk.f32.gmra.mxu1 %vm341_vm0, %v4097_v0 }
 0xcfd   : > { %v2962_v15 = vpop.f32.mrf.mxu1 }
 0xd02   : > { %v2791_v24 = vpop.xlane.xlu2 %2790 }
 0xd03   : > { %v2809_v10 = vadd.f32 %v5611_v34, %v2791_v24 }
 0xd08   : > { %v2965_v38 = vpop.f32.mrf.mxu1 }
 0xd0a   : > { %v2794_v60 = vpop.xlane.xlu0 %2793  ;;  %v2779_v7 = vpop.xlane.xlu2 %2778 }
 0xd0b   : > { %v2810_v4 = vadd.f32 %v5611_v34, %v2794_v60  ;;  %v2805_v29 = vadd.f32 %v5611_v34, %v2779_v7 }
 0xd0d   : > { %4316 = vmatpush.lsf.msrb.mxu3 %v2810_v4 }
 0xd0f   : > { %4317 = vmatpush.lsf.msrb.mxu3 %v2809_v10 }
 0xd11   : > { %4318 = vmatpush.lsf.msrb.mxu3 %v2808_v16  ;;  %v2968_v5 = vpop.f32.mrf.mxu1 }
 0xd12   : > { %v2782_v26 = vpop.xlane.xlu0 %2781  ;;  %v2770_v55 = vpop.xlane.xlu2 %2769 }
 0xd13   : > { %v2806_v28 = vadd.f32 %v5611_v34, %v2782_v26  ;;  %4319 = vmatpush.lsf.msrb.mxu3 %v2807_v27  ;;  %v2802_v42 = vadd.f32 %v5611_v34, %v2770_v55 }
 0xd15   : > { %4320 = vmatpush.lsf.msrb.mxu3 %v2806_v28 }
 0xd17   : > { %4321 = vmatpush.lsf.msrb.mxu3 %v2805_v29 }
 0xd19   : > { %4322 = vmatpush.lsf.msrb.mxu3 %v2804_v22  ;;  %v2971_v21 = vpop.f32.mrf.mxu1 }
 0xd1a   : > { %v2773_v36 = vpop.xlane.xlu0 %2772  ;;  %v2761_v44 = vpop.xlane.xlu2 %2760 }
 0xd1b   : > { %v2803_v51 = vadd.f32 %v5611_v34, %v2773_v36  ;;  %v2799_v46 = vadd.f32 %v5611_v34, %v2761_v44 }
 0xd1d   : > { %4323 = vmatpush.lsf.msrb.mxu3 %v2803_v51 }
 0xd1f   : > { %4324 = vmatpush.lsf.msrb.mxu3 %v2802_v42 }
 0xd21   : > { %4325 = vmatpush.lsf.msrb.mxu3 %v2801_v35 }
 0xd22   : > { %v2764_v8 = vpop.xlane.xlu0 %2763  ;;  %v2752_v50 = vpop.xlane.xlu2 %2751 }
 0xd23   : > { %v2800_v23 = vadd.f32 %v5611_v34, %v2764_v8  ;;  %v2796_v52 = vadd.f32 %v5611_v34, %v2752_v50 }
 0xd25   : > { %4326 = vmatpush.lsf.msrb.mxu3 %v2800_v23 }
 0xd27   : > { %4327 = vmatpush.lsf.msrb.mxu3 %v2799_v46 }
 0xd29   : > { %4328 = vmatpush.lsf.msrb.mxu3 %v2798_v54 }
 0xd2a   : > { %v2755_v56 = vpop.xlane.xlu0 %2754 }
 0xd2b   : > { %v2797_v61 = vadd.f32 %v5611_v34, %v2755_v56  ;;  %v5921_v34 = vld [vmem:[%s6316_s2] ss:$0 sm:$0xff] }
 0xd2c   : > { %v2963_v20 = vadd.f32 %v5921_v34, %v2962_v15  ;;  %v5977_v15 = vld [vmem:[%s6319_s5] ss:$0 sm:$0xff] }
 0xd2d   : > { %4329 = vmatpush.lsf.msrb.mxu3 %v2797_v61 }
 0xd2e   : > { %v3010_v43 = vmax.f32 %v2963_v20, 0.0 }
 0xd2f   : > { %4330 = vmatpush.lsf.msrb.mxu3 %v2796_v52 }
 0xd31   : > { %4331 = vmatpush.lsf.msrb.mxu3 %v2795_v63 }
 0xd32   : > { %4332 = vllmr.1.mxu3 }
 0xd53   : > { %4333 = vmatmul.lmr.bf16.vlgmr.msra.gmra.1.mxu3 }
 0xd54   : > { %3082 = vmatpush.msra.mxu3 %v5668_v45  ;;  %v2974_v45 = vpop.f32.mrf.mxu1 }
 0xd56   : > { %3083 = vmatpush.msra.mxu3 %v5674_v12  ;;  %v2966_v12 = vadd.f32 %v5921_v34, %v2965_v38 }
 0xd58   : > { %3084 = vmatpush.msra.mxu3 %v5681_v18  ;;  %v3011_v18 = vmax.f32 %v2966_v12, 0.0 }
 0xd5a   : > { %3085 = vmatpush.msra.mxu3 %v5688_v47  ;;  %v2969_v47 = vadd.f32 %v5921_v34, %v2968_v5 }
 0xd5c   : > { %3086 = vmatpush.msra.mxu3 %v5696_v48  ;;  %v2977_v32 = vpop.f32.mrf.mxu1  ;;  %v3012_v37 = vmax.f32 %v2969_v47, 0.0  ;;  %v2972_v48 = vadd.f32 %v5921_v34, %v2971_v21 }
 0xd5d   : > { %v2978_v3 = vadd.f32 %v5921_v34, %v2977_v32 }
 0xd5e   : > { %3087 = vmatpush.msra.mxu3 %v5702_v30 }
 0xd5f   : > { %v3015_v6 = vmax.f32 %v2978_v3, 0.0 }
 0xd60   : > { %3088 = vmatpush.msra.mxu3 %v5708_v49  ;;  %v3013_v49 = vmax.f32 %v2972_v48, 0.0 }
 0xd62   : > { %3089 = vmatpush.msra.mxu3 %v5715_v2  ;;  %v2975_v2 = vadd.f32 %v5921_v34, %v2974_v45 }
 0xd63   : > { %4114 = vmatmul.msk.f32.vlgmr.msra.gmra.mxu3 %vm474_vm1, %v3010_v43 }
 0xd64   : > { %v2980_v30 = vpop.f32.mrf.mxu1  ;;  %v3014_v39 = vmax.f32 %v2975_v2, 0.0 }
 0xd65   : > { %v2981_v13 = vadd.f32 %v5921_v34, %v2980_v30 }
 0xd67   : > { %v3016_v31 = vmax.f32 %v2981_v13, 0.0 }
 0xd6b   : > { %4115 = vmatmul.msk.f32.gmra.mxu3 %vm474_vm1, %v3011_v18 }
 0xd6c   : > { %v2983_v53 = vpop.f32.mrf.mxu1 }
 0xd6d   : > { %v2984_v57 = vadd.f32 %v5921_v34, %v2983_v53 }
 0xd6f   : > { %v3017_v1 = vmax.f32 %v2984_v57, 0.0 }
 0xd73   : > { %4116 = vmatmul.msk.f32.gmra.mxu3 %vm474_vm1, %v3012_v37 }
 0xd74   : > { %v2986_v11 = vpop.f32.mrf.mxu1 }
 0xd75   : > { %v2987_v24 = vadd.f32 %v5921_v34, %v2986_v11 }
 0xd77   : > { %v3018_v60 = vmax.f32 %v2987_v24, 0.0 }
 0xd7b   : > { %4117 = vmatmul.msk.f32.gmra.mxu3 %vm474_vm1, %v3013_v49 }
 0xd7c   : > { %v2989_v25 = vpop.f32.mrf.mxu1 }
 0xd7d   : > { %v2990_v4 = vadd.f32 %v5921_v34, %v2989_v25 }
 0xd7f   : > { %v3019_v7 = vmax.f32 %v2990_v4, 0.0 }
 0xd83   : > { %4118 = vmatmul.msk.f32.gmra.mxu3 %vm474_vm1, %v3014_v39 }
 0xd84   : > { %v2992_v14 = vpop.f32.mrf.mxu1 }
 0xd85   : > { %v2993_v17 = vadd.f32 %v5921_v34, %v2992_v14 }
 0xd87   : > { %v3020_v16 = vmax.f32 %v2993_v17, 0.0 }
 0xd8b   : > { %4119 = vmatmul.msk.f32.gmra.mxu3 %vm474_vm1, %v3015_v6 }
 0xd8c   : > { %v2995_v10 = vpop.f32.mrf.mxu1 }
 0xd8d   : > { %v2996_v27 = vadd.f32 %v5921_v34, %v2995_v10 }
 0xd8f   : > { %v3021_v26 = vmax.f32 %v2996_v27, 0.0 }
 0xd93   : > { %4120 = vmatmul.msk.f32.gmra.mxu3 %vm474_vm1, %v3016_v31 }
 0xd94   : > { %v2998_v19 = vpop.f32.mrf.mxu1 }
 0xd95   : > { %v2999_v28 = vadd.f32 %v5921_v34, %v2998_v19 }
 0xd97   : > { %v3022_v33 = vmax.f32 %v2999_v28, 0.0 }
 0xd9b   : > { %4121 = vmatmul.msk.f32.gmra.mxu3 %vm474_vm1, %v3017_v1 }
 0xd9c   : > { %v3001_v29 = vpop.f32.mrf.mxu1 }
 0xd9d   : > { %v3002_v55 = vadd.f32 %v5921_v34, %v3001_v29 }
 0xd9f   : > { %v3023_v62 = vmax.f32 %v3002_v55, 0.0 }
 0xda3   : > { %4122 = vmatmul.msk.f32.gmra.mxu3 %vm474_vm1, %v3018_v60 }
 0xda4   : > { %v3004_v22 = vpop.f32.mrf.mxu1 }
 0xda5   : > { %v3005_v36 = vadd.f32 %v5921_v34, %v3004_v22 }
 0xda7   : > { %v3024_v51 = vmax.f32 %v3005_v36, 0.0 }
 0xdab   : > { %4123 = vmatmul.msk.f32.gmra.mxu3 %vm474_vm1, %v3019_v7 }
 0xdac   : > { %v3007_v42 = vpop.f32.mrf.mxu1 }
 0xdad   : > { %v3008_v40 = vadd.f32 %v5921_v34, %v3007_v42 }
 0xdaf   : > { %v3025_v44 = vmax.f32 %v3008_v40, 0.0 }
 0xdb3   : > { %4124 = vmatmul.msk.f32.gmra.mxu3 %vm474_vm1, %v3020_v16 }
 0xdbb   : > { %4125 = vmatmul.msk.f32.gmra.mxu3 %vm474_vm1, %v3021_v26 }
 0xdc3   : > { %4126 = vmatmul.msk.f32.gmra.mxu3 %vm474_vm1, %v3022_v33 }
 0xdcb   : > { %4127 = vmatmul.msk.f32.gmra.mxu3 %vm474_vm1, %v3023_v62 }
 0xdd3   : > { %4128 = vmatmul.msk.f32.gmra.mxu3 %vm474_vm1, %v3024_v51 }
 0xdd6   : > { %v2876_v35 = vpop.f32.mrf.mxu3 }
 0xdd7   : > { %2879 = vst [vmem:[%s4921_s14 + $0x5] sm:$0x1] %v2876_v35 }
 0xddb   : > { %4129 = vmatmul.msk.f32.gmra.mxu3 %vm474_vm1, %v3025_v44 }
 0xde6   : > { %v5960_v9 = vpop.f32.mrf.mxu3 }
 0xdee   : > { %v3094_v8 = vpop.f32.mrf.mxu3 }
 0xdef   : > { %v3095_v28 = vadd.f32 %v5971_v58, %v3094_v8 }
 0xdf1   : > { %v3140_v51 = vmax.f32 %v3095_v28, 0.0 }
 0xdf6   : > { %v5962_v23 = vpop.f32.mrf.mxu3 }
 0xdf7   : > { %v3098_v40 = vadd.f32 %v5971_v58, %v5962_v23 }
 0xdfe   : > { %v5964_v46 = vpop.f32.mrf.mxu3 }
 0xdff   : > { %v3101_v23 = vadd.f32 %v5971_v58, %v5964_v46 }
 0xe06   : > { %v3103_v41 = vpop.f32.mrf.mxu3 }
 0xe07   : > { %v3104_v1 = vadd.f32 %v5971_v58, %v3103_v41  ;;  %v3156_v41 = vmul.f32 %v5977_v15, %v3140_v51 }
 0xe09   : > { %v3143_v7 = vmax.f32 %v3104_v1, 0.0 }
 0xe0b   : > { %v3159_v29 = vmul.f32 %v5977_v15, %v3143_v7  ;;  %v6087_v7 = vld [vmem:[%s6321_s7] sm:$0xff] }
 0xe0d   : > { %v3183_v42 = vsel %vm623_vm2, %v3159_v29, 0.0 }
 0xe0e   : > { %v3106_v54 = vpop.f32.mrf.mxu3 }
 0xe0f   : > { %v3107_v16 = vadd.f32 %v5971_v58, %v3106_v54  ;;  %v3141_v54 = vmax.f32 %v3098_v40, 0.0 }
 0xe11   : > { %v3144_v55 = vmax.f32 %v3107_v16, 0.0 }
 0xe13   : > { %v3160_v8 = vmul.f32 %v5977_v15, %v3144_v55 }
 0xe16   : > { %v5966_v50 = vpop.f32.mrf.mxu3 }
 0xe17   : > { %v3110_v35 = vadd.f32 %v5971_v58, %v5966_v50 }
 0xe1e   : > { %v3112_v56 = vpop.f32.mrf.mxu3 }
 0xe1f   : > { %v3113_v2 = vadd.f32 %v5971_v58, %v3112_v56  ;;  %v3145_v56 = vmax.f32 %v3110_v35, 0.0 }
 0xe21   : > { %v3146_v3 = vmax.f32 %v3113_v2, 0.0  ;;  %v3161_v50 = vmul.f32 %v5977_v15, %v3145_v56  ;;  %v4131_v56 = vld [vmem:[%s4588_s26 + $0x388] sm:$0xff] }
 0xe23   : > { %v3162_v25 = vmul.f32 %v5977_v15, %v3146_v3 }
 0xe25   : > { %v3192_v4 = vsel %vm623_vm2, %v3162_v25, 0.0  ;;  %v6073_v25 = vld [vmem:[%s6321_s7 + $0x10] sm:$0xff] }
 0xe26   : > { %v3115_v61 = vpop.f32.mrf.mxu3 }
 0xe27   : > { %v3116_v31 = vadd.f32 %v5971_v58, %v3115_v61 }
 0xe29   : > { %v3147_v14 = vmax.f32 %v3116_v31, 0.0  ;;  %v6067_v31 = vld [vmem:[%s6321_s7 + $0x18] sm:$0xff] }
 0xe2b   : > { %v3163_v26 = vmul.f32 %v5977_v15, %v3147_v14  ;;  %v6080_v14 = vld [vmem:[%s6321_s7 + $0x8] sm:$0xff] }
 0xe2d   : > { %v3195_v36 = vsel %vm623_vm2, %v3163_v26, 0.0 }
 0xe2e   : > { %v3118_v59 = vpop.f32.mrf.mxu3 }
 0xe2f   : > { %v3119_v19 = vadd.f32 %v5971_v58, %v3118_v59  ;;  %v3186_v59 = vsel %vm623_vm2, %v3160_v8, 0.0  ;;  %v4409_v8 = vld [vmem:[%s6315_s1 + $0x8] sm:$0xff] }
 0xe31   : > { %v3148_v22 = vmax.f32 %v3119_v19, 0.0 }
 0xe33   : > { %v3164_v44 = vmul.f32 %v5977_v15, %v3148_v22 }
 0xe35   : > { %v3198_v61 = vsel %vm623_vm2, %v3164_v44, 0.0 }
 0xe36   : > { %v3121_v52 = vpop.f32.mrf.mxu3 }
 0xe37   : > { %v3122_v63 = vadd.f32 %v5971_v58, %v3121_v52  ;;  %v3174_v52 = vsel %vm623_vm2, %v3156_v41, 0.0  ;;  %v4410_v41 = vld [vmem:[%s6315_s1] sm:$0xff] }
 0xe39   : > { %v3149_v0 = vmax.f32 %v3122_v63, 0.0  ;;  %v3157_v63 = vmul.f32 %v5977_v15, %v3141_v54  ;;  %v4130_v54 = vld [vmem:[%s4588_s26 + $0x380] sm:$0xff] }
 0xe3b   : > { %v3165_v38 = vmul.f32 %v5977_v15, %v3149_v0  ;;  %v3142_v0 = vmax.f32 %v3101_v23, 0.0  ;;  %v4135_v23 = vld [vmem:[%s4588_s26 + $0x3a8] sm:$0xff] }
 0xe3d   : > { %v3201_v5 = vsel %vm623_vm2, %v3165_v38, 0.0  ;;  %v3189_v38 = vsel %vm623_vm2, %v3161_v50, 0.0  ;;  %v4136_v50 = vld [vmem:[%s4588_s26 + $0x3b0] sm:$0xff] }
 0xe3e   : > { %v3124_v21 = vpop.f32.mrf.mxu3  ;;  %3202 = vadd.xlane.f32.xlu1 %v3201_v5  ;;  %v3177_v5 = vsel %vm623_vm2, %v3157_v63, 0.0  ;;  %v4137_v63 = vld [vmem:[%s4588_s26 + $0x3b8] sm:$0xff] }
 0xe3f   : > { %v3125_v20 = vadd.f32 %v5971_v58, %v3124_v21  ;;  %v3092_v21 = vadd.f32 %v5971_v58, %v5960_v9  ;;  %v6039_v9 = vld [vmem:[%s6321_s7 + $0x38] sm:$0xff] }
 0xe41   : > { %v3150_v43 = vmax.f32 %v3125_v20, 0.0  ;;  %v3158_v20 = vmul.f32 %v5977_v15, %v3142_v0  ;;  %v4138_v0 = vld [vmem:[%s4588_s26 + $0x3c0] sm:$0xff] }
 0xe43   : > { %v3166_v45 = vmul.f32 %v5977_v15, %v3150_v43  ;;  %v3139_v43 = vmax.f32 %v3092_v21, 0.0  ;;  %v4141_v21 = vld [vmem:[%s4588_s26 + $0x3d8] sm:$0xff] }
 0xe45   : > { %v3204_v12 = vsel %vm623_vm2, %v3166_v45, 0.0  ;;  %v3180_v45 = vsel %vm623_vm2, %v3158_v20, 0.0  ;;  %v3155_v46 = vmul.f32 %v5977_v15, %v3139_v43  ;;  %v4142_v20 = vld [vmem:[%s4588_s26 + $0x3e0] sm:$0xff]  ;;  %v4143_v43 = vld [vmem:[%s4588_s26 + $0x3e8] sm:$0xff] }
 0xe46   : > { %v3127_v18 = vpop.f32.mrf.mxu3  ;;  %3205 = vadd.xlane.f32.xlu2 %v3204_v12 }
 0xe47   : > { %v3128_v47 = vadd.f32 %v5971_v58, %v3127_v18  ;;  %v3171_v12 = vsel %vm623_vm2, %v3155_v46, 0.0  ;;  %v6033_v18 = vld [vmem:[%s6321_s7 + $0x40] sm:$0xff]  ;;  %v4145_v46 = vld [vmem:[%s4588_s26 + $0x3f8] sm:$0xff] }
 0xe48   : > { %3290 = vmatpush.msra.mxu2 %v6033_v18 }
 0xe49   : > { %v3151_v32 = vmax.f32 %v3128_v47, 0.0 }
 0xe4a   : > { %3291 = vmatpush.msra.mxu2 %v6039_v9 }
 0xe4b   : > { %v3167_v37 = vmul.f32 %v5977_v15, %v3151_v32  ;;  %v6045_v32 = vld [vmem:[%s6321_s7 + $0x30] sm:$0xff] }
 0xe4c   : > { %3292 = vmatpush.msra.mxu2 %v6045_v32 }
 0xe4d   : > { %v3207_v48 = vsel %vm623_vm2, %v3167_v37, 0.0 }
 0xe4e   : > { %v3130_v30 = vpop.f32.mrf.mxu3  ;;  %3208 = vadd.xlane.f32.xlu0 %v3207_v48 }
 0xe4f   : > { %v3131_v49 = vadd.f32 %v5971_v58, %v3130_v30  ;;  %v6051_v30 = vld [vmem:[%s6321_s7 + $0x28] sm:$0xff] }
 0xe50   : > { %3293 = vmatpush.msra.mxu2 %v6051_v30 }
 0xe51   : > { %v3152_v39 = vmax.f32 %v3131_v49, 0.0 }
 0xe53   : > { %v3168_v53 = vmul.f32 %v5977_v15, %v3152_v39 }
 0xe55   : > { %v3210_v6 = vsel %vm623_vm2, %v3168_v53, 0.0  ;;  %v6054_v53 = vld [vmem:[#allocation2] ss:$0 sm:$0xff] }
 0xe56   : > { %v3133_v11 = vpop.f32.mrf.mxu3  ;;  %3211 = vadd.xlane.f32.xlu1 %v3210_v6  ;;  %v6060_v6 = vld [vmem:[%s6321_s7 + $0x20] sm:$0xff] }
 0xe57   : > { %v3134_v13 = vadd.f32 %v5971_v58, %v3133_v11  ;;  %3294 = vmatpush.msra.mxu2 %v6060_v6 }
 0xe59   : > { %v3153_v57 = vmax.f32 %v3134_v13, 0.0 }
 0xe5b   : > { %v3169_v24 = vmul.f32 %v5977_v15, %v3153_v57 }
 0xe5d   : > { %v3213_v60 = vsel %vm623_vm2, %v3169_v24, 0.0 }
 0xe5e   : > { %v3136_v10 = vpop.f32.mrf.mxu3  ;;  %3214 = vadd.xlane.f32.xlu2 %v3213_v60  ;;  %3193 = vadd.xlane.f32.xlu1 %v3192_v4 }
 0xe5f   : > { %v3137_v17 = vadd.f32 %v5971_v58, %v3136_v10 }
 0xe61   : > { %v3154_v27 = vmax.f32 %v3137_v17, 0.0 }
 0xe63   : > { %v3170_v33 = vmul.f32 %v5977_v15, %v3154_v27 }
 0xe65   : > { %v3216_v62 = vsel %vm623_vm2, %v3170_v33, 0.0 }
 0xe66   : > { %3217 = vadd.xlane.f32.xlu0 %v3216_v62  ;;  %3196 = vadd.xlane.f32.xlu2 %v3195_v36 }
 0xe67   : > { %3184 = vadd.xlane.f32.xlu1 %v3183_v42 }
 0xe6e   : > { %3199 = vadd.xlane.f32.xlu0 %v3198_v61  ;;  %3187 = vadd.xlane.f32.xlu2 %v3186_v59  ;;  %v4132_v61 = vld [vmem:[%s4588_s26 + $0x390] sm:$0xff]  ;;  %v4133_v59 = vld [vmem:[%s4588_s26 + $0x398] sm:$0xff] }
 0xe6f   : > { %3175 = vadd.xlane.f32.xlu1 %v3174_v52  ;;  %v4134_v52 = vld [vmem:[%s4588_s26 + $0x3a0] sm:$0xff] }
 0xe76   : > { %3190 = vadd.xlane.f32.xlu0 %v3189_v38  ;;  %3178 = vadd.xlane.f32.xlu2 %v3177_v5  ;;  %v4139_v38 = vld [vmem:[%s4588_s26 + $0x3c8] sm:$0xff]  ;;  %v4140_v5 = vld [vmem:[%s4588_s26 + $0x3d0] sm:$0xff] }
 0xe7e   : > { %3181 = vadd.xlane.f32.xlu0 %v3180_v45  ;;  %v4144_v45 = vld [vmem:[%s4588_s26 + $0x3f0] sm:$0xff]  ;;  %s4431_s26 = scalar_lea.hbm %s6322_s8, 16 }
 0xe7f   : > { %p4433_p1 = scmp.lt.s32.totalorder %s4431_s26, %s4427_s13 }
 0xe81   : > { %p4434_p2 = por %p4433_p1, %p4432_p0 }
 0xe83   : > { %p4435_p3 = pnand %p4434_p2, %p4430_p13 }
 0xe86   : > { %3172 = vadd.xlane.f32.xlu0 %v3171_v12 }
 0xeb1   : > { %v3203_v37 = vpop.xlane.xlu1 %3202 }
 0xeb2   : > { %v3229_v10 = vadd.f32 %v6054_v53, %v3203_v37 }
 0xeb9   : > { %v3206_v47 = vpop.xlane.xlu2 %3205 }
 0xeba   : > { %v3230_v4 = vadd.f32 %v6054_v53, %v3206_v47 }
 0xec1   : > { %v3209_v48 = vpop.xlane.xlu0 %3208 }
 0xec2   : > { %v3231_v24 = vadd.f32 %v6054_v53, %v3209_v48 }
 0xec9   : > { %v3212_v2 = vpop.xlane.xlu1 %3211 }
 0xeca   : > { %v3232_v57 = vadd.f32 %v6054_v53, %v3212_v2 }
 0xed1   : > { %v3215_v49 = vpop.xlane.xlu2 %3214  ;;  %v3194_v1 = vpop.xlane.xlu1 %3193 }
 0xed2   : > { %v3233_v11 = vadd.f32 %v6054_v53, %v3215_v49  ;;  %v3226_v28 = vadd.f32 %v6054_v53, %v3194_v1 }
 0xed9   : > { %v3218_v39 = vpop.xlane.xlu0 %3217  ;;  %v3197_v13 = vpop.xlane.xlu2 %3196 }
 0xeda   : > { %v3234_v3 = vadd.f32 %v6054_v53, %v3218_v39  ;;  %v3227_v19 = vadd.f32 %v6054_v53, %v3197_v13  ;;  %v3185_v27 = vpop.xlane.xlu1 %3184 }
 0xedb   : > { %v3223_v55 = vadd.f32 %v6054_v53, %v3185_v27 }
 0xedc   : > { %4253 = vmatpush.lsf.msrb.mxu2 %v3234_v3 }
 0xede   : > { %4254 = vmatpush.lsf.msrb.mxu2 %v3233_v11 }
 0xee0   : > { %3295 = vmatpush.msra.mxu2 %v6067_v31 }
 0xee1   : > { %v3200_v60 = vpop.xlane.xlu0 %3199  ;;  %v3188_v16 = vpop.xlane.xlu2 %3187 }
 0xee2   : > { %4255 = vmatpush.lsf.msrb.mxu2 %v3232_v57  ;;  %v3228_v17 = vadd.f32 %v6054_v53, %v3200_v60  ;;  %v3224_v33 = vadd.f32 %v6054_v53, %v3188_v16  ;;  %v3176_v51 = vpop.xlane.xlu1 %3175 }
 0xee3   : > { %v3220_v40 = vadd.f32 %v6054_v53, %v3176_v51 }
 0xee4   : > { %3296 = vmatpush.msra.mxu2 %v6073_v25 }
 0xee6   : > { %4256 = vmatpush.lsf.msrb.mxu2 %v3231_v24 }
 0xee8   : > { %3297 = vmatpush.msra.mxu2 %v6080_v14 }
 0xee9   : > { %v3191_v26 = vpop.xlane.xlu0 %3190  ;;  %v3179_v22 = vpop.xlane.xlu2 %3178 }
 0xeea   : > { %4257 = vmatpush.lsf.msrb.mxu2 %v3230_v4  ;;  %v3225_v29 = vadd.f32 %v6054_v53, %v3191_v26  ;;  %v3221_v42 = vadd.f32 %v6054_v53, %v3179_v22 }
 0xeec   : > { %3298 = vmatpush.msra.mxu2 %v6087_v7 }
 0xeee   : > { %4258 = vmatpush.lsf.msrb.mxu2 %v3229_v10 }
 0xef0   : > { %4259 = vmatpush.lsf.msrb.mxu2 %v3228_v17 }
 0xef1   : > { %v3182_v62 = vpop.xlane.xlu0 %3181 }
 0xef2   : > { %4260 = vmatpush.lsf.msrb.mxu2 %v3227_v19  ;;  %v3222_v36 = vadd.f32 %v6054_v53, %v3182_v62 }
 0xef4   : > { %4261 = vmatpush.lsf.msrb.mxu2 %v3226_v28 }
 0xef6   : > { %4262 = vmatpush.lsf.msrb.mxu2 %v3225_v29 }
 0xef8   : > { %4263 = vmatpush.lsf.msrb.mxu2 %v3224_v33 }
 0xef9   : > { %v3173_v35 = vpop.xlane.xlu0 %3172 }
 0xefa   : > { %4264 = vmatpush.lsf.msrb.mxu2 %v3223_v55  ;;  %v3219_v44 = vadd.f32 %v6054_v53, %v3173_v35 }
 0xefc   : > { %4265 = vmatpush.lsf.msrb.mxu2 %v3222_v36 }
 0xefe   : > { %4266 = vmatpush.lsf.msrb.mxu2 %v3221_v42 }
 0xf00   : > { %4267 = vmatpush.lsf.msrb.mxu2 %v3220_v40 }
 0xf02   : > { %4268 = vmatpush.lsf.msrb.mxu2 %v3219_v44 }
 0xf03   : > { %4269 = vllmr.1.mxu2 }
 0xf24   : > { %4270 = vmatmul.lmr.bf16.vlgmr.msra.gmra.1.mxu2 }
 0xf25   : > { %3383 = vmatpush.msra.mxu2 %v4409_v8 }
 0xf27   : > { %3384 = vmatpush.msra.mxu2 %v4410_v41 }
 0xf2c   : > { %4146 = vmatmul.msk.f32.vlgmr.msra.gmra.mxu2 %vm341_vm0, %v4130_v54 }
 0xf34   : > { %4147 = vmatmul.msk.f32.gmra.mxu2 %vm341_vm0, %v4131_v56 }
 0xf3c   : > { %4148 = vmatmul.msk.f32.gmra.mxu2 %vm341_vm0, %v4132_v61 }
 0xf44   : > { %4149 = vmatmul.msk.f32.gmra.mxu2 %vm341_vm0, %v4133_v59 }
 0xf4c   : > { %4150 = vmatmul.msk.f32.gmra.mxu2 %vm341_vm0, %v4134_v52 }
 0xf54   : > { %4151 = vmatmul.msk.f32.gmra.mxu2 %vm341_vm0, %v4135_v23 }
 0xf5c   : > { %4152 = vmatmul.msk.f32.gmra.mxu2 %vm341_vm0, %v4136_v50 }
 0xf64   : > { %4153 = vmatmul.msk.f32.gmra.mxu2 %vm341_vm0, %v4137_v63 }
 0xf6c   : > { %4154 = vmatmul.msk.f32.gmra.mxu2 %vm341_vm0, %v4138_v0 }
 0xf74   : > { %4155 = vmatmul.msk.f32.gmra.mxu2 %vm341_vm0, %v4139_v38 }
 0xf7c   : > { %4156 = vmatmul.msk.f32.gmra.mxu2 %vm341_vm0, %v4140_v5 }
 0xf84   : > { %4157 = vmatmul.msk.f32.gmra.mxu2 %vm341_vm0, %v4141_v21 }
 0xf8c   : > { %4158 = vmatmul.msk.f32.gmra.mxu2 %vm341_vm0, %v4142_v20 }
 0xf94   : > { %4159 = vmatmul.msk.f32.gmra.mxu2 %vm341_vm0, %v4143_v43 }
 0xf9c   : > { %4160 = vmatmul.msk.f32.gmra.mxu2 %vm341_vm0, %v4144_v45 }
 0xfa4   : > { %4161 = vmatmul.msk.f32.gmra.mxu2 %vm341_vm0, %v4145_v46 }
 0xfa7   : > { %v3300_v12 = vpop.f32.mrf.mxu2 }
 0xfa8   : > { %3303 = vst [vmem:[%s4921_s14 + $0x6] sm:$0x1] %v3300_v12 }
 0xfaf   : > { %v3386_v47 = vpop.f32.mrf.mxu2 }
 0xfb0   : > { %v3387_v37 = vadd.f32 %v5921_v34, %v3386_v47 }
 0xfb2   : > { %v3434_v48 = vmax.f32 %v3387_v37, 0.0 }
 0xfb4   : > { %4162 = vmatmul.msk.f32.vlgmr.msra.gmra.mxu0 %vm474_vm1, %v3434_v48 }
 0xfb7   : > { %v3389_v49 = vpop.f32.mrf.mxu2 }
 0xfb8   : > { %v3390_v2 = vadd.f32 %v5921_v34, %v3389_v49 }
 0xfba   : > { %v3435_v39 = vmax.f32 %v3390_v2, 0.0 }
 0xfbc   : > { %4163 = vmatmul.msk.f32.gmra.mxu0 %vm474_vm1, %v3435_v39 }
 0xfbf   : > { %v3392_v3 = vpop.f32.mrf.mxu2 }
 0xfc0   : > { %v3393_v11 = vadd.f32 %v5921_v34, %v3392_v3 }
 0xfc2   : > { %v3436_v13 = vmax.f32 %v3393_v11, 0.0 }
 0xfc4   : > { %4164 = vmatmul.msk.f32.gmra.mxu0 %vm474_vm1, %v3436_v13 }
 0xfc7   : > { %v3395_v57 = vpop.f32.mrf.mxu2 }
 0xfc8   : > { %v3396_v1 = vadd.f32 %v5921_v34, %v3395_v57 }
 0xfca   : > { %v3437_v24 = vmax.f32 %v3396_v1, 0.0 }
 0xfcc   : > { %4165 = vmatmul.msk.f32.gmra.mxu0 %vm474_vm1, %v3437_v24 }
 0xfcf   : > { %v3398_v60 = vpop.f32.mrf.mxu2 }
 0xfd0   : > { %v3399_v4 = vadd.f32 %v5921_v34, %v3398_v60 }
 0xfd2   : > { %v3438_v10 = vmax.f32 %v3399_v4, 0.0 }
 0xfd4   : > { %4166 = vmatmul.msk.f32.gmra.mxu0 %vm474_vm1, %v3438_v10 }
 0xfd7   : > { %v3401_v17 = vpop.f32.mrf.mxu2 }
 0xfd8   : > { %v3402_v16 = vadd.f32 %v5921_v34, %v3401_v17 }
 0xfda   : > { %v3439_v19 = vmax.f32 %v3402_v16, 0.0 }
 0xfdc   : > { %4167 = vmatmul.msk.f32.gmra.mxu0 %vm474_vm1, %v3439_v19 }
 0xfdf   : > { %v3404_v27 = vpop.f32.mrf.mxu2 }
 0xfe0   : > { %v3405_v26 = vadd.f32 %v5921_v34, %v3404_v27 }
 0xfe2   : > { %v3440_v28 = vmax.f32 %v3405_v26, 0.0 }
 0xfe4   : > { %4168 = vmatmul.msk.f32.gmra.mxu0 %vm474_vm1, %v3440_v28 }
 0xfe7   : > { %v3407_v29 = vpop.f32.mrf.mxu2 }
 0xfe8   : > { %v3408_v33 = vadd.f32 %v5921_v34, %v3407_v29 }
 0xfea   : > { %v3441_v55 = vmax.f32 %v3408_v33, 0.0 }
 0xfec   : > { %4169 = vmatmul.msk.f32.gmra.mxu0 %vm474_vm1, %v3441_v55 }
 0xfef   : > { %v3410_v22 = vpop.f32.mrf.mxu2 }
 0xff0   : > { %v3411_v62 = vadd.f32 %v5921_v34, %v3410_v22 }
 0xff2   : > { %v3442_v36 = vmax.f32 %v3411_v62, 0.0 }
 0xff4   : > { %4170 = vmatmul.msk.f32.gmra.mxu0 %vm474_vm1, %v3442_v36 }
 0xff7   : > { %v3413_v51 = vpop.f32.mrf.mxu2 }
 0xff8   : > { %v3414_v42 = vadd.f32 %v5921_v34, %v3413_v51 }
 0xffa   : > { %v3443_v40 = vmax.f32 %v3414_v42, 0.0 }
 0xffc   : > { %4171 = vmatmul.msk.f32.gmra.mxu0 %vm474_vm1, %v3443_v40 }
 0xfff   : > { %v3416_v35 = vpop.f32.mrf.mxu2 }
0x1000   : > { %v3417_v44 = vadd.f32 %v5921_v34, %v3416_v35 }
0x1002   : > { %v3444_v8 = vmax.f32 %v3417_v44, 0.0 }
0x1004   : > { %4172 = vmatmul.msk.f32.gmra.mxu0 %vm474_vm1, %v3444_v8 }
0x1007   : > { %v3419_v41 = vpop.f32.mrf.mxu2 }
0x1008   : > { %v3420_v54 = vadd.f32 %v5921_v34, %v3419_v41 }
0x100a   : > { %v3445_v56 = vmax.f32 %v3420_v54, 0.0 }
0x100c   : > { %4173 = vmatmul.msk.f32.gmra.mxu0 %vm474_vm1, %v3445_v56 }
0x100f   : > { %v3422_v61 = vpop.f32.mrf.mxu2 }
0x1010   : > { %v3423_v59 = vadd.f32 %v5921_v34, %v3422_v61 }
0x1012   : > { %v3446_v52 = vmax.f32 %v3423_v59, 0.0 }
0x1014   : > { %4174 = vmatmul.msk.f32.gmra.mxu0 %vm474_vm1, %v3446_v52 }
0x1017   : > { %v3425_v23 = vpop.f32.mrf.mxu2 }
0x1018   : > { %v3426_v50 = vadd.f32 %v5921_v34, %v3425_v23 }
0x101a   : > { %v3447_v63 = vmax.f32 %v3426_v50, 0.0 }
0x101c   : > { %4175 = vmatmul.msk.f32.gmra.mxu0 %vm474_vm1, %v3447_v63 }
0x101f   : > { %v3428_v0 = vpop.f32.mrf.mxu2 }
0x1020   : > { %v3429_v38 = vadd.f32 %v5921_v34, %v3428_v0 }
0x1022   : > { %v3448_v5 = vmax.f32 %v3429_v38, 0.0 }
0x1024   : > { %4176 = vmatmul.msk.f32.gmra.mxu0 %vm474_vm1, %v3448_v5 }
0x1027   : > { %v3431_v21 = vpop.f32.mrf.mxu2 }
0x1028   : > { %v3432_v20 = vadd.f32 %v5921_v34, %v3431_v21 }
0x102a   : > { %v3449_v43 = vmax.f32 %v3432_v20, 0.0 }
0x102c   : > { %4177 = vmatmul.msk.f32.gmra.mxu0 %vm474_vm1, %v3449_v43 }
0x1031   : > { %v6173_v45 = vpop.f32.mrf.mxu0 }
0x1039   : > { %v3518_v46 = vpop.f32.mrf.mxu0 }
0x103a   : > { %v3519_v21 = vadd.f32 %v5971_v58, %v3518_v46  ;;  %v3673_v46 = vld [vmem:[%s6321_s7 + $0x70] sm:$0xff] }
0x1041   : > { %v6175_v12 = vpop.f32.mrf.mxu0 }
0x1049   : > { %v6177_v47 = vpop.f32.mrf.mxu0 }
0x1051   : > { %v3527_v37 = vpop.f32.mrf.mxu0 }
0x1052   : > { %v3528_v41 = vadd.f32 %v5971_v58, %v3527_v37 }
0x1054   : > { %v3567_v52 = vmax.f32 %v3528_v41, 0.0 }
0x1056   : > { %v3583_v20 = vmul.f32 %v5977_v15, %v3567_v52 }
0x1059   : > { %v3530_v48 = vpop.f32.mrf.mxu0 }
0x105a   : > { %v3531_v63 = vadd.f32 %v5971_v58, %v3530_v48  ;;  %v3607_v48 = vsel %vm623_vm2, %v3583_v20, 0.0 }
0x105c   : > { %v3568_v37 = vmax.f32 %v3531_v63, 0.0 }
0x1061   : > { %v6179_v49 = vpop.f32.mrf.mxu0 }
0x1069   : > { %v3536_v2 = vpop.f32.mrf.mxu0 }
0x106a   : > { %v3537_v55 = vadd.f32 %v5971_v58, %v3536_v2 }
0x106c   : > { %v3570_v36 = vmax.f32 %v3537_v55, 0.0  ;;  %v3516_v55 = vadd.f32 %v5971_v58, %v6173_v45  ;;  %v3669_v45 = vld [vmem:[%s6321_s7 + $0x50] sm:$0xff] }
0x106e   : > { %v3586_v35 = vmul.f32 %v5977_v15, %v3570_v36 }
0x1070   : > { %v3616_v59 = vsel %vm623_vm2, %v3586_v35, 0.0 }
0x1071   : > { %v3539_v39 = vpop.f32.mrf.mxu0 }
0x1072   : > { %v3540_v44 = vadd.f32 %v5971_v58, %v3539_v39 }
0x1074   : > { %v3571_v56 = vmax.f32 %v3540_v44, 0.0 }
0x1076   : > { %v3587_v5 = vmul.f32 %v5977_v15, %v3571_v56 }
0x1079   : > { %v3542_v3 = vpop.f32.mrf.mxu0 }
0x107a   : > { %v3543_v0 = vadd.f32 %v5971_v58, %v3542_v3  ;;  %v3674_v3 = vld [vmem:[%s6321_s7 + $0x78] sm:$0xff] }
0x107b   : > { %3707 = vmatpush.msra.mxu1 %v3674_v3 }
0x107c   : > { %v3572_v2 = vmax.f32 %v3543_v0, 0.0 }
0x107d   : > { %3708 = vmatpush.msra.mxu1 %v3673_v46 }
0x1081   : > { %v3545_v11 = vpop.f32.mrf.mxu0 }
0x1082   : > { %v3546_v34 = vadd.f32 %v5971_v58, %v3545_v11  ;;  %v3619_v11 = vsel %vm623_vm2, %v3587_v5, 0.0 }
0x1084   : > { %v3573_v13 = vmax.f32 %v3546_v34, 0.0  ;;  %v3564_v34 = vmax.f32 %v3519_v21, 0.0 }
0x1086   : > { %v3589_v57 = vmul.f32 %v5977_v15, %v3573_v13  ;;  %v3672_v13 = vld [vmem:[%s6321_s7 + $0x68] sm:$0xff] }
0x1087   : > { %3709 = vmatpush.msra.mxu1 %v3672_v13 }
0x1088   : > { %v3625_v1 = vsel %vm623_vm2, %v3589_v57, 0.0  ;;  %v3522_v57 = vadd.f32 %v5971_v58, %v6175_v12 }
0x1089   : > { %v3548_v24 = vpop.f32.mrf.mxu0  ;;  %3626 = vadd.xlane.f32.xlu0 %v3625_v1  ;;  %v3534_v1 = vadd.f32 %v5971_v58, %v6179_v49  ;;  %v3525_v49 = vadd.f32 %v5971_v58, %v6177_v47 }
0x108a   : > { %v3549_v60 = vadd.f32 %v5971_v58, %v3548_v24  ;;  %v3588_v24 = vmul.f32 %v5977_v15, %v3572_v2 }
0x108c   : > { %v3574_v4 = vmax.f32 %v3549_v60, 0.0  ;;  %v3584_v60 = vmul.f32 %v5977_v15, %v3568_v37 }
0x108e   : > { %v3590_v10 = vmul.f32 %v5977_v15, %v3574_v4  ;;  %v3580_v4 = vmul.f32 %v5977_v15, %v3564_v34 }
0x1090   : > { %v3628_v17 = vsel %vm623_vm2, %v3590_v10, 0.0  ;;  %v3565_v10 = vmax.f32 %v3522_v57, 0.0  ;;  %v3598_v12 = vsel %vm623_vm2, %v3580_v4, 0.0 }
0x1091   : > { %v3551_v16 = vpop.f32.mrf.mxu0  ;;  %3629 = vadd.xlane.f32.xlu1 %v3628_v17  ;;  %v3569_v17 = vmax.f32 %v3534_v1, 0.0 }
0x1092   : > { %v3552_v19 = vadd.f32 %v5971_v58, %v3551_v16  ;;  %v3622_v16 = vsel %vm623_vm2, %v3588_v24, 0.0 }
0x1094   : > { %v3575_v27 = vmax.f32 %v3552_v19, 0.0  ;;  %v3610_v19 = vsel %vm623_vm2, %v3584_v60, 0.0 }
0x1096   : > { %v3591_v26 = vmul.f32 %v5977_v15, %v3575_v27  ;;  %v3585_v27 = vmul.f32 %v5977_v15, %v3569_v17 }
0x1098   : > { %v3631_v28 = vsel %vm623_vm2, %v3591_v26, 0.0  ;;  %v3581_v26 = vmul.f32 %v5977_v15, %v3565_v10 }
0x1099   : > { %v3554_v29 = vpop.f32.mrf.mxu0  ;;  %3632 = vadd.xlane.f32.xlu2 %v3631_v28  ;;  %v3566_v28 = vmax.f32 %v3525_v49, 0.0 }
0x109a   : > { %v3555_v33 = vadd.f32 %v5971_v58, %v3554_v29  ;;  %v3613_v29 = vsel %vm623_vm2, %v3585_v27, 0.0 }
0x109c   : > { %v3576_v22 = vmax.f32 %v3555_v33, 0.0  ;;  %v3601_v33 = vsel %vm623_vm2, %v3581_v26, 0.0 }
0x109e   : > { %v3592_v62 = vmul.f32 %v5977_v15, %v3576_v22  ;;  %v3582_v22 = vmul.f32 %v5977_v15, %v3566_v28 }
0x10a0   : > { %v3634_v51 = vsel %vm623_vm2, %v3592_v62, 0.0  ;;  %v3563_v62 = vmax.f32 %v3516_v55, 0.0  ;;  %v3604_v36 = vsel %vm623_vm2, %v3582_v22, 0.0 }
0x10a1   : > { %v3557_v42 = vpop.f32.mrf.mxu0  ;;  %3635 = vadd.xlane.f32.xlu0 %v3634_v51 }
0x10a2   : > { %v3558_v40 = vadd.f32 %v5971_v58, %v3557_v42  ;;  %v3579_v47 = vmul.f32 %v5977_v15, %v3563_v62  ;;  %v3671_v42 = vld [vmem:[%s6321_s7 + $0x60] sm:$0xff] }
0x10a3   : > { %3710 = vmatpush.msra.mxu1 %v3671_v42 }
0x10a4   : > { %v3577_v8 = vmax.f32 %v3558_v40, 0.0  ;;  %v3595_v51 = vsel %vm623_vm2, %v3579_v47, 0.0 }
0x10a6   : > { %v3593_v54 = vmul.f32 %v5977_v15, %v3577_v8 }
0x10a8   : > { %v3637_v61 = vsel %vm623_vm2, %v3593_v54, 0.0 }
0x10a9   : > { %v3560_v23 = vpop.f32.mrf.mxu0  ;;  %3638 = vadd.xlane.f32.xlu1 %v3637_v61  ;;  %3617 = vadd.xlane.f32.xlu0 %v3616_v59 }
0x10aa   : > { %v3561_v50 = vadd.f32 %v5971_v58, %v3560_v23  ;;  %v3670_v58 = vld [vmem:[%s6321_s7 + $0x58] sm:$0xff] }
0x10ab   : > { %3711 = vmatpush.msra.mxu1 %v3670_v58 }
0x10ac   : > { %v3578_v38 = vmax.f32 %v3561_v50, 0.0 }
0x10ad   : > { %3712 = vmatpush.msra.mxu1 %v3669_v45 }
0x10ae   : > { %v3594_v43 = vmul.f32 %v5977_v15, %v3578_v38  ;;  %v3668_v15 = vld [vmem:[%s6321_s7 + $0x48] sm:$0xff] }
0x10af   : > { %3713 = vmatpush.msra.mxu1 %v3668_v15 }
0x10b0   : > { %v3640_v39 = vsel %vm623_vm2, %v3594_v43, 0.0 }
0x10b1   : > { %3641 = vadd.xlane.f32.xlu2 %v3640_v39  ;;  %3620 = vadd.xlane.f32.xlu1 %v3619_v11 }
0x10b2   : > { %3608 = vadd.xlane.f32.xlu0 %v3607_v48  ;;  %3714 = vmatpush.msra.mxu1 %v6033_v18 }
0x10b4   : > { %3715 = vmatpush.msra.mxu1 %v6039_v9 }
0x10b6   : > { %3716 = vmatpush.msra.mxu1 %v6045_v32 }
0x10b8   : > { %3717 = vmatpush.msra.mxu1 %v6051_v30 }
0x10b9   : > { %3623 = vadd.xlane.f32.xlu2 %v3622_v16  ;;  %3611 = vadd.xlane.f32.xlu1 %v3610_v19 }
0x10ba   : > { %3599 = vadd.xlane.f32.xlu0 %v3598_v12  ;;  %3718 = vmatpush.msra.mxu1 %v6060_v6 }
0x10bc   : > { %3719 = vmatpush.msra.mxu1 %v6067_v31 }
0x10be   : > { %3720 = vmatpush.msra.mxu1 %v6073_v25 }
0x10c0   : > { %3721 = vmatpush.msra.mxu1 %v6080_v14 }
0x10c1   : > { %3614 = vadd.xlane.f32.xlu2 %v3613_v29  ;;  %3602 = vadd.xlane.f32.xlu1 %v3601_v33 }
0x10c2   : > { %3722 = vmatpush.msra.mxu1 %v6087_v7 }
0x10c9   : > { %3605 = vadd.xlane.f32.xlu2 %v3604_v36 }
0x10d1   : > { %3596 = vadd.xlane.f32.xlu2 %v3595_v51 }
0x10fc   : > { %v3627_v35 = vpop.xlane.xlu0 %3626 }
0x10fd   : > { %v3653_v54 = vadd.f32 %v6054_v53, %v3627_v35 }
0x1104   : > { %v3630_v40 = vpop.xlane.xlu1 %3629 }
0x1105   : > { %v3654_v41 = vadd.f32 %v6054_v53, %v3630_v40 }
0x110c   : > { %v3633_v44 = vpop.xlane.xlu2 %3632 }
0x110d   : > { %v3655_v14 = vadd.f32 %v6054_v53, %v3633_v44 }
0x1114   : > { %v3636_v8 = vpop.xlane.xlu0 %3635 }
0x1115   : > { %v3656_v31 = vadd.f32 %v6054_v53, %v3636_v8 }
0x111c   : > { %v3639_v18 = vpop.xlane.xlu1 %3638  ;;  %v3618_v25 = vpop.xlane.xlu0 %3617 }
0x111d   : > { %v3657_v30 = vadd.f32 %v6054_v53, %v3639_v18  ;;  %v3650_v50 = vadd.f32 %v6054_v53, %v3618_v25 }
0x1124   : > { %v3642_v9 = vpop.xlane.xlu2 %3641  ;;  %v3621_v6 = vpop.xlane.xlu1 %3620 }
0x1125   : > { %v3658_v32 = vadd.f32 %v6054_v53, %v3642_v9  ;;  %v3651_v59 = vadd.f32 %v6054_v53, %v3621_v6  ;;  %v3609_v52 = vpop.xlane.xlu0 %3608 }
0x1126   : > { %v3647_v38 = vadd.f32 %v6054_v53, %v3609_v52 }
0x1127   : > { %4229 = vmatpush.lsf.msrb.mxu1 %v3658_v32 }
0x1129   : > { %4230 = vmatpush.lsf.msrb.mxu1 %v3657_v30 }
0x112b   : > { %4231 = vmatpush.lsf.msrb.mxu1 %v3656_v31 }
0x112c   : > { %v3624_v7 = vpop.xlane.xlu2 %3623  ;;  %v3612_v61 = vpop.xlane.xlu1 %3611 }
0x112d   : > { %4232 = vmatpush.lsf.msrb.mxu1 %v3655_v14  ;;  %v3652_v56 = vadd.f32 %v6054_v53, %v3624_v7  ;;  %v3648_v0 = vadd.f32 %v6054_v53, %v3612_v61  ;;  %v3600_v43 = vpop.xlane.xlu0 %3599 }
0x112e   : > { %v3644_v2 = vadd.f32 %v6054_v53, %v3600_v43 }
0x112f   : > { %4233 = vmatpush.lsf.msrb.mxu1 %v3654_v41 }
0x1131   : > { %4234 = vmatpush.lsf.msrb.mxu1 %v3653_v54 }
0x1133   : > { %4235 = vmatpush.lsf.msrb.mxu1 %v3652_v56 }
0x1134   : > { %v3615_v23 = vpop.xlane.xlu2 %3614  ;;  %v3603_v5 = vpop.xlane.xlu1 %3602 }
0x1135   : > { %4236 = vmatpush.lsf.msrb.mxu1 %v3651_v59  ;;  %v3649_v63 = vadd.f32 %v6054_v53, %v3615_v23  ;;  %v3645_v37 = vadd.f32 %v6054_v53, %v3603_v5 }
0x1137   : > { %4237 = vmatpush.lsf.msrb.mxu1 %v3650_v50 }
0x1139   : > { %4238 = vmatpush.lsf.msrb.mxu1 %v3649_v63 }
0x113b   : > { %4239 = vmatpush.lsf.msrb.mxu1 %v3648_v0 }
0x113c   : > { %v3606_v21 = vpop.xlane.xlu2 %3605 }
0x113d   : > { %v3646_v20 = vadd.f32 %v6054_v53, %v3606_v21  ;;  %4240 = vmatpush.lsf.msrb.mxu1 %v3647_v38 }
0x113f   : > { %4241 = vmatpush.lsf.msrb.mxu1 %v3646_v20 }
0x1141   : > { %4242 = vmatpush.lsf.msrb.mxu1 %v3645_v37 }
0x1143   : > { %4243 = vmatpush.lsf.msrb.mxu1 %v3644_v2 }
0x1144   : > { %v3597_v39 = vpop.xlane.xlu2 %3596 }
0x1145   : > { %v3643_v11 = vadd.f32 %v6054_v53, %v3597_v39 }
0x1147   : > { %4244 = vmatpush.lsf.msrb.mxu1 %v3643_v11 }
0x1148   : > { %4245 = vllmr.1.mxu1 }
0x1169   : > { %4246 = vmatmul.lmr.bf16.vlgmr.msra.gmra.1.mxu1 }
0x11e6   : > { %v3724_v34 = vpop.f32.mrf.mxu1 }
0x11e7   : > { %3727 = vst [vmem:[%s4921_s14 + $0x7] sm:$0x1] %v3724_v34 }
0x11e8   : > { %4438 = shalt.err (!%p4435_p3)
}
0x11e9   : > { %4334 = dma.vmem_to_hbm [thread:$0]  (%p4568_p5), %s3742_s24, 128, %s3744_s25, %s3729_s27  }
0x11ea PF: > { %p4340_p4 = scmp.ge.s32.totalorder %s4473_s10, 2  ;;  %s3755_s11 = sand.u32 1, %s4461_s29  }
0x11eb   : > { %s3756_s14 = scalar_lea.sflag [#allocation4], %s3755_s11 }
0x11ec   : > { %p4337_p7 = pnand %p4340_p4, %p4572_p6 }
0x11ee   : > { %p4338_p8 = pneg %p4337_p7 }
0x11f0   : > { %4456 = dma.done.wait (%p4338_p8), %s3756_s14, 128  }
0x11f1   : > { %4458 = vsyncadd (%p4338_p8), %s3756_s14, 4294967168  ;;  %p20_p9 = scmp.ge.s32.totalorder %s4555_s12, 4   ;;  %s6325_s29 = smov %s4465_s30 }
0x11f2   : > { %s6326_s30 = smov %s4469_s9  ;;  %s6327_s9 = smov %s4566_s15 }
0x11f3   : > { %s6328_s10 = smov %s4555_s12  ;;  %22 = sbr.rel (!%p20_p9) target bundleno = 6 (0x6), region = 94 }
0x11f8   :  { %3762 = vsyncpa [#allocation4], 1 }
0x11f9   :  { %3764 = vsyncpa [#allocation4 + $0x1], 1 }

</bundles_post_ra>
